<compile_context>
chip_gen: v5e
topology: v5e:2x2
jax: 0.10.0
libtpu: 0.0.40
codegen_flags: <defaults>
</compile_context>

<pallas_src>
import functools

import numpy as np
import jax
import jax.numpy as jnp
from jax.experimental import pallas as pl
from jax.experimental.pallas import tpu as pltpu


MXU_DTYPE = jnp.bfloat16   # matmul operand dtype (accumulation stays f32)
CPAD = 8                   # every channel axis is padded to 8 sublanes
KPAD = 256                 # lane width of the packed weight slab (>= max K=216)


# ------------------------------------------------------------------ kernel

def _megakernel(H, W, slots, data_ref, mask_ref, w_ref, b_ref, y_ref, e_ref):
    """Whole Module_2_1 forward (minus FFT / resize) for one pixel block."""
    f32 = jnp.float32
    N = data_ref.shape[1]                       # pixels in this block (lanes)
    SHIFTS = tuple(dh * W + dw for dh in (-1, 0, 1) for dw in (-1, 0, 1))

    FI = data_ref[0:CPAD, :]                    # (8, N)  X, zero-padded rows
    prior = data_ref[CPAD:CPAD + 1, :]          # (1, N)  resized prior_cam
    pfa = data_ref[CPAD + 1:CPAD + 2, :]        # (1, N)  |fft2(prior_cam)|

    def sigmoid(v):
        return pl.reciprocal(1.0 + jnp.exp(-v), approx=False)

    def act_fn(a, act):
        if act == "relu":
            return jnp.maximum(a, 0.0)
        if act == "sigmoid":
            return sigmoid(a)
        return a

    def weight(slot, k):
        # 8-sublane-aligned static slice of the f32 weight slab, cast once.
        return w_ref[slot * CPAD:(slot + 1) * CPAD, :k].astype(MXU_DTYPE)

    def bias(slot):
        return b_ref[slot * CPAD:(slot + 1) * CPAD, :]      # (8, 1) f32

    def taps(x):
        # (8, N) activation -> (72, N) stacked shifted + boundary-masked taps.
        slabs = []
        for t, s in enumerate(SHIFTS):
            if s == 0:                                   # centre tap: mask==1
                slabs.append(x)
            else:
                r = pltpu.roll(x, shift=(-s) % N, axis=1)
                slabs.append(r * mask_ref[t * CPAD:(t + 1) * CPAD, :])
        return jnp.concatenate(slabs, axis=0)            # (72, N) f32

    def conv3(xs, name, act=None):
        slot = slots[name]
        if len(xs) == 1:
            op = taps(xs[0])
        else:
            op = jnp.concatenate([taps(x) for x in xs], axis=0)
        y = jnp.dot(weight(slot, 72 * len(xs)), op.astype(MXU_DTYPE),
                    preferred_element_type=f32)
        return act_fn(y + bias(slot), act)                # (8, N)

    def conv1(xs, name, act=None):
        slot = slots[name]
        op = xs[0] if len(xs) == 1 else jnp.concatenate(xs, axis=0)
        y = jnp.dot(weight(slot, CPAD * len(xs)), op.astype(MXU_DTYPE),
                    preferred_element_type=f32)
        return act_fn(y + bias(slot), act)                # (8, N)

    # ---------------- HIM -------------------------------------------------
    # TODO(synk): the HIM submodule is not defined in the provided source;
    # approximated as yt = FI + expand(prior_cam) so the rest stays faithful.
    yt = FI + prior

    # ---------------- Edge_EH(yt) -----------------------------------------
    h = conv1([yt], "e_c0_1")
    h = conv3([h], "e_c0_2")
    h = conv1([h], "e_c0_3", act="relu")
    a = conv3([h], "e_sa1", act="relu")
    a = conv3([a], "e_sa2", act="sigmoid")
    x1 = h * a[0:1, :]                                    # SA gate (row 0)

    g = conv1([yt], "e_c1_1")
    g = conv3([g], "e_c1_2")
    g = conv1([g], "e_c1_3", act="relu")
    g = conv1([g], "e_c_1")
    g = conv3([g], "e_c_2")
    x2 = conv3([g], "e_c_3", act="relu")

    out_edge = conv1([x1, x2], "e_out", act="relu")       # 1x1 over cat(x1,x2)

    # ---------------- edge head + edge_enhance ------------------------------
    e = conv3([out_edge], "oe1")
    e = conv3([e], "oe2", act="relu")
    e = conv3([e], "oe3")[0:1, :]                         # (1, N)

    mh = mask_ref[72:73, :]                               # 1.0 where h < H-1
    mw = mask_ref[73:74, :]                               # 1.0 where w < W-1
    down = pltpu.roll(e, shift=(-W) % N, axis=1)          # e at (h+1, w)
    gv = mh * jnp.abs(e - down) + (1.0 - mh) * e
    right = pltpu.roll(gv, shift=(N - 1) % N, axis=1)     # gv at (h, w+1)
    gh = mw * jnp.abs(gv - right) + (1.0 - mw) * gv
    edge = jnp.clip(e - gh, 0.0, 1.0)

    # ---------------- conv3(yt) + spectral branch ---------------------------
    t = conv1([yt], "c3_1")
    t = conv3([t], "c3_2")
    yt_t = conv3([t], "c3_3", act="relu")
    # |ifft2(fft2(yt))| == |yt| (yt is real, no spectral op in between), so no
    # FFT round-trip is needed here.
    yt_f = jnp.maximum(jnp.abs(yt) * bias(slots["norm_scale"])
                       + bias(slots["norm_shift"]), 0.0)
    yt_out = yt_t + yt_f

    # y_r = ((1 - sigmoid(prior)) + (1 - sigmoid(|fft2(prior)|))) * FI
    r = (1.0 - sigmoid(prior)) + (1.0 - sigmoid(pfa))     # (1, N)
    y_r = r * FI

    # ---------------- self.out(cat([out_edge, y_r, yt_out])) + prior --------
    o = conv3([out_edge, y_r, yt_out], "o1")
    o = conv3([o], "o2", act="relu")
    o = conv3([o], "o3")[0:1, :]                          # (1, N)

    y_ref[...] = o + prior
    e_ref[...] = edge


# ------------------------------------------------------------ param prep

def init_params(key, C, mid):
    keys = iter(jax.random.split(key, 64))

    def conv(cout, cin, k):
        k1, k2 = jax.random.split(next(keys))
        bound = 1.0 / np.sqrt(cin * k * k)
        w = jax.random.uniform(k1, (cout, cin, k, k), jnp.float32, -bound, bound)
        b = jax.random.uniform(k2, (cout,), jnp.float32, -bound, bound)
        return (w, b)

    def bn(c):
        k1, k2 = jax.random.split(next(keys))
        gamma = 1.0 + 0.1 * jax.random.normal(k1, (c,), jnp.float32)
        beta = 0.1 * jax.random.normal(k2, (c,), jnp.float32)
        return (gamma, beta, jnp.zeros((c,), jnp.float32),
                jnp.ones((c,), jnp.float32))

    p = {}
    p["o1"] = conv(mid, C * 3, 3); p["o1_bn"] = bn(mid)
    p["o2"] = conv(mid // 2, mid, 3); p["o2_bn"] = bn(mid // 2)
    p["o3"] = conv(1, mid // 2, 3)
    p["c3_1"] = conv(C * 2, C, 1); p["c3_1_bn"] = bn(C * 2)
    p["c3_2"] = conv(C * 2, C * 2, 3); p["c3_2_bn"] = bn(C * 2)
    p["c3_3"] = conv(C, C * 2, 3); p["c3_3_bn"] = bn(C)
    p["oe1"] = conv(mid // 2, C, 3); p["oe1_bn"] = bn(mid // 2)
    p["oe2"] = conv(mid // 4, mid // 2, 3); p["oe2_bn"] = bn(mid // 4)
    p["oe3"] = conv(1, mid // 4, 3)
    p["norm_bn"] = bn(C)
    e = {}
    e["c0_1"] = conv(C * 2, C, 1); e["c0_1_bn"] = bn(C * 2)
    e["c0_2"] = conv(C, C * 2, 3); e["c0_2_bn"] = bn(C)
    e["c0_3"] = conv(C, C, 1); e["c0_3_bn"] = bn(C)
    e["c1_1"] = conv(C * 2, C, 1); e["c1_1_bn"] = bn(C * 2)
    e["c1_2"] = conv(C, C * 2, 3); e["c1_2_bn"] = bn(C)
    e["c1_3"] = conv(C, C, 1); e["c1_3_bn"] = bn(C)
    e["c_1"] = conv(C * 2, C, 1); e["c_1_bn"] = bn(C * 2)
    e["c_2"] = conv(C, C * 2, 3); e["c_2_bn"] = bn(C)
    e["c_3"] = conv(C, C, 3); e["c_3_bn"] = bn(C)
    e["sa1"] = conv(max(C // 4, 1), C, 3)
    e["sa2"] = conv(1, max(C // 4, 1), 3)
    e["out"] = conv(C, C * 2, 1); e["out_bn"] = bn(C)
    p["edge"] = e
    return p


def _pack_conv(wb, bn, k, splits, eps):
    """Fold BN, re-lay weight into the stacked-tap (8, K) matmul layout."""
    w = np.asarray(wb[0], np.float32)
    b = np.asarray(wb[1], np.float32)
    if bn is not None:
        gamma, beta, mean, var = [np.asarray(a, np.float32) for a in bn]
        s = gamma / np.sqrt(var + eps)
        w = w * s[:, None, None, None]
        b = (b - mean) * s + beta
    cout = w.shape[0]
    assert cout <= CPAD and all(c <= CPAD for c in splits)
    P = len(splits)
    if k == 3:
        K = P * 9 * CPAD
        wk = np.zeros((CPAD, K), np.float32)
        off = 0
        for pi, cin in enumerate(splits):
            wp = w[:, off:off + cin]                     # (cout, cin, 3, 3)
            off += cin
            for t in range(9):                           # tap order == kernel
                col = pi * 9 * CPAD + t * CPAD
                wk[:cout, col:col + cin] = wp[:, :, t // 3, t % 3]
    else:
        K = P * CPAD
        wk = np.zeros((CPAD, K), np.float32)
        off = 0
        for pi, cin in enumerate(splits):
            wk[:cout, pi * CPAD:pi * CPAD + cin] = w[:, off:off + cin, 0, 0]
            off += cin
    bb = np.zeros((CPAD, 1), np.float32)
    bb[:cout, 0] = b
    return wk, bb


def prepare_params(p, C, mid, eps=1e-5):
    """BN folding + packing of every parameter into two aligned slabs."""
    e = p["edge"]
    conv_defs = [
        ("e_c0_1", e["c0_1"], e["c0_1_bn"], 1, [C]),
        ("e_c0_2", e["c0_2"], e["c0_2_bn"], 3, [2 * C]),
        ("e_c0_3", e["c0_3"], e["c0_3_bn"], 1, [C]),
        ("e_c1_1", e["c1_1"], e["c1_1_bn"], 1, [C]),
        ("e_c1_2", e["c1_2"], e["c1_2_bn"], 3, [2 * C]),
        ("e_c1_3", e["c1_3"], e["c1_3_bn"], 1, [C]),
        ("e_c_1", e["c_1"], e["c_1_bn"], 1, [C]),
        ("e_c_2", e["c_2"], e["c_2_bn"], 3, [2 * C]),
        ("e_c_3", e["c_3"], e["c_3_bn"], 3, [C]),
        ("e_sa1", e["sa1"], None, 3, [C]),
        ("e_sa2", e["sa2"], None, 3, [max(C // 4, 1)]),
        ("e_out", e["out"], e["out_bn"], 1, [C, C]),
        ("oe1", p["oe1"], p["oe1_bn"], 3, [C]),
        ("oe2", p["oe2"], p["oe2_bn"], 3, [mid // 2]),
        ("oe3", p["oe3"], None, 3, [mid // 4]),
        ("c3_1", p["c3_1"], p["c3_1_bn"], 1, [C]),
        ("c3_2", p["c3_2"], p["c3_2_bn"], 3, [2 * C]),
        ("c3_3", p["c3_3"], p["c3_3_bn"], 3, [2 * C]),
        ("o1", p["o1"], p["o1_bn"], 3, [C, C, C]),
        ("o2", p["o2"], p["o2_bn"], 3, [mid]),
        ("o3", p["o3"], None, 3, [mid // 2]),
    ]
    slots = {}
    wrows, brows = [], []
    for i, (name, wb, bn, k, splits) in enumerate(conv_defs):
        wk, bb = _pack_conv(wb, bn, k, splits, eps)
        assert wk.shape[1] <= KPAD
        row = np.zeros((CPAD, KPAD), np.float32)
        row[:, :wk.shape[1]] = wk
        wrows.append(row)
        brows.append(bb)
        slots[name] = i

    # BatchNorm applied to |yt| folded to scale/shift (bias-only slots).
    gamma, beta, mean, var = [np.asarray(a, np.float32) for a in p["norm_bn"]]
    s = gamma / np.sqrt(var + eps)
    scale = np.zeros((CPAD, 1), np.float32); scale[:C, 0] = s
    shift = np.zeros((CPAD, 1), np.float32); shift[:C, 0] = beta - mean * s
    slots["norm_scale"] = len(conv_defs)
    slots["norm_shift"] = len(conv_defs) + 1
    brows += [scale, shift]

    wslab = jnp.asarray(np.concatenate(wrows, axis=0))    # (21*8, 256) f32
    bslab = jnp.asarray(np.concatenate(brows, axis=0))    # (23*8, 1)   f32
    return slots, wslab, bslab


def _build_masks(H, W, tiles):
    """(80, tiles*H*W) slab: 9 broadcast tap masks (8 rows each) + mh + mw."""
    HW = H * W
    m = np.arange(HW)
    h, w = m // W, m % W
    rows = []
    for dh in (-1, 0, 1):
        for dw in (-1, 0, 1):
            ok = ((h + dh >= 0) & (h + dh < H) &
                  (w + dw >= 0) & (w + dw < W)).astype(np.float32)
            rows.append(np.broadcast_to(ok, (CPAD, HW)))
    mh = (h < H - 1).astype(np.float32)[None]
    mw = (w < W - 1).astype(np.float32)[None]
    slab = np.concatenate(rows + [mh, mw, np.zeros((6, HW), np.float32)],
                          axis=0)                          # (80, HW)
    if tiles > 1:
        slab = np.tile(slab, (1, tiles))
    return np.ascontiguousarray(slab)


# --------------------------------------------------------------- JAX glue

def bilinear_align_corners(x_nchw, out_h, out_w):
    B, C, H, W = x_nchw.shape
    if (H, W) == (out_h, out_w):
        return x_nchw

    def coords(out_n, in_n):
        if out_n == 1:
            return jnp.zeros((1,), jnp.float32)
        return jnp.arange(out_n, dtype=jnp.float32) * (in_n - 1) / (out_n - 1)

    sy, sx = coords(out_h, H), coords(out_w, W)
    y0 = jnp.floor(sy).astype(jnp.int32); y1 = jnp.minimum(y0 + 1, H - 1)
    wy = (sy - y0)[None, None, :, None]
    x0 = jnp.floor(sx).astype(jnp.int32); x1 = jnp.minimum(x0 + 1, W - 1)
    wx = (sx - x0)[None, None, None, :]
    top, bot = x_nchw[:, :, y0, :], x_nchw[:, :, y1, :]
    v = top * (1.0 - wy) + bot * wy
    return v[:, :, :, x0] * (1.0 - wx) + v[:, :, :, x1] * wx


def module_2_1_forward(slots, wslab, bslab, X, prior_cam, *, batch_grid=False):
    B, C, H, W = X.shape
    assert C <= CPAD
    HW = H * W
    N = B * HW
    assert HW % 128 == 0 and N % 128 == 0

    prior = bilinear_align_corners(prior_cam, H, W)        # (B,1,H,W)
    # |fft2(prior_cam)| stays in plain JAX (no Pallas FFT); the
    # ifft2(fft2(yt)) round-trip is mathematically identity so |yt| is
    # computed inside the kernel instead.
    pfa = jnp.abs(jnp.fft.fft2(prior)).astype(jnp.float32)

    def to_rows(a):                    # (B,Ch,H,W) -> (Ch, B*H*W), lanes=pixels
        return jnp.transpose(a, (1, 0, 2, 3)).reshape(a.shape[1], N)

    data = jnp.concatenate([
        to_rows(X.astype(jnp.float32)),
        jnp.zeros((CPAD - C, N), jnp.float32),
        to_rows(prior.astype(jnp.float32)),
        to_rows(pfa),
        jnp.zeros((6, N), jnp.float32)], axis=0)           # (16, N)

    masks = jnp.asarray(_build_masks(H, W, 1 if batch_grid else B))

    if batch_grid:
        # v7x / megacore: one image per grid step, sharded across TensorCores.
        grid = (B,)
        data_spec = pl.BlockSpec((16, HW), lambda b: (0, b))
        mask_spec = pl.BlockSpec(masks.shape, lambda b: (0, 0))
        out_spec = [pl.BlockSpec((1, HW), lambda b: (0, b)),
                    pl.BlockSpec((1, HW), lambda b: (0, b))]
        dims = ("parallel",)
    else:
        # single-TC v5e/v6e: fold the batch onto the lane axis (N = B*H*W).
        grid = (1,)
        data_spec = pl.BlockSpec((16, N), lambda b: (0, 0))
        mask_spec = pl.BlockSpec(masks.shape, lambda b: (0, 0))
        out_spec = [pl.BlockSpec((1, N), lambda b: (0, 0)),
                    pl.BlockSpec((1, N), lambda b: (0, 0))]
        dims = ("arbitrary",)

    w_spec = pl.BlockSpec(wslab.shape, lambda b: (0, 0))
    b_spec = pl.BlockSpec(bslab.shape, lambda b: (0, 0))

    y_flat, edge_flat = pl.pallas_call(
        functools.partial(_megakernel, H, W, slots),
        grid=grid,
        in_specs=[data_spec, mask_spec, w_spec, b_spec],
        out_specs=out_spec,
        out_shape=(jax.ShapeDtypeStruct((1, N), jnp.float32),
                   jax.ShapeDtypeStruct((1, N), jnp.float32)),
        compiler_params=pltpu.CompilerParams(dimension_semantics=dims),
    )(data, masks, wslab, bslab)

    y = y_flat.reshape(B, 1, H, W)
    edge = edge_flat.reshape(B, 1, H, W)
    return y, edge


def _pick_batch_grid():
    """grid=(B,) only on parts with >=2 schedulable TensorCores per chip."""
    try:
        kind = jax.devices()[0].device_kind.lower()
    except Exception:
        return False
    single_tc = any(t in kind for t in ("v5e", "v5 lite", "v6e", "v6 lite"))
    return not single_tc


# --------------------------------------------------------------------- main

if __name__ == "__main__":
    key = jax.random.PRNGKey(0)
    kx, kp, kparams = jax.random.split(key, 3)

    B, C, H, W = 2, 4, 16, 16        # in_channels = 4
    mid = 8                          # mid_channels = 8
    X = jax.random.normal(kx, (B, C, H, W), jnp.float32)
    prior_cam = jax.random.normal(kp, (B, 1, 8, 8), jnp.float32)

    slots, wslab, bslab = prepare_params(init_params(kparams, C, mid), C, mid)

    batch_grid = _pick_batch_grid()
    fwd = jax.jit(functools.partial(module_2_1_forward, slots,
                                    batch_grid=batch_grid))
    y, edge = fwd(wslab, bslab, X, prior_cam)
    jax.block_until_ready((y, edge))

    assert y.shape == (B, 1, H, W), y.shape
    assert edge.shape == (B, 1, H, W), edge.shape
    assert bool(jnp.all(jnp.isfinite(y))) and bool(jnp.all(jnp.isfinite(edge)))
    print("KERNEL_OK")
</pallas_src>

<mosaic_0001>
module attributes {stable_mosaic.version = 11 : i64} {
  func.func @_megakernel(%arg0: i32, %arg1: memref<16x256xf32, #tpu.memory_space<vmem>>, %arg2: memref<80x256xf32, #tpu.memory_space<vmem>>, %arg3: memref<168x256xf32, #tpu.memory_space<vmem>>, %arg4: memref<184x1xf32, #tpu.memory_space<vmem>>, %arg5: memref<1x256xf32, #tpu.memory_space<vmem>>, %arg6: memref<1x256xf32, #tpu.memory_space<vmem>>) attributes {dimension_semantics = [#tpu.dimension_semantics<parallel>], iteration_bounds = array<i64: 2>, scalar_prefetch = 0 : i64, scratch_operands = 0 : i64, tpu.core_type = #tpu.core_type<tc>, window_params = [{transform_indices = @transform_0, window_bounds = array<i64: 16, 256>}, {pipeline_mode = #tpu.pipeline_mode<synchronous>, transform_indices = @transform_1, window_bounds = array<i64: 80, 256>}, {pipeline_mode = #tpu.pipeline_mode<synchronous>, transform_indices = @transform_2, window_bounds = array<i64: 168, 256>}, {pipeline_mode = #tpu.pipeline_mode<synchronous>, transform_indices = @transform_3, window_bounds = array<i64: 184, 1>}, {transform_indices = @transform_4, window_bounds = array<i64: 1, 256>}, {transform_indices = @transform_5, window_bounds = array<i64: 1, 256>}]} {
    %c0 = arith.constant 0 : index
    %c0_0 = arith.constant 0 : index
    %0 = vector.load %arg1[%c0, %c0_0] : memref<16x256xf32, #tpu.memory_space<vmem>>, vector<8x256xf32>
    %c8 = arith.constant 8 : index
    %c0_1 = arith.constant 0 : index
    %1 = vector.load %arg1[%c8, %c0_1] : memref<16x256xf32, #tpu.memory_space<vmem>>, vector<1x256xf32>
    %c9 = arith.constant 9 : index
    %c0_2 = arith.constant 0 : index
    %2 = vector.load %arg1[%c9, %c0_2] : memref<16x256xf32, #tpu.memory_space<vmem>>, vector<1x256xf32>
    %3 = vector.broadcast %1 : vector<1x256xf32> to vector<8x256xf32>
    %4 = arith.addf %0, %3 : vector<8x256xf32>
    %c0_3 = arith.constant 0 : index
    %c0_4 = arith.constant 0 : index
    %5 = vector.load %arg3[%c0_3, %c0_4] : memref<168x256xf32, #tpu.memory_space<vmem>>, vector<8x8xf32>
    %6 = arith.truncf %5 : vector<8x8xf32> to vector<8x8xbf16>
    %7 = arith.truncf %4 : vector<8x256xf32> to vector<8x256xbf16>
    %cst = arith.constant dense<0.000000e+00> : vector<8x256xf32>
    %8 = tpu.matmul %6, %7, %cst {dimension_numbers = #tpu.dot_dimension_numbers<[1], [0], [0], [1], [0, 0, 1, 1], [], []>} : vector<8x8xbf16>, vector<8x256xbf16>, vector<8x256xf32> -> vector<8x256xf32>
    %c0_5 = arith.constant 0 : index
    %c0_6 = arith.constant 0 : index
    %9 = vector.load %arg4[%c0_5, %c0_6] : memref<184x1xf32, #tpu.memory_space<vmem>>, vector<8x1xf32>
    %10 = vector.broadcast %9 : vector<8x1xf32> to vector<8x256xf32>
    %11 = arith.addf %8, %10 : vector<8x256xf32>
    %c17_i32 = arith.constant 17 : i32
    %12 = tpu.dynamic_rotate %11 by %c17_i32 dim 1 : vector<8x256xf32>, i32 -> vector<8x256xf32>
    %c0_7 = arith.constant 0 : index
    %c0_8 = arith.constant 0 : index
    %13 = vector.load %arg2[%c0_7, %c0_8] : memref<80x256xf32, #tpu.memory_space<vmem>>, vector<8x256xf32>
    %14 = arith.mulf %12, %13 : vector<8x256xf32>
    %c16_i32 = arith.constant 16 : i32
    %15 = tpu.dynamic_rotate %11 by %c16_i32 dim 1 : vector<8x256xf32>, i32 -> vector<8x256xf32>
    %c8_9 = arith.constant 8 : index
    %c0_10 = arith.constant 0 : index
    %16 = vector.load %arg2[%c8_9, %c0_10] : memref<80x256xf32, #tpu.memory_space<vmem>>, vector<8x256xf32>
    %17 = arith.mulf %15, %16 : vector<8x256xf32>
    %c15_i32 = arith.constant 15 : i32
    %18 = tpu.dynamic_rotate %11 by %c15_i32 dim 1 : vector<8x256xf32>, i32 -> vector<8x256xf32>
    %c16 = arith.constant 16 : index
    %c0_11 = arith.constant 0 : index
    %19 = vector.load %arg2[%c16, %c0_11] : memref<80x256xf32, #tpu.memory_space<vmem>>, vector<8x256xf32>
    %20 = arith.mulf %18, %19 : vector<8x256xf32>
    %c1_i32 = arith.constant 1 : i32
    %21 = tpu.dynamic_rotate %11 by %c1_i32 dim 1 : vector<8x256xf32>, i32 -> vector<8x256xf32>
    %c24 = arith.constant 24 : index
    %c0_12 = arith.constant 0 : index
    %22 = vector.load %arg2[%c24, %c0_12] : memref<80x256xf32, #tpu.memory_space<vmem>>, vector<8x256xf32>
    %23 = arith.mulf %21, %22 : vector<8x256xf32>
    %c255_i32 = arith.constant 255 : i32
    %24 = tpu.dynamic_rotate %11 by %c255_i32 dim 1 : vector<8x256xf32>, i32 -> vector<8x256xf32>
    %c40 = arith.constant 40 : index
    %c0_13 = arith.constant 0 : index
    %25 = vector.load %arg2[%c40, %c0_13] : memref<80x256xf32, #tpu.memory_space<vmem>>, vector<8x256xf32>
    %26 = arith.mulf %24, %25 : vector<8x256xf32>
    %c241_i32 = arith.constant 241 : i32
    %27 = tpu.dynamic_rotate %11 by %c241_i32 dim 1 : vector<8x256xf32>, i32 -> vector<8x256xf32>
    %c48 = arith.constant 48 : index
    %c0_14 = arith.constant 0 : index
    %28 = vector.load %arg2[%c48, %c0_14] : memref<80x256xf32, #tpu.memory_space<vmem>>, vector<8x256xf32>
    %29 = arith.mulf %27, %28 : vector<8x256xf32>
    %c240_i32 = arith.constant 240 : i32
    %30 = tpu.dynamic_rotate %11 by %c240_i32 dim 1 : vector<8x256xf32>, i32 -> vector<8x256xf32>
    %c56 = arith.constant 56 : index
    %c0_15 = arith.constant 0 : index
    %31 = vector.load %arg2[%c56, %c0_15] : memref<80x256xf32, #tpu.memory_space<vmem>>, vector<8x256xf32>
    %32 = arith.mulf %30, %31 : vector<8x256xf32>
    %c239_i32 = arith.constant 239 : i32
    %33 = tpu.dynamic_rotate %11 by %c239_i32 dim 1 : vector<8x256xf32>, i32 -> vector<8x256xf32>
    %c64 = arith.constant 64 : index
    %c0_16 = arith.constant 0 : index
    %34 = vector.load %arg2[%c64, %c0_16] : memref<80x256xf32, #tpu.memory_space<vmem>>, vector<8x256xf32>
    %35 = arith.mulf %33, %34 : vector<8x256xf32>
    %36 = tpu.concatenate %14, %17, %20, %23, %11, %26, %29, %32, %35 in 0 : vector<8x256xf32>, vector<8x256xf32>, vector<8x256xf32>, vector<8x256xf32>, vector<8x256xf32>, vector<8x256xf32>, vector<8x256xf32>, vector<8x256xf32>, vector<8x256xf32> -> vector<72x256xf32>
    %c8_17 = arith.constant 8 : index
    %c0_18 = arith.constant 0 : index
    %37 = vector.load %arg3[%c8_17, %c0_18] : memref<168x256xf32, #tpu.memory_space<vmem>>, vector<8x72xf32>
    %38 = arith.truncf %37 : vector<8x72xf32> to vector<8x72xbf16>
    %39 = arith.truncf %36 : vector<72x256xf32> to vector<72x256xbf16>
    %cst_19 = arith.constant dense<0.000000e+00> : vector<8x256xf32>
    %40 = tpu.matmul %38, %39, %cst_19 {dimension_numbers = #tpu.dot_dimension_numbers<[1], [0], [0], [1], [0, 0, 1, 1], [], []>} : vector<8x72xbf16>, vector<72x256xbf16>, vector<8x256xf32> -> vector<8x256xf32>
    %c8_20 = arith.constant 8 : index
    %c0_21 = arith.constant 0 : index
    %41 = vector.load %arg4[%c8_20, %c0_21] : memref<184x1xf32, #tpu.memory_space<vmem>>, vector<8x1xf32>
    %42 = vector.broadcast %41 : vector<8x1xf32> to vector<8x256xf32>
    %43 = arith.addf %40, %42 : vector<8x256xf32>
    %c16_22 = arith.constant 16 : index
    %c0_23 = arith.constant 0 : index
    %44 = vector.load %arg3[%c16_22, %c0_23] : memref<168x256xf32, #tpu.memory_space<vmem>>, vector<8x8xf32>
    %45 = arith.truncf %44 : vector<8x8xf32> to vector<8x8xbf16>
    %46 = arith.truncf %43 : vector<8x256xf32> to vector<8x256xbf16>
    %cst_24 = arith.constant dense<0.000000e+00> : vector<8x256xf32>
    %47 = tpu.matmul %45, %46, %cst_24 {dimension_numbers = #tpu.dot_dimension_numbers<[1], [0], [0], [1], [0, 0, 1, 1], [], []>} : vector<8x8xbf16>, vector<8x256xbf16>, vector<8x256xf32> -> vector<8x256xf32>
    %c16_25 = arith.constant 16 : index
    %c0_26 = arith.constant 0 : index
    %48 = vector.load %arg4[%c16_25, %c0_26] : memref<184x1xf32, #tpu.memory_space<vmem>>, vector<8x1xf32>
    %49 = vector.broadcast %48 : vector<8x1xf32> to vector<8x256xf32>
    %50 = arith.addf %47, %49 : vector<8x256xf32>
    %cst_27 = arith.constant 0.000000e+00 : f32
    %51 = vector.broadcast %cst_27 : f32 to vector<8x256xf32>
    %52 = arith.maximumf %50, %51 : vector<8x256xf32>
    %c17_i32_28 = arith.constant 17 : i32
    %53 = tpu.dynamic_rotate %52 by %c17_i32_28 dim 1 : vector<8x256xf32>, i32 -> vector<8x256xf32>
    %c0_29 = arith.constant 0 : index
    %c0_30 = arith.constant 0 : index
    %54 = vector.load %arg2[%c0_29, %c0_30] : memref<80x256xf32, #tpu.memory_space<vmem>>, vector<8x256xf32>
    %55 = arith.mulf %53, %54 : vector<8x256xf32>
    %c16_i32_31 = arith.constant 16 : i32
    %56 = tpu.dynamic_rotate %52 by %c16_i32_31 dim 1 : vector<8x256xf32>, i32 -> vector<8x256xf32>
    %c8_32 = arith.constant 8 : index
    %c0_33 = arith.constant 0 : index
    %57 = vector.load %arg2[%c8_32, %c0_33] : memref<80x256xf32, #tpu.memory_space<vmem>>, vector<8x256xf32>
    %58 = arith.mulf %56, %57 : vector<8x256xf32>
    %c15_i32_34 = arith.constant 15 : i32
    %59 = tpu.dynamic_rotate %52 by %c15_i32_34 dim 1 : vector<8x256xf32>, i32 -> vector<8x256xf32>
    %c16_35 = arith.constant 16 : index
    %c0_36 = arith.constant 0 : index
    %60 = vector.load %arg2[%c16_35, %c0_36] : memref<80x256xf32, #tpu.memory_space<vmem>>, vector<8x256xf32>
    %61 = arith.mulf %59, %60 : vector<8x256xf32>
    %c1_i32_37 = arith.constant 1 : i32
    %62 = tpu.dynamic_rotate %52 by %c1_i32_37 dim 1 : vector<8x256xf32>, i32 -> vector<8x256xf32>
    %c24_38 = arith.constant 24 : index
    %c0_39 = arith.constant 0 : index
    %63 = vector.load %arg2[%c24_38, %c0_39] : memref<80x256xf32, #tpu.memory_space<vmem>>, vector<8x256xf32>
    %64 = arith.mulf %62, %63 : vector<8x256xf32>
    %c255_i32_40 = arith.constant 255 : i32
    %65 = tpu.dynamic_rotate %52 by %c255_i32_40 dim 1 : vector<8x256xf32>, i32 -> vector<8x256xf32>
    %c40_41 = arith.constant 40 : index
    %c0_42 = arith.constant 0 : index
    %66 = vector.load %arg2[%c40_41, %c0_42] : memref<80x256xf32, #tpu.memory_space<vmem>>, vector<8x256xf32>
    %67 = arith.mulf %65, %66 : vector<8x256xf32>
    %c241_i32_43 = arith.constant 241 : i32
    %68 = tpu.dynamic_rotate %52 by %c241_i32_43 dim 1 : vector<8x256xf32>, i32 -> vector<8x256xf32>
    %c48_44 = arith.constant 48 : index
    %c0_45 = arith.constant 0 : index
    %69 = vector.load %arg2[%c48_44, %c0_45] : memref<80x256xf32, #tpu.memory_space<vmem>>, vector<8x256xf32>
    %70 = arith.mulf %68, %69 : vector<8x256xf32>
    %c240_i32_46 = arith.constant 240 : i32
    %71 = tpu.dynamic_rotate %52 by %c240_i32_46 dim 1 : vector<8x256xf32>, i32 -> vector<8x256xf32>
    %c56_47 = arith.constant 56 : index
    %c0_48 = arith.constant 0 : index
    %72 = vector.load %arg2[%c56_47, %c0_48] : memref<80x256xf32, #tpu.memory_space<vmem>>, vector<8x256xf32>
    %73 = arith.mulf %71, %72 : vector<8x256xf32>
    %c239_i32_49 = arith.constant 239 : i32
    %74 = tpu.dynamic_rotate %52 by %c239_i32_49 dim 1 : vector<8x256xf32>, i32 -> vector<8x256xf32>
    %c64_50 = arith.constant 64 : index
    %c0_51 = arith.constant 0 : index
    %75 = vector.load %arg2[%c64_50, %c0_51] : memref<80x256xf32, #tpu.memory_space<vmem>>, vector<8x256xf32>
    %76 = arith.mulf %74, %75 : vector<8x256xf32>
    %77 = tpu.concatenate %55, %58, %61, %64, %52, %67, %70, %73, %76 in 0 : vector<8x256xf32>, vector<8x256xf32>, vector<8x256xf32>, vector<8x256xf32>, vector<8x256xf32>, vector<8x256xf32>, vector<8x256xf32>, vector<8x256xf32>, vector<8x256xf32> -> vector<72x256xf32>
    %c72 = arith.constant 72 : index
    %c0_52 = arith.constant 0 : index
    %78 = vector.load %arg3[%c72, %c0_52] : memref<168x256xf32, #tpu.memory_space<vmem>>, vector<8x72xf32>
    %79 = arith.truncf %78 : vector<8x72xf32> to vector<8x72xbf16>
    %80 = arith.truncf %77 : vector<72x256xf32> to vector<72x256xbf16>
    %cst_53 = arith.constant dense<0.000000e+00> : vector<8x256xf32>
    %81 = tpu.matmul %79, %80, %cst_53 {dimension_numbers = #tpu.dot_dimension_numbers<[1], [0], [0], [1], [0, 0, 1, 1], [], []>} : vector<8x72xbf16>, vector<72x256xbf16>, vector<8x256xf32> -> vector<8x256xf32>
    %c72_54 = arith.constant 72 : index
    %c0_55 = arith.constant 0 : index
    %82 = vector.load %arg4[%c72_54, %c0_55] : memref<184x1xf32, #tpu.memory_space<vmem>>, vector<8x1xf32>
    %83 = vector.broadcast %82 : vector<8x1xf32> to vector<8x256xf32>
    %84 = arith.addf %81, %83 : vector<8x256xf32>
    %cst_56 = arith.constant 0.000000e+00 : f32
    %85 = vector.broadcast %cst_56 : f32 to vector<8x256xf32>
    %86 = arith.maximumf %84, %85 : vector<8x256xf32>
    %c17_i32_57 = arith.constant 17 : i32
    %87 = tpu.dynamic_rotate %86 by %c17_i32_57 dim 1 : vector<8x256xf32>, i32 -> vector<8x256xf32>
    %c0_58 = arith.constant 0 : index
    %c0_59 = arith.constant 0 : index
    %88 = vector.load %arg2[%c0_58, %c0_59] : memref<80x256xf32, #tpu.memory_space<vmem>>, vector<8x256xf32>
    %89 = arith.mulf %87, %88 : vector<8x256xf32>
    %c16_i32_60 = arith.constant 16 : i32
    %90 = tpu.dynamic_rotate %86 by %c16_i32_60 dim 1 : vector<8x256xf32>, i32 -> vector<8x256xf32>
    %c8_61 = arith.constant 8 : index
    %c0_62 = arith.constant 0 : index
    %91 = vector.load %arg2[%c8_61, %c0_62] : memref<80x256xf32, #tpu.memory_space<vmem>>, vector<8x256xf32>
    %92 = arith.mulf %90, %91 : vector<8x256xf32>
    %c15_i32_63 = arith.constant 15 : i32
    %93 = tpu.dynamic_rotate %86 by %c15_i32_63 dim 1 : vector<8x256xf32>, i32 -> vector<8x256xf32>
    %c16_64 = arith.constant 16 : index
    %c0_65 = arith.constant 0 : index
    %94 = vector.load %arg2[%c16_64, %c0_65] : memref<80x256xf32, #tpu.memory_space<vmem>>, vector<8x256xf32>
    %95 = arith.mulf %93, %94 : vector<8x256xf32>
    %c1_i32_66 = arith.constant 1 : i32
    %96 = tpu.dynamic_rotate %86 by %c1_i32_66 dim 1 : vector<8x256xf32>, i32 -> vector<8x256xf32>
    %c24_67 = arith.constant 24 : index
    %c0_68 = arith.constant 0 : index
    %97 = vector.load %arg2[%c24_67, %c0_68] : memref<80x256xf32, #tpu.memory_space<vmem>>, vector<8x256xf32>
    %98 = arith.mulf %96, %97 : vector<8x256xf32>
    %c255_i32_69 = arith.constant 255 : i32
    %99 = tpu.dynamic_rotate %86 by %c255_i32_69 dim 1 : vector<8x256xf32>, i32 -> vector<8x256xf32>
    %c40_70 = arith.constant 40 : index
    %c0_71 = arith.constant 0 : index
    %100 = vector.load %arg2[%c40_70, %c0_71] : memref<80x256xf32, #tpu.memory_space<vmem>>, vector<8x256xf32>
    %101 = arith.mulf %99, %100 : vector<8x256xf32>
    %c241_i32_72 = arith.constant 241 : i32
    %102 = tpu.dynamic_rotate %86 by %c241_i32_72 dim 1 : vector<8x256xf32>, i32 -> vector<8x256xf32>
    %c48_73 = arith.constant 48 : index
    %c0_74 = arith.constant 0 : index
    %103 = vector.load %arg2[%c48_73, %c0_74] : memref<80x256xf32, #tpu.memory_space<vmem>>, vector<8x256xf32>
    %104 = arith.mulf %102, %103 : vector<8x256xf32>
    %c240_i32_75 = arith.constant 240 : i32
    %105 = tpu.dynamic_rotate %86 by %c240_i32_75 dim 1 : vector<8x256xf32>, i32 -> vector<8x256xf32>
    %c56_76 = arith.constant 56 : index
    %c0_77 = arith.constant 0 : index
    %106 = vector.load %arg2[%c56_76, %c0_77] : memref<80x256xf32, #tpu.memory_space<vmem>>, vector<8x256xf32>
    %107 = arith.mulf %105, %106 : vector<8x256xf32>
    %c239_i32_78 = arith.constant 239 : i32
    %108 = tpu.dynamic_rotate %86 by %c239_i32_78 dim 1 : vector<8x256xf32>, i32 -> vector<8x256xf32>
    %c64_79 = arith.constant 64 : index
    %c0_80 = arith.constant 0 : index
    %109 = vector.load %arg2[%c64_79, %c0_80] : memref<80x256xf32, #tpu.memory_space<vmem>>, vector<8x256xf32>
    %110 = arith.mulf %108, %109 : vector<8x256xf32>
    %111 = tpu.concatenate %89, %92, %95, %98, %86, %101, %104, %107, %110 in 0 : vector<8x256xf32>, vector<8x256xf32>, vector<8x256xf32>, vector<8x256xf32>, vector<8x256xf32>, vector<8x256xf32>, vector<8x256xf32>, vector<8x256xf32>, vector<8x256xf32> -> vector<72x256xf32>
    %c80 = arith.constant 80 : index
    %c0_81 = arith.constant 0 : index
    %112 = vector.load %arg3[%c80, %c0_81] : memref<168x256xf32, #tpu.memory_space<vmem>>, vector<8x72xf32>
    %113 = arith.truncf %112 : vector<8x72xf32> to vector<8x72xbf16>
    %114 = arith.truncf %111 : vector<72x256xf32> to vector<72x256xbf16>
    %cst_82 = arith.constant dense<0.000000e+00> : vector<8x256xf32>
    %115 = tpu.matmul %113, %114, %cst_82 {dimension_numbers = #tpu.dot_dimension_numbers<[1], [0], [0], [1], [0, 0, 1, 1], [], []>} : vector<8x72xbf16>, vector<72x256xbf16>, vector<8x256xf32> -> vector<8x256xf32>
    %c80_83 = arith.constant 80 : index
    %c0_84 = arith.constant 0 : index
    %116 = vector.load %arg4[%c80_83, %c0_84] : memref<184x1xf32, #tpu.memory_space<vmem>>, vector<8x1xf32>
    %117 = vector.broadcast %116 : vector<8x1xf32> to vector<8x256xf32>
    %118 = arith.addf %115, %117 : vector<8x256xf32>
    %cst_85 = arith.constant 0.000000e+00 : f32
    %119 = vector.broadcast %cst_85 : f32 to vector<8x256xf32>
    %120 = arith.subf %119, %118 : vector<8x256xf32>
    %121 = math.exp %120 : vector<8x256xf32>
    %cst_86 = arith.constant 1.000000e+00 : f32
    %122 = vector.broadcast %cst_86 : f32 to vector<8x256xf32>
    %123 = arith.addf %122, %121 : vector<8x256xf32>
    %124 = tpu.reciprocal %123 : vector<8x256xf32> -> vector<8x256xf32>
    %125 = vector.extract_strided_slice %124 {offsets = [0, 0], sizes = [1, 256], strides = [1, 1]} : vector<8x256xf32> to vector<1x256xf32>
    %126 = vector.broadcast %125 : vector<1x256xf32> to vector<8x256xf32>
    %127 = arith.mulf %52, %126 : vector<8x256xf32>
    %c24_87 = arith.constant 24 : index
    %c0_88 = arith.constant 0 : index
    %128 = vector.load %arg3[%c24_87, %c0_88] : memref<168x256xf32, #tpu.memory_space<vmem>>, vector<8x8xf32>
    %129 = arith.truncf %128 : vector<8x8xf32> to vector<8x8xbf16>
    %130 = arith.truncf %4 : vector<8x256xf32> to vector<8x256xbf16>
    %cst_89 = arith.constant dense<0.000000e+00> : vector<8x256xf32>
    %131 = tpu.matmul %129, %130, %cst_89 {dimension_numbers = #tpu.dot_dimension_numbers<[1], [0], [0], [1], [0, 0, 1, 1], [], []>} : vector<8x8xbf16>, vector<8x256xbf16>, vector<8x256xf32> -> vector<8x256xf32>
    %c24_90 = arith.constant 24 : index
    %c0_91 = arith.constant 0 : index
    %132 = vector.load %arg4[%c24_90, %c0_91] : memref<184x1xf32, #tpu.memory_space<vmem>>, vector<8x1xf32>
    %133 = vector.broadcast %132 : vector<8x1xf32> to vector<8x256xf32>
    %134 = arith.addf %131, %133 : vector<8x256xf32>
    %c17_i32_92 = arith.constant 17 : i32
    %135 = tpu.dynamic_rotate %134 by %c17_i32_92 dim 1 : vector<8x256xf32>, i32 -> vector<8x256xf32>
    %c0_93 = arith.constant 0 : index
    %c0_94 = arith.constant 0 : index
    %136 = vector.load %arg2[%c0_93, %c0_94] : memref<80x256xf32, #tpu.memory_space<vmem>>, vector<8x256xf32>
    %137 = arith.mulf %135, %136 : vector<8x256xf32>
    %c16_i32_95 = arith.constant 16 : i32
    %138 = tpu.dynamic_rotate %134 by %c16_i32_95 dim 1 : vector<8x256xf32>, i32 -> vector<8x256xf32>
    %c8_96 = arith.constant 8 : index
    %c0_97 = arith.constant 0 : index
    %139 = vector.load %arg2[%c8_96, %c0_97] : memref<80x256xf32, #tpu.memory_space<vmem>>, vector<8x256xf32>
    %140 = arith.mulf %138, %139 : vector<8x256xf32>
    %c15_i32_98 = arith.constant 15 : i32
    %141 = tpu.dynamic_rotate %134 by %c15_i32_98 dim 1 : vector<8x256xf32>, i32 -> vector<8x256xf32>
    %c16_99 = arith.constant 16 : index
    %c0_100 = arith.constant 0 : index
    %142 = vector.load %arg2[%c16_99, %c0_100] : memref<80x256xf32, #tpu.memory_space<vmem>>, vector<8x256xf32>
    %143 = arith.mulf %141, %142 : vector<8x256xf32>
    %c1_i32_101 = arith.constant 1 : i32
    %144 = tpu.dynamic_rotate %134 by %c1_i32_101 dim 1 : vector<8x256xf32>, i32 -> vector<8x256xf32>
    %c24_102 = arith.constant 24 : index
    %c0_103 = arith.constant 0 : index
    %145 = vector.load %arg2[%c24_102, %c0_103] : memref<80x256xf32, #tpu.memory_space<vmem>>, vector<8x256xf32>
    %146 = arith.mulf %144, %145 : vector<8x256xf32>
    %c255_i32_104 = arith.constant 255 : i32
    %147 = tpu.dynamic_rotate %134 by %c255_i32_104 dim 1 : vector<8x256xf32>, i32 -> vector<8x256xf32>
    %c40_105 = arith.constant 40 : index
    %c0_106 = arith.constant 0 : index
    %148 = vector.load %arg2[%c40_105, %c0_106] : memref<80x256xf32, #tpu.memory_space<vmem>>, vector<8x256xf32>
    %149 = arith.mulf %147, %148 : vector<8x256xf32>
    %c241_i32_107 = arith.constant 241 : i32
    %150 = tpu.dynamic_rotate %134 by %c241_i32_107 dim 1 : vector<8x256xf32>, i32 -> vector<8x256xf32>
    %c48_108 = arith.constant 48 : index
    %c0_109 = arith.constant 0 : index
    %151 = vector.load %arg2[%c48_108, %c0_109] : memref<80x256xf32, #tpu.memory_space<vmem>>, vector<8x256xf32>
    %152 = arith.mulf %150, %151 : vector<8x256xf32>
    %c240_i32_110 = arith.constant 240 : i32
    %153 = tpu.dynamic_rotate %134 by %c240_i32_110 dim 1 : vector<8x256xf32>, i32 -> vector<8x256xf32>
    %c56_111 = arith.constant 56 : index
    %c0_112 = arith.constant 0 : index
    %154 = vector.load %arg2[%c56_111, %c0_112] : memref<80x256xf32, #tpu.memory_space<vmem>>, vector<8x256xf32>
    %155 = arith.mulf %153, %154 : vector<8x256xf32>
    %c239_i32_113 = arith.constant 239 : i32
    %156 = tpu.dynamic_rotate %134 by %c239_i32_113 dim 1 : vector<8x256xf32>, i32 -> vector<8x256xf32>
    %c64_114 = arith.constant 64 : index
    %c0_115 = arith.constant 0 : index
    %157 = vector.load %arg2[%c64_114, %c0_115] : memref<80x256xf32, #tpu.memory_space<vmem>>, vector<8x256xf32>
    %158 = arith.mulf %156, %157 : vector<8x256xf32>
    %159 = tpu.concatenate %137, %140, %143, %146, %134, %149, %152, %155, %158 in 0 : vector<8x256xf32>, vector<8x256xf32>, vector<8x256xf32>, vector<8x256xf32>, vector<8x256xf32>, vector<8x256xf32>, vector<8x256xf32>, vector<8x256xf32>, vector<8x256xf32> -> vector<72x256xf32>
    %c32 = arith.constant 32 : index
    %c0_116 = arith.constant 0 : index
    %160 = vector.load %arg3[%c32, %c0_116] : memref<168x256xf32, #tpu.memory_space<vmem>>, vector<8x72xf32>
    %161 = arith.truncf %160 : vector<8x72xf32> to vector<8x72xbf16>
    %162 = arith.truncf %159 : vector<72x256xf32> to vector<72x256xbf16>
    %cst_117 = arith.constant dense<0.000000e+00> : vector<8x256xf32>
    %163 = tpu.matmul %161, %162, %cst_117 {dimension_numbers = #tpu.dot_dimension_numbers<[1], [0], [0], [1], [0, 0, 1, 1], [], []>} : vector<8x72xbf16>, vector<72x256xbf16>, vector<8x256xf32> -> vector<8x256xf32>
    %c32_118 = arith.constant 32 : index
    %c0_119 = arith.constant 0 : index
    %164 = vector.load %arg4[%c32_118, %c0_119] : memref<184x1xf32, #tpu.memory_space<vmem>>, vector<8x1xf32>
    %165 = vector.broadcast %164 : vector<8x1xf32> to vector<8x256xf32>
    %166 = arith.addf %163, %165 : vector<8x256xf32>
    %c40_120 = arith.constant 40 : index
    %c0_121 = arith.constant 0 : index
    %167 = vector.load %arg3[%c40_120, %c0_121] : memref<168x256xf32, #tpu.memory_space<vmem>>, vector<8x8xf32>
    %168 = arith.truncf %167 : vector<8x8xf32> to vector<8x8xbf16>
    %169 = arith.truncf %166 : vector<8x256xf32> to vector<8x256xbf16>
    %cst_122 = arith.constant dense<0.000000e+00> : vector<8x256xf32>
    %170 = tpu.matmul %168, %169, %cst_122 {dimension_numbers = #tpu.dot_dimension_numbers<[1], [0], [0], [1], [0, 0, 1, 1], [], []>} : vector<8x8xbf16>, vector<8x256xbf16>, vector<8x256xf32> -> vector<8x256xf32>
    %c40_123 = arith.constant 40 : index
    %c0_124 = arith.constant 0 : index
    %171 = vector.load %arg4[%c40_123, %c0_124] : memref<184x1xf32, #tpu.memory_space<vmem>>, vector<8x1xf32>
    %172 = vector.broadcast %171 : vector<8x1xf32> to vector<8x256xf32>
    %173 = arith.addf %170, %172 : vector<8x256xf32>
    %cst_125 = arith.constant 0.000000e+00 : f32
    %174 = vector.broadcast %cst_125 : f32 to vector<8x256xf32>
    %175 = arith.maximumf %173, %174 : vector<8x256xf32>
    %c48_126 = arith.constant 48 : index
    %c0_127 = arith.constant 0 : index
    %176 = vector.load %arg3[%c48_126, %c0_127] : memref<168x256xf32, #tpu.memory_space<vmem>>, vector<8x8xf32>
    %177 = arith.truncf %176 : vector<8x8xf32> to vector<8x8xbf16>
    %178 = arith.truncf %175 : vector<8x256xf32> to vector<8x256xbf16>
    %cst_128 = arith.constant dense<0.000000e+00> : vector<8x256xf32>
    %179 = tpu.matmul %177, %178, %cst_128 {dimension_numbers = #tpu.dot_dimension_numbers<[1], [0], [0], [1], [0, 0, 1, 1], [], []>} : vector<8x8xbf16>, vector<8x256xbf16>, vector<8x256xf32> -> vector<8x256xf32>
    %c48_129 = arith.constant 48 : index
    %c0_130 = arith.constant 0 : index
    %180 = vector.load %arg4[%c48_129, %c0_130] : memref<184x1xf32, #tpu.memory_space<vmem>>, vector<8x1xf32>
    %181 = vector.broadcast %180 : vector<8x1xf32> to vector<8x256xf32>
    %182 = arith.addf %179, %181 : vector<8x256xf32>
    %c17_i32_131 = arith.constant 17 : i32
    %183 = tpu.dynamic_rotate %182 by %c17_i32_131 dim 1 : vector<8x256xf32>, i32 -> vector<8x256xf32>
    %c0_132 = arith.constant 0 : index
    %c0_133 = arith.constant 0 : index
    %184 = vector.load %arg2[%c0_132, %c0_133] : memref<80x256xf32, #tpu.memory_space<vmem>>, vector<8x256xf32>
    %185 = arith.mulf %183, %184 : vector<8x256xf32>
    %c16_i32_134 = arith.constant 16 : i32
    %186 = tpu.dynamic_rotate %182 by %c16_i32_134 dim 1 : vector<8x256xf32>, i32 -> vector<8x256xf32>
    %c8_135 = arith.constant 8 : index
    %c0_136 = arith.constant 0 : index
    %187 = vector.load %arg2[%c8_135, %c0_136] : memref<80x256xf32, #tpu.memory_space<vmem>>, vector<8x256xf32>
    %188 = arith.mulf %186, %187 : vector<8x256xf32>
    %c15_i32_137 = arith.constant 15 : i32
    %189 = tpu.dynamic_rotate %182 by %c15_i32_137 dim 1 : vector<8x256xf32>, i32 -> vector<8x256xf32>
    %c16_138 = arith.constant 16 : index
    %c0_139 = arith.constant 0 : index
    %190 = vector.load %arg2[%c16_138, %c0_139] : memref<80x256xf32, #tpu.memory_space<vmem>>, vector<8x256xf32>
    %191 = arith.mulf %189, %190 : vector<8x256xf32>
    %c1_i32_140 = arith.constant 1 : i32
    %192 = tpu.dynamic_rotate %182 by %c1_i32_140 dim 1 : vector<8x256xf32>, i32 -> vector<8x256xf32>
    %c24_141 = arith.constant 24 : index
    %c0_142 = arith.constant 0 : index
    %193 = vector.load %arg2[%c24_141, %c0_142] : memref<80x256xf32, #tpu.memory_space<vmem>>, vector<8x256xf32>
    %194 = arith.mulf %192, %193 : vector<8x256xf32>
    %c255_i32_143 = arith.constant 255 : i32
    %195 = tpu.dynamic_rotate %182 by %c255_i32_143 dim 1 : vector<8x256xf32>, i32 -> vector<8x256xf32>
    %c40_144 = arith.constant 40 : index
    %c0_145 = arith.constant 0 : index
    %196 = vector.load %arg2[%c40_144, %c0_145] : memref<80x256xf32, #tpu.memory_space<vmem>>, vector<8x256xf32>
    %197 = arith.mulf %195, %196 : vector<8x256xf32>
    %c241_i32_146 = arith.constant 241 : i32
    %198 = tpu.dynamic_rotate %182 by %c241_i32_146 dim 1 : vector<8x256xf32>, i32 -> vector<8x256xf32>
    %c48_147 = arith.constant 48 : index
    %c0_148 = arith.constant 0 : index
    %199 = vector.load %arg2[%c48_147, %c0_148] : memref<80x256xf32, #tpu.memory_space<vmem>>, vector<8x256xf32>
    %200 = arith.mulf %198, %199 : vector<8x256xf32>
    %c240_i32_149 = arith.constant 240 : i32
    %201 = tpu.dynamic_rotate %182 by %c240_i32_149 dim 1 : vector<8x256xf32>, i32 -> vector<8x256xf32>
    %c56_150 = arith.constant 56 : index
    %c0_151 = arith.constant 0 : index
    %202 = vector.load %arg2[%c56_150, %c0_151] : memref<80x256xf32, #tpu.memory_space<vmem>>, vector<8x256xf32>
    %203 = arith.mulf %201, %202 : vector<8x256xf32>
    %c239_i32_152 = arith.constant 239 : i32
    %204 = tpu.dynamic_rotate %182 by %c239_i32_152 dim 1 : vector<8x256xf32>, i32 -> vector<8x256xf32>
    %c64_153 = arith.constant 64 : index
    %c0_154 = arith.constant 0 : index
    %205 = vector.load %arg2[%c64_153, %c0_154] : memref<80x256xf32, #tpu.memory_space<vmem>>, vector<8x256xf32>
    %206 = arith.mulf %204, %205 : vector<8x256xf32>
    %207 = tpu.concatenate %185, %188, %191, %194, %182, %197, %200, %203, %206 in 0 : vector<8x256xf32>, vector<8x256xf32>, vector<8x256xf32>, vector<8x256xf32>, vector<8x256xf32>, vector<8x256xf32>, vector<8x256xf32>, vector<8x256xf32>, vector<8x256xf32> -> vector<72x256xf32>
    %c56_155 = arith.constant 56 : index
    %c0_156 = arith.constant 0 : index
    %208 = vector.load %arg3[%c56_155, %c0_156] : memref<168x256xf32, #tpu.memory_space<vmem>>, vector<8x72xf32>
    %209 = arith.truncf %208 : vector<8x72xf32> to vector<8x72xbf16>
    %210 = arith.truncf %207 : vector<72x256xf32> to vector<72x256xbf16>
    %cst_157 = arith.constant dense<0.000000e+00> : vector<8x256xf32>
    %211 = tpu.matmul %209, %210, %cst_157 {dimension_numbers = #tpu.dot_dimension_numbers<[1], [0], [0], [1], [0, 0, 1, 1], [], []>} : vector<8x72xbf16>, vector<72x256xbf16>, vector<8x256xf32> -> vector<8x256xf32>
    %c56_158 = arith.constant 56 : index
    %c0_159 = arith.constant 0 : index
    %212 = vector.load %arg4[%c56_158, %c0_159] : memref<184x1xf32, #tpu.memory_space<vmem>>, vector<8x1xf32>
    %213 = vector.broadcast %212 : vector<8x1xf32> to vector<8x256xf32>
    %214 = arith.addf %211, %213 : vector<8x256xf32>
    %c17_i32_160 = arith.constant 17 : i32
    %215 = tpu.dynamic_rotate %214 by %c17_i32_160 dim 1 : vector<8x256xf32>, i32 -> vector<8x256xf32>
    %c0_161 = arith.constant 0 : index
    %c0_162 = arith.constant 0 : index
    %216 = vector.load %arg2[%c0_161, %c0_162] : memref<80x256xf32, #tpu.memory_space<vmem>>, vector<8x256xf32>
    %217 = arith.mulf %215, %216 : vector<8x256xf32>
    %c16_i32_163 = arith.constant 16 : i32
    %218 = tpu.dynamic_rotate %214 by %c16_i32_163 dim 1 : vector<8x256xf32>, i32 -> vector<8x256xf32>
    %c8_164 = arith.constant 8 : index
    %c0_165 = arith.constant 0 : index
    %219 = vector.load %arg2[%c8_164, %c0_165] : memref<80x256xf32, #tpu.memory_space<vmem>>, vector<8x256xf32>
    %220 = arith.mulf %218, %219 : vector<8x256xf32>
    %c15_i32_166 = arith.constant 15 : i32
    %221 = tpu.dynamic_rotate %214 by %c15_i32_166 dim 1 : vector<8x256xf32>, i32 -> vector<8x256xf32>
    %c16_167 = arith.constant 16 : index
    %c0_168 = arith.constant 0 : index
    %222 = vector.load %arg2[%c16_167, %c0_168] : memref<80x256xf32, #tpu.memory_space<vmem>>, vector<8x256xf32>
    %223 = arith.mulf %221, %222 : vector<8x256xf32>
    %c1_i32_169 = arith.constant 1 : i32
    %224 = tpu.dynamic_rotate %214 by %c1_i32_169 dim 1 : vector<8x256xf32>, i32 -> vector<8x256xf32>
    %c24_170 = arith.constant 24 : index
    %c0_171 = arith.constant 0 : index
    %225 = vector.load %arg2[%c24_170, %c0_171] : memref<80x256xf32, #tpu.memory_space<vmem>>, vector<8x256xf32>
    %226 = arith.mulf %224, %225 : vector<8x256xf32>
    %c255_i32_172 = arith.constant 255 : i32
    %227 = tpu.dynamic_rotate %214 by %c255_i32_172 dim 1 : vector<8x256xf32>, i32 -> vector<8x256xf32>
    %c40_173 = arith.constant 40 : index
    %c0_174 = arith.constant 0 : index
    %228 = vector.load %arg2[%c40_173, %c0_174] : memref<80x256xf32, #tpu.memory_space<vmem>>, vector<8x256xf32>
    %229 = arith.mulf %227, %228 : vector<8x256xf32>
    %c241_i32_175 = arith.constant 241 : i32
    %230 = tpu.dynamic_rotate %214 by %c241_i32_175 dim 1 : vector<8x256xf32>, i32 -> vector<8x256xf32>
    %c48_176 = arith.constant 48 : index
    %c0_177 = arith.constant 0 : index
    %231 = vector.load %arg2[%c48_176, %c0_177] : memref<80x256xf32, #tpu.memory_space<vmem>>, vector<8x256xf32>
    %232 = arith.mulf %230, %231 : vector<8x256xf32>
    %c240_i32_178 = arith.constant 240 : i32
    %233 = tpu.dynamic_rotate %214 by %c240_i32_178 dim 1 : vector<8x256xf32>, i32 -> vector<8x256xf32>
    %c56_179 = arith.constant 56 : index
    %c0_180 = arith.constant 0 : index
    %234 = vector.load %arg2[%c56_179, %c0_180] : memref<80x256xf32, #tpu.memory_space<vmem>>, vector<8x256xf32>
    %235 = arith.mulf %233, %234 : vector<8x256xf32>
    %c239_i32_181 = arith.constant 239 : i32
    %236 = tpu.dynamic_rotate %214 by %c239_i32_181 dim 1 : vector<8x256xf32>, i32 -> vector<8x256xf32>
    %c64_182 = arith.constant 64 : index
    %c0_183 = arith.constant 0 : index
    %237 = vector.load %arg2[%c64_182, %c0_183] : memref<80x256xf32, #tpu.memory_space<vmem>>, vector<8x256xf32>
    %238 = arith.mulf %236, %237 : vector<8x256xf32>
    %239 = tpu.concatenate %217, %220, %223, %226, %214, %229, %232, %235, %238 in 0 : vector<8x256xf32>, vector<8x256xf32>, vector<8x256xf32>, vector<8x256xf32>, vector<8x256xf32>, vector<8x256xf32>, vector<8x256xf32>, vector<8x256xf32>, vector<8x256xf32> -> vector<72x256xf32>
    %c64_184 = arith.constant 64 : index
    %c0_185 = arith.constant 0 : index
    %240 = vector.load %arg3[%c64_184, %c0_185] : memref<168x256xf32, #tpu.memory_space<vmem>>, vector<8x72xf32>
    %241 = arith.truncf %240 : vector<8x72xf32> to vector<8x72xbf16>
    %242 = arith.truncf %239 : vector<72x256xf32> to vector<72x256xbf16>
    %cst_186 = arith.constant dense<0.000000e+00> : vector<8x256xf32>
    %243 = tpu.matmul %241, %242, %cst_186 {dimension_numbers = #tpu.dot_dimension_numbers<[1], [0], [0], [1], [0, 0, 1, 1], [], []>} : vector<8x72xbf16>, vector<72x256xbf16>, vector<8x256xf32> -> vector<8x256xf32>
    %c64_187 = arith.constant 64 : index
    %c0_188 = arith.constant 0 : index
    %244 = vector.load %arg4[%c64_187, %c0_188] : memref<184x1xf32, #tpu.memory_space<vmem>>, vector<8x1xf32>
    %245 = vector.broadcast %244 : vector<8x1xf32> to vector<8x256xf32>
    %246 = arith.addf %243, %245 : vector<8x256xf32>
    %cst_189 = arith.constant 0.000000e+00 : f32
    %247 = vector.broadcast %cst_189 : f32 to vector<8x256xf32>
    %248 = arith.maximumf %246, %247 : vector<8x256xf32>
    %249 = tpu.concatenate %127, %248 in 0 : vector<8x256xf32>, vector<8x256xf32> -> vector<16x256xf32>
    %c88 = arith.constant 88 : index
    %c0_190 = arith.constant 0 : index
    %250 = vector.load %arg3[%c88, %c0_190] : memref<168x256xf32, #tpu.memory_space<vmem>>, vector<8x16xf32>
    %251 = arith.truncf %250 : vector<8x16xf32> to vector<8x16xbf16>
    %252 = arith.truncf %249 : vector<16x256xf32> to vector<16x256xbf16>
    %cst_191 = arith.constant dense<0.000000e+00> : vector<8x256xf32>
    %253 = tpu.matmul %251, %252, %cst_191 {dimension_numbers = #tpu.dot_dimension_numbers<[1], [0], [0], [1], [0, 0, 1, 1], [], []>} : vector<8x16xbf16>, vector<16x256xbf16>, vector<8x256xf32> -> vector<8x256xf32>
    %c88_192 = arith.constant 88 : index
    %c0_193 = arith.constant 0 : index
    %254 = vector.load %arg4[%c88_192, %c0_193] : memref<184x1xf32, #tpu.memory_space<vmem>>, vector<8x1xf32>
    %255 = vector.broadcast %254 : vector<8x1xf32> to vector<8x256xf32>
    %256 = arith.addf %253, %255 : vector<8x256xf32>
    %cst_194 = arith.constant 0.000000e+00 : f32
    %257 = vector.broadcast %cst_194 : f32 to vector<8x256xf32>
    %258 = arith.maximumf %256, %257 : vector<8x256xf32>
    %c17_i32_195 = arith.constant 17 : i32
    %259 = tpu.dynamic_rotate %258 by %c17_i32_195 dim 1 : vector<8x256xf32>, i32 -> vector<8x256xf32>
    %c0_196 = arith.constant 0 : index
    %c0_197 = arith.constant 0 : index
    %260 = vector.load %arg2[%c0_196, %c0_197] : memref<80x256xf32, #tpu.memory_space<vmem>>, vector<8x256xf32>
    %261 = arith.mulf %259, %260 : vector<8x256xf32>
    %c16_i32_198 = arith.constant 16 : i32
    %262 = tpu.dynamic_rotate %258 by %c16_i32_198 dim 1 : vector<8x256xf32>, i32 -> vector<8x256xf32>
    %c8_199 = arith.constant 8 : index
    %c0_200 = arith.constant 0 : index
    %263 = vector.load %arg2[%c8_199, %c0_200] : memref<80x256xf32, #tpu.memory_space<vmem>>, vector<8x256xf32>
    %264 = arith.mulf %262, %263 : vector<8x256xf32>
    %c15_i32_201 = arith.constant 15 : i32
    %265 = tpu.dynamic_rotate %258 by %c15_i32_201 dim 1 : vector<8x256xf32>, i32 -> vector<8x256xf32>
    %c16_202 = arith.constant 16 : index
    %c0_203 = arith.constant 0 : index
    %266 = vector.load %arg2[%c16_202, %c0_203] : memref<80x256xf32, #tpu.memory_space<vmem>>, vector<8x256xf32>
    %267 = arith.mulf %265, %266 : vector<8x256xf32>
    %c1_i32_204 = arith.constant 1 : i32
    %268 = tpu.dynamic_rotate %258 by %c1_i32_204 dim 1 : vector<8x256xf32>, i32 -> vector<8x256xf32>
    %c24_205 = arith.constant 24 : index
    %c0_206 = arith.constant 0 : index
    %269 = vector.load %arg2[%c24_205, %c0_206] : memref<80x256xf32, #tpu.memory_space<vmem>>, vector<8x256xf32>
    %270 = arith.mulf %268, %269 : vector<8x256xf32>
    %c255_i32_207 = arith.constant 255 : i32
    %271 = tpu.dynamic_rotate %258 by %c255_i32_207 dim 1 : vector<8x256xf32>, i32 -> vector<8x256xf32>
    %c40_208 = arith.constant 40 : index
    %c0_209 = arith.constant 0 : index
    %272 = vector.load %arg2[%c40_208, %c0_209] : memref<80x256xf32, #tpu.memory_space<vmem>>, vector<8x256xf32>
    %273 = arith.mulf %271, %272 : vector<8x256xf32>
    %c241_i32_210 = arith.constant 241 : i32
    %274 = tpu.dynamic_rotate %258 by %c241_i32_210 dim 1 : vector<8x256xf32>, i32 -> vector<8x256xf32>
    %c48_211 = arith.constant 48 : index
    %c0_212 = arith.constant 0 : index
    %275 = vector.load %arg2[%c48_211, %c0_212] : memref<80x256xf32, #tpu.memory_space<vmem>>, vector<8x256xf32>
    %276 = arith.mulf %274, %275 : vector<8x256xf32>
    %c240_i32_213 = arith.constant 240 : i32
    %277 = tpu.dynamic_rotate %258 by %c240_i32_213 dim 1 : vector<8x256xf32>, i32 -> vector<8x256xf32>
    %c56_214 = arith.constant 56 : index
    %c0_215 = arith.constant 0 : index
    %278 = vector.load %arg2[%c56_214, %c0_215] : memref<80x256xf32, #tpu.memory_space<vmem>>, vector<8x256xf32>
    %279 = arith.mulf %277, %278 : vector<8x256xf32>
    %c239_i32_216 = arith.constant 239 : i32
    %280 = tpu.dynamic_rotate %258 by %c239_i32_216 dim 1 : vector<8x256xf32>, i32 -> vector<8x256xf32>
    %c64_217 = arith.constant 64 : index
    %c0_218 = arith.constant 0 : index
    %281 = vector.load %arg2[%c64_217, %c0_218] : memref<80x256xf32, #tpu.memory_space<vmem>>, vector<8x256xf32>
    %282 = arith.mulf %280, %281 : vector<8x256xf32>
    %283 = tpu.concatenate %261, %264, %267, %270, %258, %273, %276, %279, %282 in 0 : vector<8x256xf32>, vector<8x256xf32>, vector<8x256xf32>, vector<8x256xf32>, vector<8x256xf32>, vector<8x256xf32>, vector<8x256xf32>, vector<8x256xf32>, vector<8x256xf32> -> vector<72x256xf32>
    %c96 = arith.constant 96 : index
    %c0_219 = arith.constant 0 : index
    %284 = vector.load %arg3[%c96, %c0_219] : memref<168x256xf32, #tpu.memory_space<vmem>>, vector<8x72xf32>
    %285 = arith.truncf %284 : vector<8x72xf32> to vector<8x72xbf16>
    %286 = arith.truncf %283 : vector<72x256xf32> to vector<72x256xbf16>
    %cst_220 = arith.constant dense<0.000000e+00> : vector<8x256xf32>
    %287 = tpu.matmul %285, %286, %cst_220 {dimension_numbers = #tpu.dot_dimension_numbers<[1], [0], [0], [1], [0, 0, 1, 1], [], []>} : vector<8x72xbf16>, vector<72x256xbf16>, vector<8x256xf32> -> vector<8x256xf32>
    %c96_221 = arith.constant 96 : index
    %c0_222 = arith.constant 0 : index
    %288 = vector.load %arg4[%c96_221, %c0_222] : memref<184x1xf32, #tpu.memory_space<vmem>>, vector<8x1xf32>
    %289 = vector.broadcast %288 : vector<8x1xf32> to vector<8x256xf32>
    %290 = arith.addf %287, %289 : vector<8x256xf32>
    %c17_i32_223 = arith.constant 17 : i32
    %291 = tpu.dynamic_rotate %290 by %c17_i32_223 dim 1 : vector<8x256xf32>, i32 -> vector<8x256xf32>
    %c0_224 = arith.constant 0 : index
    %c0_225 = arith.constant 0 : index
    %292 = vector.load %arg2[%c0_224, %c0_225] : memref<80x256xf32, #tpu.memory_space<vmem>>, vector<8x256xf32>
    %293 = arith.mulf %291, %292 : vector<8x256xf32>
    %c16_i32_226 = arith.constant 16 : i32
    %294 = tpu.dynamic_rotate %290 by %c16_i32_226 dim 1 : vector<8x256xf32>, i32 -> vector<8x256xf32>
    %c8_227 = arith.constant 8 : index
    %c0_228 = arith.constant 0 : index
    %295 = vector.load %arg2[%c8_227, %c0_228] : memref<80x256xf32, #tpu.memory_space<vmem>>, vector<8x256xf32>
    %296 = arith.mulf %294, %295 : vector<8x256xf32>
    %c15_i32_229 = arith.constant 15 : i32
    %297 = tpu.dynamic_rotate %290 by %c15_i32_229 dim 1 : vector<8x256xf32>, i32 -> vector<8x256xf32>
    %c16_230 = arith.constant 16 : index
    %c0_231 = arith.constant 0 : index
    %298 = vector.load %arg2[%c16_230, %c0_231] : memref<80x256xf32, #tpu.memory_space<vmem>>, vector<8x256xf32>
    %299 = arith.mulf %297, %298 : vector<8x256xf32>
    %c1_i32_232 = arith.constant 1 : i32
    %300 = tpu.dynamic_rotate %290 by %c1_i32_232 dim 1 : vector<8x256xf32>, i32 -> vector<8x256xf32>
    %c24_233 = arith.constant 24 : index
    %c0_234 = arith.constant 0 : index
    %301 = vector.load %arg2[%c24_233, %c0_234] : memref<80x256xf32, #tpu.memory_space<vmem>>, vector<8x256xf32>
    %302 = arith.mulf %300, %301 : vector<8x256xf32>
    %c255_i32_235 = arith.constant 255 : i32
    %303 = tpu.dynamic_rotate %290 by %c255_i32_235 dim 1 : vector<8x256xf32>, i32 -> vector<8x256xf32>
    %c40_236 = arith.constant 40 : index
    %c0_237 = arith.constant 0 : index
    %304 = vector.load %arg2[%c40_236, %c0_237] : memref<80x256xf32, #tpu.memory_space<vmem>>, vector<8x256xf32>
    %305 = arith.mulf %303, %304 : vector<8x256xf32>
    %c241_i32_238 = arith.constant 241 : i32
    %306 = tpu.dynamic_rotate %290 by %c241_i32_238 dim 1 : vector<8x256xf32>, i32 -> vector<8x256xf32>
    %c48_239 = arith.constant 48 : index
    %c0_240 = arith.constant 0 : index
    %307 = vector.load %arg2[%c48_239, %c0_240] : memref<80x256xf32, #tpu.memory_space<vmem>>, vector<8x256xf32>
    %308 = arith.mulf %306, %307 : vector<8x256xf32>
    %c240_i32_241 = arith.constant 240 : i32
    %309 = tpu.dynamic_rotate %290 by %c240_i32_241 dim 1 : vector<8x256xf32>, i32 -> vector<8x256xf32>
    %c56_242 = arith.constant 56 : index
    %c0_243 = arith.constant 0 : index
    %310 = vector.load %arg2[%c56_242, %c0_243] : memref<80x256xf32, #tpu.memory_space<vmem>>, vector<8x256xf32>
    %311 = arith.mulf %309, %310 : vector<8x256xf32>
    %c239_i32_244 = arith.constant 239 : i32
    %312 = tpu.dynamic_rotate %290 by %c239_i32_244 dim 1 : vector<8x256xf32>, i32 -> vector<8x256xf32>
    %c64_245 = arith.constant 64 : index
    %c0_246 = arith.constant 0 : index
    %313 = vector.load %arg2[%c64_245, %c0_246] : memref<80x256xf32, #tpu.memory_space<vmem>>, vector<8x256xf32>
    %314 = arith.mulf %312, %313 : vector<8x256xf32>
    %315 = tpu.concatenate %293, %296, %299, %302, %290, %305, %308, %311, %314 in 0 : vector<8x256xf32>, vector<8x256xf32>, vector<8x256xf32>, vector<8x256xf32>, vector<8x256xf32>, vector<8x256xf32>, vector<8x256xf32>, vector<8x256xf32>, vector<8x256xf32> -> vector<72x256xf32>
    %c104 = arith.constant 104 : index
    %c0_247 = arith.constant 0 : index
    %316 = vector.load %arg3[%c104, %c0_247] : memref<168x256xf32, #tpu.memory_space<vmem>>, vector<8x72xf32>
    %317 = arith.truncf %316 : vector<8x72xf32> to vector<8x72xbf16>
    %318 = arith.truncf %315 : vector<72x256xf32> to vector<72x256xbf16>
    %cst_248 = arith.constant dense<0.000000e+00> : vector<8x256xf32>
    %319 = tpu.matmul %317, %318, %cst_248 {dimension_numbers = #tpu.dot_dimension_numbers<[1], [0], [0], [1], [0, 0, 1, 1], [], []>} : vector<8x72xbf16>, vector<72x256xbf16>, vector<8x256xf32> -> vector<8x256xf32>
    %c104_249 = arith.constant 104 : index
    %c0_250 = arith.constant 0 : index
    %320 = vector.load %arg4[%c104_249, %c0_250] : memref<184x1xf32, #tpu.memory_space<vmem>>, vector<8x1xf32>
    %321 = vector.broadcast %320 : vector<8x1xf32> to vector<8x256xf32>
    %322 = arith.addf %319, %321 : vector<8x256xf32>
    %cst_251 = arith.constant 0.000000e+00 : f32
    %323 = vector.broadcast %cst_251 : f32 to vector<8x256xf32>
    %324 = arith.maximumf %322, %323 : vector<8x256xf32>
    %c17_i32_252 = arith.constant 17 : i32
    %325 = tpu.dynamic_rotate %324 by %c17_i32_252 dim 1 : vector<8x256xf32>, i32 -> vector<8x256xf32>
    %c0_253 = arith.constant 0 : index
    %c0_254 = arith.constant 0 : index
    %326 = vector.load %arg2[%c0_253, %c0_254] : memref<80x256xf32, #tpu.memory_space<vmem>>, vector<8x256xf32>
    %327 = arith.mulf %325, %326 : vector<8x256xf32>
    %c16_i32_255 = arith.constant 16 : i32
    %328 = tpu.dynamic_rotate %324 by %c16_i32_255 dim 1 : vector<8x256xf32>, i32 -> vector<8x256xf32>
    %c8_256 = arith.constant 8 : index
    %c0_257 = arith.constant 0 : index
    %329 = vector.load %arg2[%c8_256, %c0_257] : memref<80x256xf32, #tpu.memory_space<vmem>>, vector<8x256xf32>
    %330 = arith.mulf %328, %329 : vector<8x256xf32>
    %c15_i32_258 = arith.constant 15 : i32
    %331 = tpu.dynamic_rotate %324 by %c15_i32_258 dim 1 : vector<8x256xf32>, i32 -> vector<8x256xf32>
    %c16_259 = arith.constant 16 : index
    %c0_260 = arith.constant 0 : index
    %332 = vector.load %arg2[%c16_259, %c0_260] : memref<80x256xf32, #tpu.memory_space<vmem>>, vector<8x256xf32>
    %333 = arith.mulf %331, %332 : vector<8x256xf32>
    %c1_i32_261 = arith.constant 1 : i32
    %334 = tpu.dynamic_rotate %324 by %c1_i32_261 dim 1 : vector<8x256xf32>, i32 -> vector<8x256xf32>
    %c24_262 = arith.constant 24 : index
    %c0_263 = arith.constant 0 : index
    %335 = vector.load %arg2[%c24_262, %c0_263] : memref<80x256xf32, #tpu.memory_space<vmem>>, vector<8x256xf32>
    %336 = arith.mulf %334, %335 : vector<8x256xf32>
    %c255_i32_264 = arith.constant 255 : i32
    %337 = tpu.dynamic_rotate %324 by %c255_i32_264 dim 1 : vector<8x256xf32>, i32 -> vector<8x256xf32>
    %c40_265 = arith.constant 40 : index
    %c0_266 = arith.constant 0 : index
    %338 = vector.load %arg2[%c40_265, %c0_266] : memref<80x256xf32, #tpu.memory_space<vmem>>, vector<8x256xf32>
    %339 = arith.mulf %337, %338 : vector<8x256xf32>
    %c241_i32_267 = arith.constant 241 : i32
    %340 = tpu.dynamic_rotate %324 by %c241_i32_267 dim 1 : vector<8x256xf32>, i32 -> vector<8x256xf32>
    %c48_268 = arith.constant 48 : index
    %c0_269 = arith.constant 0 : index
    %341 = vector.load %arg2[%c48_268, %c0_269] : memref<80x256xf32, #tpu.memory_space<vmem>>, vector<8x256xf32>
    %342 = arith.mulf %340, %341 : vector<8x256xf32>
    %c240_i32_270 = arith.constant 240 : i32
    %343 = tpu.dynamic_rotate %324 by %c240_i32_270 dim 1 : vector<8x256xf32>, i32 -> vector<8x256xf32>
    %c56_271 = arith.constant 56 : index
    %c0_272 = arith.constant 0 : index
    %344 = vector.load %arg2[%c56_271, %c0_272] : memref<80x256xf32, #tpu.memory_space<vmem>>, vector<8x256xf32>
    %345 = arith.mulf %343, %344 : vector<8x256xf32>
    %c239_i32_273 = arith.constant 239 : i32
    %346 = tpu.dynamic_rotate %324 by %c239_i32_273 dim 1 : vector<8x256xf32>, i32 -> vector<8x256xf32>
    %c64_274 = arith.constant 64 : index
    %c0_275 = arith.constant 0 : index
    %347 = vector.load %arg2[%c64_274, %c0_275] : memref<80x256xf32, #tpu.memory_space<vmem>>, vector<8x256xf32>
    %348 = arith.mulf %346, %347 : vector<8x256xf32>
    %349 = tpu.concatenate %327, %330, %333, %336, %324, %339, %342, %345, %348 in 0 : vector<8x256xf32>, vector<8x256xf32>, vector<8x256xf32>, vector<8x256xf32>, vector<8x256xf32>, vector<8x256xf32>, vector<8x256xf32>, vector<8x256xf32>, vector<8x256xf32> -> vector<72x256xf32>
    %c112 = arith.constant 112 : index
    %c0_276 = arith.constant 0 : index
    %350 = vector.load %arg3[%c112, %c0_276] : memref<168x256xf32, #tpu.memory_space<vmem>>, vector<8x72xf32>
    %351 = arith.truncf %350 : vector<8x72xf32> to vector<8x72xbf16>
    %352 = arith.truncf %349 : vector<72x256xf32> to vector<72x256xbf16>
    %cst_277 = arith.constant dense<0.000000e+00> : vector<8x256xf32>
    %353 = tpu.matmul %351, %352, %cst_277 {dimension_numbers = #tpu.dot_dimension_numbers<[1], [0], [0], [1], [0, 0, 1, 1], [], []>} : vector<8x72xbf16>, vector<72x256xbf16>, vector<8x256xf32> -> vector<8x256xf32>
    %c112_278 = arith.constant 112 : index
    %c0_279 = arith.constant 0 : index
    %354 = vector.load %arg4[%c112_278, %c0_279] : memref<184x1xf32, #tpu.memory_space<vmem>>, vector<8x1xf32>
    %355 = vector.broadcast %354 : vector<8x1xf32> to vector<8x256xf32>
    %356 = arith.addf %353, %355 : vector<8x256xf32>
    %357 = vector.extract_strided_slice %356 {offsets = [0, 0], sizes = [1, 256], strides = [1, 1]} : vector<8x256xf32> to vector<1x256xf32>
    %c72_280 = arith.constant 72 : index
    %c0_281 = arith.constant 0 : index
    %358 = vector.load %arg2[%c72_280, %c0_281] : memref<80x256xf32, #tpu.memory_space<vmem>>, vector<1x256xf32>
    %c73 = arith.constant 73 : index
    %c0_282 = arith.constant 0 : index
    %359 = vector.load %arg2[%c73, %c0_282] : memref<80x256xf32, #tpu.memory_space<vmem>>, vector<1x256xf32>
    %c240_i32_283 = arith.constant 240 : i32
    %360 = tpu.dynamic_rotate %357 by %c240_i32_283 dim 1 : vector<1x256xf32>, i32 -> vector<1x256xf32>
    %361 = arith.subf %357, %360 : vector<1x256xf32>
    %362 = math.absf %361 : vector<1x256xf32>
    %363 = arith.mulf %358, %362 : vector<1x256xf32>
    %cst_284 = arith.constant 1.000000e+00 : f32
    %364 = vector.broadcast %cst_284 : f32 to vector<1x256xf32>
    %365 = arith.subf %364, %358 : vector<1x256xf32>
    %366 = arith.mulf %365, %357 : vector<1x256xf32>
    %367 = arith.addf %363, %366 : vector<1x256xf32>
    %c255_i32_285 = arith.constant 255 : i32
    %368 = tpu.dynamic_rotate %367 by %c255_i32_285 dim 1 : vector<1x256xf32>, i32 -> vector<1x256xf32>
    %369 = arith.subf %367, %368 : vector<1x256xf32>
    %370 = math.absf %369 : vector<1x256xf32>
    %371 = arith.mulf %359, %370 : vector<1x256xf32>
    %cst_286 = arith.constant 1.000000e+00 : f32
    %372 = vector.broadcast %cst_286 : f32 to vector<1x256xf32>
    %373 = arith.subf %372, %359 : vector<1x256xf32>
    %374 = arith.mulf %373, %367 : vector<1x256xf32>
    %375 = arith.addf %371, %374 : vector<1x256xf32>
    %376 = arith.subf %357, %375 : vector<1x256xf32>
    %cst_287 = arith.constant 0.000000e+00 : f32
    %cst_288 = arith.constant 1.000000e+00 : f32
    %377 = vector.broadcast %cst_287 : f32 to vector<1x256xf32>
    %378 = arith.maximumf %377, %376 : vector<1x256xf32>
    %379 = vector.broadcast %cst_288 : f32 to vector<1x256xf32>
    %380 = arith.minimumf %379, %378 : vector<1x256xf32>
    %c120 = arith.constant 120 : index
    %c0_289 = arith.constant 0 : index
    %381 = vector.load %arg3[%c120, %c0_289] : memref<168x256xf32, #tpu.memory_space<vmem>>, vector<8x8xf32>
    %382 = arith.truncf %381 : vector<8x8xf32> to vector<8x8xbf16>
    %383 = arith.truncf %4 : vector<8x256xf32> to vector<8x256xbf16>
    %cst_290 = arith.constant dense<0.000000e+00> : vector<8x256xf32>
    %384 = tpu.matmul %382, %383, %cst_290 {dimension_numbers = #tpu.dot_dimension_numbers<[1], [0], [0], [1], [0, 0, 1, 1], [], []>} : vector<8x8xbf16>, vector<8x256xbf16>, vector<8x256xf32> -> vector<8x256xf32>
    %c120_291 = arith.constant 120 : index
    %c0_292 = arith.constant 0 : index
    %385 = vector.load %arg4[%c120_291, %c0_292] : memref<184x1xf32, #tpu.memory_space<vmem>>, vector<8x1xf32>
    %386 = vector.broadcast %385 : vector<8x1xf32> to vector<8x256xf32>
    %387 = arith.addf %384, %386 : vector<8x256xf32>
    %c17_i32_293 = arith.constant 17 : i32
    %388 = tpu.dynamic_rotate %387 by %c17_i32_293 dim 1 : vector<8x256xf32>, i32 -> vector<8x256xf32>
    %c0_294 = arith.constant 0 : index
    %c0_295 = arith.constant 0 : index
    %389 = vector.load %arg2[%c0_294, %c0_295] : memref<80x256xf32, #tpu.memory_space<vmem>>, vector<8x256xf32>
    %390 = arith.mulf %388, %389 : vector<8x256xf32>
    %c16_i32_296 = arith.constant 16 : i32
    %391 = tpu.dynamic_rotate %387 by %c16_i32_296 dim 1 : vector<8x256xf32>, i32 -> vector<8x256xf32>
    %c8_297 = arith.constant 8 : index
    %c0_298 = arith.constant 0 : index
    %392 = vector.load %arg2[%c8_297, %c0_298] : memref<80x256xf32, #tpu.memory_space<vmem>>, vector<8x256xf32>
    %393 = arith.mulf %391, %392 : vector<8x256xf32>
    %c15_i32_299 = arith.constant 15 : i32
    %394 = tpu.dynamic_rotate %387 by %c15_i32_299 dim 1 : vector<8x256xf32>, i32 -> vector<8x256xf32>
    %c16_300 = arith.constant 16 : index
    %c0_301 = arith.constant 0 : index
    %395 = vector.load %arg2[%c16_300, %c0_301] : memref<80x256xf32, #tpu.memory_space<vmem>>, vector<8x256xf32>
    %396 = arith.mulf %394, %395 : vector<8x256xf32>
    %c1_i32_302 = arith.constant 1 : i32
    %397 = tpu.dynamic_rotate %387 by %c1_i32_302 dim 1 : vector<8x256xf32>, i32 -> vector<8x256xf32>
    %c24_303 = arith.constant 24 : index
    %c0_304 = arith.constant 0 : index
    %398 = vector.load %arg2[%c24_303, %c0_304] : memref<80x256xf32, #tpu.memory_space<vmem>>, vector<8x256xf32>
    %399 = arith.mulf %397, %398 : vector<8x256xf32>
    %c255_i32_305 = arith.constant 255 : i32
    %400 = tpu.dynamic_rotate %387 by %c255_i32_305 dim 1 : vector<8x256xf32>, i32 -> vector<8x256xf32>
    %c40_306 = arith.constant 40 : index
    %c0_307 = arith.constant 0 : index
    %401 = vector.load %arg2[%c40_306, %c0_307] : memref<80x256xf32, #tpu.memory_space<vmem>>, vector<8x256xf32>
    %402 = arith.mulf %400, %401 : vector<8x256xf32>
    %c241_i32_308 = arith.constant 241 : i32
    %403 = tpu.dynamic_rotate %387 by %c241_i32_308 dim 1 : vector<8x256xf32>, i32 -> vector<8x256xf32>
    %c48_309 = arith.constant 48 : index
    %c0_310 = arith.constant 0 : index
    %404 = vector.load %arg2[%c48_309, %c0_310] : memref<80x256xf32, #tpu.memory_space<vmem>>, vector<8x256xf32>
    %405 = arith.mulf %403, %404 : vector<8x256xf32>
    %c240_i32_311 = arith.constant 240 : i32
    %406 = tpu.dynamic_rotate %387 by %c240_i32_311 dim 1 : vector<8x256xf32>, i32 -> vector<8x256xf32>
    %c56_312 = arith.constant 56 : index
    %c0_313 = arith.constant 0 : index
    %407 = vector.load %arg2[%c56_312, %c0_313] : memref<80x256xf32, #tpu.memory_space<vmem>>, vector<8x256xf32>
    %408 = arith.mulf %406, %407 : vector<8x256xf32>
    %c239_i32_314 = arith.constant 239 : i32
    %409 = tpu.dynamic_rotate %387 by %c239_i32_314 dim 1 : vector<8x256xf32>, i32 -> vector<8x256xf32>
    %c64_315 = arith.constant 64 : index
    %c0_316 = arith.constant 0 : index
    %410 = vector.load %arg2[%c64_315, %c0_316] : memref<80x256xf32, #tpu.memory_space<vmem>>, vector<8x256xf32>
    %411 = arith.mulf %409, %410 : vector<8x256xf32>
    %412 = tpu.concatenate %390, %393, %396, %399, %387, %402, %405, %408, %411 in 0 : vector<8x256xf32>, vector<8x256xf32>, vector<8x256xf32>, vector<8x256xf32>, vector<8x256xf32>, vector<8x256xf32>, vector<8x256xf32>, vector<8x256xf32>, vector<8x256xf32> -> vector<72x256xf32>
    %c128 = arith.constant 128 : index
    %c0_317 = arith.constant 0 : index
    %413 = vector.load %arg3[%c128, %c0_317] : memref<168x256xf32, #tpu.memory_space<vmem>>, vector<8x72xf32>
    %414 = arith.truncf %413 : vector<8x72xf32> to vector<8x72xbf16>
    %415 = arith.truncf %412 : vector<72x256xf32> to vector<72x256xbf16>
    %cst_318 = arith.constant dense<0.000000e+00> : vector<8x256xf32>
    %416 = tpu.matmul %414, %415, %cst_318 {dimension_numbers = #tpu.dot_dimension_numbers<[1], [0], [0], [1], [0, 0, 1, 1], [], []>} : vector<8x72xbf16>, vector<72x256xbf16>, vector<8x256xf32> -> vector<8x256xf32>
    %c128_319 = arith.constant 128 : index
    %c0_320 = arith.constant 0 : index
    %417 = vector.load %arg4[%c128_319, %c0_320] : memref<184x1xf32, #tpu.memory_space<vmem>>, vector<8x1xf32>
    %418 = vector.broadcast %417 : vector<8x1xf32> to vector<8x256xf32>
    %419 = arith.addf %416, %418 : vector<8x256xf32>
    %c17_i32_321 = arith.constant 17 : i32
    %420 = tpu.dynamic_rotate %419 by %c17_i32_321 dim 1 : vector<8x256xf32>, i32 -> vector<8x256xf32>
    %c0_322 = arith.constant 0 : index
    %c0_323 = arith.constant 0 : index
    %421 = vector.load %arg2[%c0_322, %c0_323] : memref<80x256xf32, #tpu.memory_space<vmem>>, vector<8x256xf32>
    %422 = arith.mulf %420, %421 : vector<8x256xf32>
    %c16_i32_324 = arith.constant 16 : i32
    %423 = tpu.dynamic_rotate %419 by %c16_i32_324 dim 1 : vector<8x256xf32>, i32 -> vector<8x256xf32>
    %c8_325 = arith.constant 8 : index
    %c0_326 = arith.constant 0 : index
    %424 = vector.load %arg2[%c8_325, %c0_326] : memref<80x256xf32, #tpu.memory_space<vmem>>, vector<8x256xf32>
    %425 = arith.mulf %423, %424 : vector<8x256xf32>
    %c15_i32_327 = arith.constant 15 : i32
    %426 = tpu.dynamic_rotate %419 by %c15_i32_327 dim 1 : vector<8x256xf32>, i32 -> vector<8x256xf32>
    %c16_328 = arith.constant 16 : index
    %c0_329 = arith.constant 0 : index
    %427 = vector.load %arg2[%c16_328, %c0_329] : memref<80x256xf32, #tpu.memory_space<vmem>>, vector<8x256xf32>
    %428 = arith.mulf %426, %427 : vector<8x256xf32>
    %c1_i32_330 = arith.constant 1 : i32
    %429 = tpu.dynamic_rotate %419 by %c1_i32_330 dim 1 : vector<8x256xf32>, i32 -> vector<8x256xf32>
    %c24_331 = arith.constant 24 : index
    %c0_332 = arith.constant 0 : index
    %430 = vector.load %arg2[%c24_331, %c0_332] : memref<80x256xf32, #tpu.memory_space<vmem>>, vector<8x256xf32>
    %431 = arith.mulf %429, %430 : vector<8x256xf32>
    %c255_i32_333 = arith.constant 255 : i32
    %432 = tpu.dynamic_rotate %419 by %c255_i32_333 dim 1 : vector<8x256xf32>, i32 -> vector<8x256xf32>
    %c40_334 = arith.constant 40 : index
    %c0_335 = arith.constant 0 : index
    %433 = vector.load %arg2[%c40_334, %c0_335] : memref<80x256xf32, #tpu.memory_space<vmem>>, vector<8x256xf32>
    %434 = arith.mulf %432, %433 : vector<8x256xf32>
    %c241_i32_336 = arith.constant 241 : i32
    %435 = tpu.dynamic_rotate %419 by %c241_i32_336 dim 1 : vector<8x256xf32>, i32 -> vector<8x256xf32>
    %c48_337 = arith.constant 48 : index
    %c0_338 = arith.constant 0 : index
    %436 = vector.load %arg2[%c48_337, %c0_338] : memref<80x256xf32, #tpu.memory_space<vmem>>, vector<8x256xf32>
    %437 = arith.mulf %435, %436 : vector<8x256xf32>
    %c240_i32_339 = arith.constant 240 : i32
    %438 = tpu.dynamic_rotate %419 by %c240_i32_339 dim 1 : vector<8x256xf32>, i32 -> vector<8x256xf32>
    %c56_340 = arith.constant 56 : index
    %c0_341 = arith.constant 0 : index
    %439 = vector.load %arg2[%c56_340, %c0_341] : memref<80x256xf32, #tpu.memory_space<vmem>>, vector<8x256xf32>
    %440 = arith.mulf %438, %439 : vector<8x256xf32>
    %c239_i32_342 = arith.constant 239 : i32
    %441 = tpu.dynamic_rotate %419 by %c239_i32_342 dim 1 : vector<8x256xf32>, i32 -> vector<8x256xf32>
    %c64_343 = arith.constant 64 : index
    %c0_344 = arith.constant 0 : index
    %442 = vector.load %arg2[%c64_343, %c0_344] : memref<80x256xf32, #tpu.memory_space<vmem>>, vector<8x256xf32>
    %443 = arith.mulf %441, %442 : vector<8x256xf32>
    %444 = tpu.concatenate %422, %425, %428, %431, %419, %434, %437, %440, %443 in 0 : vector<8x256xf32>, vector<8x256xf32>, vector<8x256xf32>, vector<8x256xf32>, vector<8x256xf32>, vector<8x256xf32>, vector<8x256xf32>, vector<8x256xf32>, vector<8x256xf32> -> vector<72x256xf32>
    %c136 = arith.constant 136 : index
    %c0_345 = arith.constant 0 : index
    %445 = vector.load %arg3[%c136, %c0_345] : memref<168x256xf32, #tpu.memory_space<vmem>>, vector<8x72xf32>
    %446 = arith.truncf %445 : vector<8x72xf32> to vector<8x72xbf16>
    %447 = arith.truncf %444 : vector<72x256xf32> to vector<72x256xbf16>
    %cst_346 = arith.constant dense<0.000000e+00> : vector<8x256xf32>
    %448 = tpu.matmul %446, %447, %cst_346 {dimension_numbers = #tpu.dot_dimension_numbers<[1], [0], [0], [1], [0, 0, 1, 1], [], []>} : vector<8x72xbf16>, vector<72x256xbf16>, vector<8x256xf32> -> vector<8x256xf32>
    %c136_347 = arith.constant 136 : index
    %c0_348 = arith.constant 0 : index
    %449 = vector.load %arg4[%c136_347, %c0_348] : memref<184x1xf32, #tpu.memory_space<vmem>>, vector<8x1xf32>
    %450 = vector.broadcast %449 : vector<8x1xf32> to vector<8x256xf32>
    %451 = arith.addf %448, %450 : vector<8x256xf32>
    %cst_349 = arith.constant 0.000000e+00 : f32
    %452 = vector.broadcast %cst_349 : f32 to vector<8x256xf32>
    %453 = arith.maximumf %451, %452 : vector<8x256xf32>
    %454 = math.absf %4 : vector<8x256xf32>
    %c168 = arith.constant 168 : index
    %c0_350 = arith.constant 0 : index
    %455 = vector.load %arg4[%c168, %c0_350] : memref<184x1xf32, #tpu.memory_space<vmem>>, vector<8x1xf32>
    %456 = vector.broadcast %455 : vector<8x1xf32> to vector<8x256xf32>
    %457 = arith.mulf %454, %456 : vector<8x256xf32>
    %c176 = arith.constant 176 : index
    %c0_351 = arith.constant 0 : index
    %458 = vector.load %arg4[%c176, %c0_351] : memref<184x1xf32, #tpu.memory_space<vmem>>, vector<8x1xf32>
    %459 = vector.broadcast %458 : vector<8x1xf32> to vector<8x256xf32>
    %460 = arith.addf %457, %459 : vector<8x256xf32>
    %cst_352 = arith.constant 0.000000e+00 : f32
    %461 = vector.broadcast %cst_352 : f32 to vector<8x256xf32>
    %462 = arith.maximumf %460, %461 : vector<8x256xf32>
    %463 = arith.addf %453, %462 : vector<8x256xf32>
    %cst_353 = arith.constant 0.000000e+00 : f32
    %464 = vector.broadcast %cst_353 : f32 to vector<1x256xf32>
    %465 = arith.subf %464, %1 : vector<1x256xf32>
    %466 = math.exp %465 : vector<1x256xf32>
    %cst_354 = arith.constant 1.000000e+00 : f32
    %467 = vector.broadcast %cst_354 : f32 to vector<1x256xf32>
    %468 = arith.addf %467, %466 : vector<1x256xf32>
    %469 = tpu.reciprocal %468 : vector<1x256xf32> -> vector<1x256xf32>
    %cst_355 = arith.constant 1.000000e+00 : f32
    %470 = vector.broadcast %cst_355 : f32 to vector<1x256xf32>
    %471 = arith.subf %470, %469 : vector<1x256xf32>
    %cst_356 = arith.constant 0.000000e+00 : f32
    %472 = vector.broadcast %cst_356 : f32 to vector<1x256xf32>
    %473 = arith.subf %472, %2 : vector<1x256xf32>
    %474 = math.exp %473 : vector<1x256xf32>
    %cst_357 = arith.constant 1.000000e+00 : f32
    %475 = vector.broadcast %cst_357 : f32 to vector<1x256xf32>
    %476 = arith.addf %475, %474 : vector<1x256xf32>
    %477 = tpu.reciprocal %476 : vector<1x256xf32> -> vector<1x256xf32>
    %cst_358 = arith.constant 1.000000e+00 : f32
    %478 = vector.broadcast %cst_358 : f32 to vector<1x256xf32>
    %479 = arith.subf %478, %477 : vector<1x256xf32>
    %480 = arith.addf %471, %479 : vector<1x256xf32>
    %481 = vector.broadcast %480 : vector<1x256xf32> to vector<8x256xf32>
    %482 = arith.mulf %481, %0 : vector<8x256xf32>
    %c17_i32_359 = arith.constant 17 : i32
    %483 = tpu.dynamic_rotate %258 by %c17_i32_359 dim 1 : vector<8x256xf32>, i32 -> vector<8x256xf32>
    %c0_360 = arith.constant 0 : index
    %c0_361 = arith.constant 0 : index
    %484 = vector.load %arg2[%c0_360, %c0_361] : memref<80x256xf32, #tpu.memory_space<vmem>>, vector<8x256xf32>
    %485 = arith.mulf %483, %484 : vector<8x256xf32>
    %c16_i32_362 = arith.constant 16 : i32
    %486 = tpu.dynamic_rotate %258 by %c16_i32_362 dim 1 : vector<8x256xf32>, i32 -> vector<8x256xf32>
    %c8_363 = arith.constant 8 : index
    %c0_364 = arith.constant 0 : index
    %487 = vector.load %arg2[%c8_363, %c0_364] : memref<80x256xf32, #tpu.memory_space<vmem>>, vector<8x256xf32>
    %488 = arith.mulf %486, %487 : vector<8x256xf32>
    %c15_i32_365 = arith.constant 15 : i32
    %489 = tpu.dynamic_rotate %258 by %c15_i32_365 dim 1 : vector<8x256xf32>, i32 -> vector<8x256xf32>
    %c16_366 = arith.constant 16 : index
    %c0_367 = arith.constant 0 : index
    %490 = vector.load %arg2[%c16_366, %c0_367] : memref<80x256xf32, #tpu.memory_space<vmem>>, vector<8x256xf32>
    %491 = arith.mulf %489, %490 : vector<8x256xf32>
    %c1_i32_368 = arith.constant 1 : i32
    %492 = tpu.dynamic_rotate %258 by %c1_i32_368 dim 1 : vector<8x256xf32>, i32 -> vector<8x256xf32>
    %c24_369 = arith.constant 24 : index
    %c0_370 = arith.constant 0 : index
    %493 = vector.load %arg2[%c24_369, %c0_370] : memref<80x256xf32, #tpu.memory_space<vmem>>, vector<8x256xf32>
    %494 = arith.mulf %492, %493 : vector<8x256xf32>
    %c255_i32_371 = arith.constant 255 : i32
    %495 = tpu.dynamic_rotate %258 by %c255_i32_371 dim 1 : vector<8x256xf32>, i32 -> vector<8x256xf32>
    %c40_372 = arith.constant 40 : index
    %c0_373 = arith.constant 0 : index
    %496 = vector.load %arg2[%c40_372, %c0_373] : memref<80x256xf32, #tpu.memory_space<vmem>>, vector<8x256xf32>
    %497 = arith.mulf %495, %496 : vector<8x256xf32>
    %c241_i32_374 = arith.constant 241 : i32
    %498 = tpu.dynamic_rotate %258 by %c241_i32_374 dim 1 : vector<8x256xf32>, i32 -> vector<8x256xf32>
    %c48_375 = arith.constant 48 : index
    %c0_376 = arith.constant 0 : index
    %499 = vector.load %arg2[%c48_375, %c0_376] : memref<80x256xf32, #tpu.memory_space<vmem>>, vector<8x256xf32>
    %500 = arith.mulf %498, %499 : vector<8x256xf32>
    %c240_i32_377 = arith.constant 240 : i32
    %501 = tpu.dynamic_rotate %258 by %c240_i32_377 dim 1 : vector<8x256xf32>, i32 -> vector<8x256xf32>
    %c56_378 = arith.constant 56 : index
    %c0_379 = arith.constant 0 : index
    %502 = vector.load %arg2[%c56_378, %c0_379] : memref<80x256xf32, #tpu.memory_space<vmem>>, vector<8x256xf32>
    %503 = arith.mulf %501, %502 : vector<8x256xf32>
    %c239_i32_380 = arith.constant 239 : i32
    %504 = tpu.dynamic_rotate %258 by %c239_i32_380 dim 1 : vector<8x256xf32>, i32 -> vector<8x256xf32>
    %c64_381 = arith.constant 64 : index
    %c0_382 = arith.constant 0 : index
    %505 = vector.load %arg2[%c64_381, %c0_382] : memref<80x256xf32, #tpu.memory_space<vmem>>, vector<8x256xf32>
    %506 = arith.mulf %504, %505 : vector<8x256xf32>
    %507 = tpu.concatenate %485, %488, %491, %494, %258, %497, %500, %503, %506 in 0 : vector<8x256xf32>, vector<8x256xf32>, vector<8x256xf32>, vector<8x256xf32>, vector<8x256xf32>, vector<8x256xf32>, vector<8x256xf32>, vector<8x256xf32>, vector<8x256xf32> -> vector<72x256xf32>
    %c17_i32_383 = arith.constant 17 : i32
    %508 = tpu.dynamic_rotate %482 by %c17_i32_383 dim 1 : vector<8x256xf32>, i32 -> vector<8x256xf32>
    %c0_384 = arith.constant 0 : index
    %c0_385 = arith.constant 0 : index
    %509 = vector.load %arg2[%c0_384, %c0_385] : memref<80x256xf32, #tpu.memory_space<vmem>>, vector<8x256xf32>
    %510 = arith.mulf %508, %509 : vector<8x256xf32>
    %c16_i32_386 = arith.constant 16 : i32
    %511 = tpu.dynamic_rotate %482 by %c16_i32_386 dim 1 : vector<8x256xf32>, i32 -> vector<8x256xf32>
    %c8_387 = arith.constant 8 : index
    %c0_388 = arith.constant 0 : index
    %512 = vector.load %arg2[%c8_387, %c0_388] : memref<80x256xf32, #tpu.memory_space<vmem>>, vector<8x256xf32>
    %513 = arith.mulf %511, %512 : vector<8x256xf32>
    %c15_i32_389 = arith.constant 15 : i32
    %514 = tpu.dynamic_rotate %482 by %c15_i32_389 dim 1 : vector<8x256xf32>, i32 -> vector<8x256xf32>
    %c16_390 = arith.constant 16 : index
    %c0_391 = arith.constant 0 : index
    %515 = vector.load %arg2[%c16_390, %c0_391] : memref<80x256xf32, #tpu.memory_space<vmem>>, vector<8x256xf32>
    %516 = arith.mulf %514, %515 : vector<8x256xf32>
    %c1_i32_392 = arith.constant 1 : i32
    %517 = tpu.dynamic_rotate %482 by %c1_i32_392 dim 1 : vector<8x256xf32>, i32 -> vector<8x256xf32>
    %c24_393 = arith.constant 24 : index
    %c0_394 = arith.constant 0 : index
    %518 = vector.load %arg2[%c24_393, %c0_394] : memref<80x256xf32, #tpu.memory_space<vmem>>, vector<8x256xf32>
    %519 = arith.mulf %517, %518 : vector<8x256xf32>
    %c255_i32_395 = arith.constant 255 : i32
    %520 = tpu.dynamic_rotate %482 by %c255_i32_395 dim 1 : vector<8x256xf32>, i32 -> vector<8x256xf32>
    %c40_396 = arith.constant 40 : index
    %c0_397 = arith.constant 0 : index
    %521 = vector.load %arg2[%c40_396, %c0_397] : memref<80x256xf32, #tpu.memory_space<vmem>>, vector<8x256xf32>
    %522 = arith.mulf %520, %521 : vector<8x256xf32>
    %c241_i32_398 = arith.constant 241 : i32
    %523 = tpu.dynamic_rotate %482 by %c241_i32_398 dim 1 : vector<8x256xf32>, i32 -> vector<8x256xf32>
    %c48_399 = arith.constant 48 : index
    %c0_400 = arith.constant 0 : index
    %524 = vector.load %arg2[%c48_399, %c0_400] : memref<80x256xf32, #tpu.memory_space<vmem>>, vector<8x256xf32>
    %525 = arith.mulf %523, %524 : vector<8x256xf32>
    %c240_i32_401 = arith.constant 240 : i32
    %526 = tpu.dynamic_rotate %482 by %c240_i32_401 dim 1 : vector<8x256xf32>, i32 -> vector<8x256xf32>
    %c56_402 = arith.constant 56 : index
    %c0_403 = arith.constant 0 : index
    %527 = vector.load %arg2[%c56_402, %c0_403] : memref<80x256xf32, #tpu.memory_space<vmem>>, vector<8x256xf32>
    %528 = arith.mulf %526, %527 : vector<8x256xf32>
    %c239_i32_404 = arith.constant 239 : i32
    %529 = tpu.dynamic_rotate %482 by %c239_i32_404 dim 1 : vector<8x256xf32>, i32 -> vector<8x256xf32>
    %c64_405 = arith.constant 64 : index
    %c0_406 = arith.constant 0 : index
    %530 = vector.load %arg2[%c64_405, %c0_406] : memref<80x256xf32, #tpu.memory_space<vmem>>, vector<8x256xf32>
    %531 = arith.mulf %529, %530 : vector<8x256xf32>
    %532 = tpu.concatenate %510, %513, %516, %519, %482, %522, %525, %528, %531 in 0 : vector<8x256xf32>, vector<8x256xf32>, vector<8x256xf32>, vector<8x256xf32>, vector<8x256xf32>, vector<8x256xf32>, vector<8x256xf32>, vector<8x256xf32>, vector<8x256xf32> -> vector<72x256xf32>
    %c17_i32_407 = arith.constant 17 : i32
    %533 = tpu.dynamic_rotate %463 by %c17_i32_407 dim 1 : vector<8x256xf32>, i32 -> vector<8x256xf32>
    %c0_408 = arith.constant 0 : index
    %c0_409 = arith.constant 0 : index
    %534 = vector.load %arg2[%c0_408, %c0_409] : memref<80x256xf32, #tpu.memory_space<vmem>>, vector<8x256xf32>
    %535 = arith.mulf %533, %534 : vector<8x256xf32>
    %c16_i32_410 = arith.constant 16 : i32
    %536 = tpu.dynamic_rotate %463 by %c16_i32_410 dim 1 : vector<8x256xf32>, i32 -> vector<8x256xf32>
    %c8_411 = arith.constant 8 : index
    %c0_412 = arith.constant 0 : index
    %537 = vector.load %arg2[%c8_411, %c0_412] : memref<80x256xf32, #tpu.memory_space<vmem>>, vector<8x256xf32>
    %538 = arith.mulf %536, %537 : vector<8x256xf32>
    %c15_i32_413 = arith.constant 15 : i32
    %539 = tpu.dynamic_rotate %463 by %c15_i32_413 dim 1 : vector<8x256xf32>, i32 -> vector<8x256xf32>
    %c16_414 = arith.constant 16 : index
    %c0_415 = arith.constant 0 : index
    %540 = vector.load %arg2[%c16_414, %c0_415] : memref<80x256xf32, #tpu.memory_space<vmem>>, vector<8x256xf32>
    %541 = arith.mulf %539, %540 : vector<8x256xf32>
    %c1_i32_416 = arith.constant 1 : i32
    %542 = tpu.dynamic_rotate %463 by %c1_i32_416 dim 1 : vector<8x256xf32>, i32 -> vector<8x256xf32>
    %c24_417 = arith.constant 24 : index
    %c0_418 = arith.constant 0 : index
    %543 = vector.load %arg2[%c24_417, %c0_418] : memref<80x256xf32, #tpu.memory_space<vmem>>, vector<8x256xf32>
    %544 = arith.mulf %542, %543 : vector<8x256xf32>
    %c255_i32_419 = arith.constant 255 : i32
    %545 = tpu.dynamic_rotate %463 by %c255_i32_419 dim 1 : vector<8x256xf32>, i32 -> vector<8x256xf32>
    %c40_420 = arith.constant 40 : index
    %c0_421 = arith.constant 0 : index
    %546 = vector.load %arg2[%c40_420, %c0_421] : memref<80x256xf32, #tpu.memory_space<vmem>>, vector<8x256xf32>
    %547 = arith.mulf %545, %546 : vector<8x256xf32>
    %c241_i32_422 = arith.constant 241 : i32
    %548 = tpu.dynamic_rotate %463 by %c241_i32_422 dim 1 : vector<8x256xf32>, i32 -> vector<8x256xf32>
    %c48_423 = arith.constant 48 : index
    %c0_424 = arith.constant 0 : index
    %549 = vector.load %arg2[%c48_423, %c0_424] : memref<80x256xf32, #tpu.memory_space<vmem>>, vector<8x256xf32>
    %550 = arith.mulf %548, %549 : vector<8x256xf32>
    %c240_i32_425 = arith.constant 240 : i32
    %551 = tpu.dynamic_rotate %463 by %c240_i32_425 dim 1 : vector<8x256xf32>, i32 -> vector<8x256xf32>
    %c56_426 = arith.constant 56 : index
    %c0_427 = arith.constant 0 : index
    %552 = vector.load %arg2[%c56_426, %c0_427] : memref<80x256xf32, #tpu.memory_space<vmem>>, vector<8x256xf32>
    %553 = arith.mulf %551, %552 : vector<8x256xf32>
    %c239_i32_428 = arith.constant 239 : i32
    %554 = tpu.dynamic_rotate %463 by %c239_i32_428 dim 1 : vector<8x256xf32>, i32 -> vector<8x256xf32>
    %c64_429 = arith.constant 64 : index
    %c0_430 = arith.constant 0 : index
    %555 = vector.load %arg2[%c64_429, %c0_430] : memref<80x256xf32, #tpu.memory_space<vmem>>, vector<8x256xf32>
    %556 = arith.mulf %554, %555 : vector<8x256xf32>
    %557 = tpu.concatenate %535, %538, %541, %544, %463, %547, %550, %553, %556 in 0 : vector<8x256xf32>, vector<8x256xf32>, vector<8x256xf32>, vector<8x256xf32>, vector<8x256xf32>, vector<8x256xf32>, vector<8x256xf32>, vector<8x256xf32>, vector<8x256xf32> -> vector<72x256xf32>
    %558 = tpu.concatenate %507, %532, %557 in 0 : vector<72x256xf32>, vector<72x256xf32>, vector<72x256xf32> -> vector<216x256xf32>
    %c144 = arith.constant 144 : index
    %c0_431 = arith.constant 0 : index
    %559 = vector.load %arg3[%c144, %c0_431] : memref<168x256xf32, #tpu.memory_space<vmem>>, vector<8x216xf32>
    %560 = arith.truncf %559 : vector<8x216xf32> to vector<8x216xbf16>
    %561 = arith.truncf %558 : vector<216x256xf32> to vector<216x256xbf16>
    %cst_432 = arith.constant dense<0.000000e+00> : vector<8x256xf32>
    %562 = tpu.matmul %560, %561, %cst_432 {dimension_numbers = #tpu.dot_dimension_numbers<[1], [0], [0], [1], [0, 0, 1, 1], [], []>} : vector<8x216xbf16>, vector<216x256xbf16>, vector<8x256xf32> -> vector<8x256xf32>
    %c144_433 = arith.constant 144 : index
    %c0_434 = arith.constant 0 : index
    %563 = vector.load %arg4[%c144_433, %c0_434] : memref<184x1xf32, #tpu.memory_space<vmem>>, vector<8x1xf32>
    %564 = vector.broadcast %563 : vector<8x1xf32> to vector<8x256xf32>
    %565 = arith.addf %562, %564 : vector<8x256xf32>
    %c17_i32_435 = arith.constant 17 : i32
    %566 = tpu.dynamic_rotate %565 by %c17_i32_435 dim 1 : vector<8x256xf32>, i32 -> vector<8x256xf32>
    %c0_436 = arith.constant 0 : index
    %c0_437 = arith.constant 0 : index
    %567 = vector.load %arg2[%c0_436, %c0_437] : memref<80x256xf32, #tpu.memory_space<vmem>>, vector<8x256xf32>
    %568 = arith.mulf %566, %567 : vector<8x256xf32>
    %c16_i32_438 = arith.constant 16 : i32
    %569 = tpu.dynamic_rotate %565 by %c16_i32_438 dim 1 : vector<8x256xf32>, i32 -> vector<8x256xf32>
    %c8_439 = arith.constant 8 : index
    %c0_440 = arith.constant 0 : index
    %570 = vector.load %arg2[%c8_439, %c0_440] : memref<80x256xf32, #tpu.memory_space<vmem>>, vector<8x256xf32>
    %571 = arith.mulf %569, %570 : vector<8x256xf32>
    %c15_i32_441 = arith.constant 15 : i32
    %572 = tpu.dynamic_rotate %565 by %c15_i32_441 dim 1 : vector<8x256xf32>, i32 -> vector<8x256xf32>
    %c16_442 = arith.constant 16 : index
    %c0_443 = arith.constant 0 : index
    %573 = vector.load %arg2[%c16_442, %c0_443] : memref<80x256xf32, #tpu.memory_space<vmem>>, vector<8x256xf32>
    %574 = arith.mulf %572, %573 : vector<8x256xf32>
    %c1_i32_444 = arith.constant 1 : i32
    %575 = tpu.dynamic_rotate %565 by %c1_i32_444 dim 1 : vector<8x256xf32>, i32 -> vector<8x256xf32>
    %c24_445 = arith.constant 24 : index
    %c0_446 = arith.constant 0 : index
    %576 = vector.load %arg2[%c24_445, %c0_446] : memref<80x256xf32, #tpu.memory_space<vmem>>, vector<8x256xf32>
    %577 = arith.mulf %575, %576 : vector<8x256xf32>
    %c255_i32_447 = arith.constant 255 : i32
    %578 = tpu.dynamic_rotate %565 by %c255_i32_447 dim 1 : vector<8x256xf32>, i32 -> vector<8x256xf32>
    %c40_448 = arith.constant 40 : index
    %c0_449 = arith.constant 0 : index
    %579 = vector.load %arg2[%c40_448, %c0_449] : memref<80x256xf32, #tpu.memory_space<vmem>>, vector<8x256xf32>
    %580 = arith.mulf %578, %579 : vector<8x256xf32>
    %c241_i32_450 = arith.constant 241 : i32
    %581 = tpu.dynamic_rotate %565 by %c241_i32_450 dim 1 : vector<8x256xf32>, i32 -> vector<8x256xf32>
    %c48_451 = arith.constant 48 : index
    %c0_452 = arith.constant 0 : index
    %582 = vector.load %arg2[%c48_451, %c0_452] : memref<80x256xf32, #tpu.memory_space<vmem>>, vector<8x256xf32>
    %583 = arith.mulf %581, %582 : vector<8x256xf32>
    %c240_i32_453 = arith.constant 240 : i32
    %584 = tpu.dynamic_rotate %565 by %c240_i32_453 dim 1 : vector<8x256xf32>, i32 -> vector<8x256xf32>
    %c56_454 = arith.constant 56 : index
    %c0_455 = arith.constant 0 : index
    %585 = vector.load %arg2[%c56_454, %c0_455] : memref<80x256xf32, #tpu.memory_space<vmem>>, vector<8x256xf32>
    %586 = arith.mulf %584, %585 : vector<8x256xf32>
    %c239_i32_456 = arith.constant 239 : i32
    %587 = tpu.dynamic_rotate %565 by %c239_i32_456 dim 1 : vector<8x256xf32>, i32 -> vector<8x256xf32>
    %c64_457 = arith.constant 64 : index
    %c0_458 = arith.constant 0 : index
    %588 = vector.load %arg2[%c64_457, %c0_458] : memref<80x256xf32, #tpu.memory_space<vmem>>, vector<8x256xf32>
    %589 = arith.mulf %587, %588 : vector<8x256xf32>
    %590 = tpu.concatenate %568, %571, %574, %577, %565, %580, %583, %586, %589 in 0 : vector<8x256xf32>, vector<8x256xf32>, vector<8x256xf32>, vector<8x256xf32>, vector<8x256xf32>, vector<8x256xf32>, vector<8x256xf32>, vector<8x256xf32>, vector<8x256xf32> -> vector<72x256xf32>
    %c152 = arith.constant 152 : index
    %c0_459 = arith.constant 0 : index
    %591 = vector.load %arg3[%c152, %c0_459] : memref<168x256xf32, #tpu.memory_space<vmem>>, vector<8x72xf32>
    %592 = arith.truncf %591 : vector<8x72xf32> to vector<8x72xbf16>
    %593 = arith.truncf %590 : vector<72x256xf32> to vector<72x256xbf16>
    %cst_460 = arith.constant dense<0.000000e+00> : vector<8x256xf32>
    %594 = tpu.matmul %592, %593, %cst_460 {dimension_numbers = #tpu.dot_dimension_numbers<[1], [0], [0], [1], [0, 0, 1, 1], [], []>} : vector<8x72xbf16>, vector<72x256xbf16>, vector<8x256xf32> -> vector<8x256xf32>
    %c152_461 = arith.constant 152 : index
    %c0_462 = arith.constant 0 : index
    %595 = vector.load %arg4[%c152_461, %c0_462] : memref<184x1xf32, #tpu.memory_space<vmem>>, vector<8x1xf32>
    %596 = vector.broadcast %595 : vector<8x1xf32> to vector<8x256xf32>
    %597 = arith.addf %594, %596 : vector<8x256xf32>
    %cst_463 = arith.constant 0.000000e+00 : f32
    %598 = vector.broadcast %cst_463 : f32 to vector<8x256xf32>
    %599 = arith.maximumf %597, %598 : vector<8x256xf32>
    %c17_i32_464 = arith.constant 17 : i32
    %600 = tpu.dynamic_rotate %599 by %c17_i32_464 dim 1 : vector<8x256xf32>, i32 -> vector<8x256xf32>
    %c0_465 = arith.constant 0 : index
    %c0_466 = arith.constant 0 : index
    %601 = vector.load %arg2[%c0_465, %c0_466] : memref<80x256xf32, #tpu.memory_space<vmem>>, vector<8x256xf32>
    %602 = arith.mulf %600, %601 : vector<8x256xf32>
    %c16_i32_467 = arith.constant 16 : i32
    %603 = tpu.dynamic_rotate %599 by %c16_i32_467 dim 1 : vector<8x256xf32>, i32 -> vector<8x256xf32>
    %c8_468 = arith.constant 8 : index
    %c0_469 = arith.constant 0 : index
    %604 = vector.load %arg2[%c8_468, %c0_469] : memref<80x256xf32, #tpu.memory_space<vmem>>, vector<8x256xf32>
    %605 = arith.mulf %603, %604 : vector<8x256xf32>
    %c15_i32_470 = arith.constant 15 : i32
    %606 = tpu.dynamic_rotate %599 by %c15_i32_470 dim 1 : vector<8x256xf32>, i32 -> vector<8x256xf32>
    %c16_471 = arith.constant 16 : index
    %c0_472 = arith.constant 0 : index
    %607 = vector.load %arg2[%c16_471, %c0_472] : memref<80x256xf32, #tpu.memory_space<vmem>>, vector<8x256xf32>
    %608 = arith.mulf %606, %607 : vector<8x256xf32>
    %c1_i32_473 = arith.constant 1 : i32
    %609 = tpu.dynamic_rotate %599 by %c1_i32_473 dim 1 : vector<8x256xf32>, i32 -> vector<8x256xf32>
    %c24_474 = arith.constant 24 : index
    %c0_475 = arith.constant 0 : index
    %610 = vector.load %arg2[%c24_474, %c0_475] : memref<80x256xf32, #tpu.memory_space<vmem>>, vector<8x256xf32>
    %611 = arith.mulf %609, %610 : vector<8x256xf32>
    %c255_i32_476 = arith.constant 255 : i32
    %612 = tpu.dynamic_rotate %599 by %c255_i32_476 dim 1 : vector<8x256xf32>, i32 -> vector<8x256xf32>
    %c40_477 = arith.constant 40 : index
    %c0_478 = arith.constant 0 : index
    %613 = vector.load %arg2[%c40_477, %c0_478] : memref<80x256xf32, #tpu.memory_space<vmem>>, vector<8x256xf32>
    %614 = arith.mulf %612, %613 : vector<8x256xf32>
    %c241_i32_479 = arith.constant 241 : i32
    %615 = tpu.dynamic_rotate %599 by %c241_i32_479 dim 1 : vector<8x256xf32>, i32 -> vector<8x256xf32>
    %c48_480 = arith.constant 48 : index
    %c0_481 = arith.constant 0 : index
    %616 = vector.load %arg2[%c48_480, %c0_481] : memref<80x256xf32, #tpu.memory_space<vmem>>, vector<8x256xf32>
    %617 = arith.mulf %615, %616 : vector<8x256xf32>
    %c240_i32_482 = arith.constant 240 : i32
    %618 = tpu.dynamic_rotate %599 by %c240_i32_482 dim 1 : vector<8x256xf32>, i32 -> vector<8x256xf32>
    %c56_483 = arith.constant 56 : index
    %c0_484 = arith.constant 0 : index
    %619 = vector.load %arg2[%c56_483, %c0_484] : memref<80x256xf32, #tpu.memory_space<vmem>>, vector<8x256xf32>
    %620 = arith.mulf %618, %619 : vector<8x256xf32>
    %c239_i32_485 = arith.constant 239 : i32
    %621 = tpu.dynamic_rotate %599 by %c239_i32_485 dim 1 : vector<8x256xf32>, i32 -> vector<8x256xf32>
    %c64_486 = arith.constant 64 : index
    %c0_487 = arith.constant 0 : index
    %622 = vector.load %arg2[%c64_486, %c0_487] : memref<80x256xf32, #tpu.memory_space<vmem>>, vector<8x256xf32>
    %623 = arith.mulf %621, %622 : vector<8x256xf32>
    %624 = tpu.concatenate %602, %605, %608, %611, %599, %614, %617, %620, %623 in 0 : vector<8x256xf32>, vector<8x256xf32>, vector<8x256xf32>, vector<8x256xf32>, vector<8x256xf32>, vector<8x256xf32>, vector<8x256xf32>, vector<8x256xf32>, vector<8x256xf32> -> vector<72x256xf32>
    %c160 = arith.constant 160 : index
    %c0_488 = arith.constant 0 : index
    %625 = vector.load %arg3[%c160, %c0_488] : memref<168x256xf32, #tpu.memory_space<vmem>>, vector<8x72xf32>
    %626 = arith.truncf %625 : vector<8x72xf32> to vector<8x72xbf16>
    %627 = arith.truncf %624 : vector<72x256xf32> to vector<72x256xbf16>
    %cst_489 = arith.constant dense<0.000000e+00> : vector<8x256xf32>
    %628 = tpu.matmul %626, %627, %cst_489 {dimension_numbers = #tpu.dot_dimension_numbers<[1], [0], [0], [1], [0, 0, 1, 1], [], []>} : vector<8x72xbf16>, vector<72x256xbf16>, vector<8x256xf32> -> vector<8x256xf32>
    %c160_490 = arith.constant 160 : index
    %c0_491 = arith.constant 0 : index
    %629 = vector.load %arg4[%c160_490, %c0_491] : memref<184x1xf32, #tpu.memory_space<vmem>>, vector<8x1xf32>
    %630 = vector.broadcast %629 : vector<8x1xf32> to vector<8x256xf32>
    %631 = arith.addf %628, %630 : vector<8x256xf32>
    %632 = vector.extract_strided_slice %631 {offsets = [0, 0], sizes = [1, 256], strides = [1, 1]} : vector<8x256xf32> to vector<1x256xf32>
    %633 = arith.addf %632, %1 : vector<1x256xf32>
    %c0_492 = arith.constant 0 : index
    %c0_493 = arith.constant 0 : index
    %634 = vector.load %arg5[%c0_492, %c0_493] : memref<1x256xf32, #tpu.memory_space<vmem>>, vector<1x256xf32>
    tpu.vector_store %arg5[%c0_492, %c0_493], %633 {strides = array<i32>} : memref<1x256xf32, #tpu.memory_space<vmem>>, vector<1x256xf32>,
    %c0_494 = arith.constant 0 : index
    %c0_495 = arith.constant 0 : index
    %635 = vector.load %arg6[%c0_494, %c0_495] : memref<1x256xf32, #tpu.memory_space<vmem>>, vector<1x256xf32>
    tpu.vector_store %arg6[%c0_494, %c0_495], %380 {strides = array<i32>} : memref<1x256xf32, #tpu.memory_space<vmem>>, vector<1x256xf32>,
    return
  }
  func.func @transform_0(%arg0: i32) -> (i32, i32) {
    %c0_i32 = arith.constant 0 : i32
    %c0_i32_0 = arith.constant 0 : i32
    return %c0_i32, %arg0 : i32, i32
  }
  func.func @transform_1(%arg0: i32) -> (i32, i32) {
    %c0_i32 = arith.constant 0 : i32
    %c0_i32_0 = arith.constant 0 : i32
    %c0_i32_1 = arith.constant 0 : i32
    return %c0_i32, %c0_i32_0 : i32, i32
  }
  func.func @transform_2(%arg0: i32) -> (i32, i32) {
    %c0_i32 = arith.constant 0 : i32
    %c0_i32_0 = arith.constant 0 : i32
    %c0_i32_1 = arith.constant 0 : i32
    return %c0_i32, %c0_i32_0 : i32, i32
  }
  func.func @transform_3(%arg0: i32) -> (i32, i32) {
    %c0_i32 = arith.constant 0 : i32
    %c0_i32_0 = arith.constant 0 : i32
    %c0_i32_1 = arith.constant 0 : i32
    return %c0_i32, %c0_i32_0 : i32, i32
  }
  func.func @transform_4(%arg0: i32) -> (i32, i32) {
    %c0_i32 = arith.constant 0 : i32
    %c0_i32_0 = arith.constant 0 : i32
    return %c0_i32, %arg0 : i32, i32
  }
  func.func @transform_5(%arg0: i32) -> (i32, i32) {
    %c0_i32 = arith.constant 0 : i32
    %c0_i32_0 = arith.constant 0 : i32
    return %c0_i32, %arg0 : i32, i32
  }
}

</mosaic_0001>

<bundles_post_ra>
// kernel: module_2_1_forward.1
= control target key start
LH: loop header
LB: loop body
LE: loop exit
PB: predicated region body
PF: predicated region fallthrough
CT: control target
= control target key end

     0   :  { %s2836_s18 = smov 0   ;;  %s2838_s19 = smov 0   ;;  %s4728_s0 = inlined_call_operand.vmem [shape: f32[16,512], index: 0, kind: input, shape index: {}]   ;;  %s4729_s1 = inlined_call_operand.vmem [shape: f32[80,256], index: 1, kind: input, shape index: {}]   ;;  %s4730_s2 = inlined_call_operand.vmem [shape: f32[168,256], index: 2, kind: input, shape index: {}]   ;;  %s4731_s3 = inlined_call_operand.vmem [shape: f32[184,1], index: 3, kind: input, shape index: {}]   ;;  %s4732_s4 = inlined_call_operand.vmem [shape: f32[1,512], index: 4, kind: output, shape index: {0}]   ;;  %s4733_s5 = inlined_call_operand.vmem [shape: f32[1,512], index: 5, kind: output, shape index: {1}]  }
   0x1   :  { %s2840_s20 = smov 0  }
   0x2 LB: > { %s2629_s21 = sadd.s32 4294967295, %s2795_s20   ;;  %s2853_s22 = sadd.s32 1, %s2795_s20   ;;  %s2795_s20 = sphi %s2840_s20, %s4773_s20   ;;  %s2791_s19 = sphi %s2838_s19, %s4772_s19   ;;  %s2787_s18 = sphi %s2836_s18, %s4771_s18  }
   0x3   : > { %s20_s23 = ssub.s32 %s2795_s20, %s2853_s22  ;;  %s23_s24 = sadd.s32 1, %s2791_s19 }
   0x4   : > { %p21_p0 = scmp.eq.s32.totalorder %s20_s23, 0  ;;  %p30_p1 = scmp.ne.s32.totalorder %s2791_s19, %s2787_s18 }
   0x5   : > { %p31_p2 = scmp.eq.s32.totalorder %s2795_s20, 0  ;;  %p2632_p4 = scmp.ge.s32.totalorder %s2795_s20, 2 }
   0x6   : > { %s2862_s25 = scalar_select %p21_p0, %s2791_s19, %s23_s24  }
   0x7   : > { %p32_p3 = por %p31_p2, %p30_p1  ;;  %180 = sbr.rel (%p2632_p4) target bundleno = 20 (0x14), region = 28 }
   0xc   : > { %183 = sbr.rel (!%p32_p3) target bundleno = 20 (0x14), region = 32  ;;  %s185_s26 = sand.u32 (%p32_p3), 1, %s2791_s19  }
   0xd   : > { %s2688_s27 = sshll.u32 (%p32_p3), %s2795_s20, 4  ;;  %s2633_s28 = sshll.u32 (%p32_p3), %s185_s26, 5 }
   0xe   : > { %s190_s6 = scalar_lea.vmem (%p32_p3), %s4728_s0, %s2688_s27  ;;  %s187_s7 = scalar_lea.vmem (%p32_p3), [#allocation2], %s2633_s28 }
   0xf   : > { %v203_v0 = vld [vmem:[%s190_s6] sm:$0xff] (%p32_p3)  ;;  %v205_v1 = vld [vmem:[%s190_s6 + $0x8] sm:$0xff] (%p32_p3) }
  0x10   : > { %v207_v2 = vld [vmem:[%s190_s6 + $0x20] sm:$0xff] (%p32_p3)  ;;  %204 = vst [vmem:[%s187_s7] sm:$0xff] (%p32_p3), %v203_v0  ;;  %v209_v3 = vld [vmem:[%s190_s6 + $0x28] sm:$0xff] (%p32_p3) }
  0x11   : > { %206 = vst [vmem:[%s187_s7 + $0x8] sm:$0xff] %v205_v1 }
  0x12   : > { %208 = vst [vmem:[%s187_s7 + $0x10] sm:$0xff] %v207_v2 }
  0x13   : > { %210 = vst [vmem:[%s187_s7 + $0x18] sm:$0xff] %v209_v3 }
  0x14 PF: > { %p2636_p5 = scmp.ge.s32.totalorder %s2795_s20, 1  ;;  %p215_p6 = scmp.lt.s32.totalorder %s2795_s20, 3 }
  0x16   : > { %p216_p7 = pnand %p2636_p5, %p215_p6 }
  0x17   : > { %s222_s8 = sand.u32 (!%p216_p7), 1, %s2787_s18   ;;  %s2798_s15 = smov (!%p216_p7), 112  }
  0x18   : > { %219 = sbr.rel (%p216_p7) target bundleno = 4449 (0x1161), region = 55  ;;  %s2637_s11 = sshll.u32 (!%p216_p7), %s222_s8, 5 }
  0x19   : > { %s224_s12 = scalar_lea.vmem (!%p216_p7), [#allocation2], %s2637_s11  ;;  %s2799_s16 = smov (!%p216_p7), 113  }
  0x1a   : > { %s2800_s17 = smov (!%p216_p7), 111   ;;  %s2801_s18 = smov (!%p216_p7), 127  }
  0x1b   : > { %s2802_s23 = smov (!%p216_p7), 15   ;;  %s2803_s24 = smov (!%p216_p7), 1  }
  0x1c   : > { %s2804_s26 = smov (!%p216_p7), 17   ;;  %s2805_s27 = smov (!%p216_p7), 16  }
  0x1d   : > { %v281_v4 = vld [vmem:[%s4731_s3] sm:$0xff]  ;;  %v2797_v5 = vmov 0   ;;  %v2878_v7 = vld [vmem:[%s224_s12 + $0x10] ss:$8 sm:$0x3]  ;;  %v2880_v8 = vld [vmem:[%s224_s12 + $0x8] sm:$0xff]  ;;  %v328_v0 = vlaneseq }
  0x1e   : > { %2722 = vset.pattern.permute.xlu0 %v2797_v5  ;;  %2723 = vset.pattern.permute.xlu2 %v2797_v5  ;;  %v2876_v6 = vld [vmem:[%s224_s12] sm:$0xff]  ;;  %v2641_v9 = vld [vmem:[%s224_s12 + $0x11] ss:$8 sm:$0x3]  ;;  %v271_v10 = vperm.slane %v2878_v7, 0  ;;  %v2025_v11 = vsub.f32 0.0, %v2878_v7 }
  0x1f   : > { %284 = vperm.xlu0 %2722, %v281_v4   ;;  %2724 = vset.pattern.permute.xlu1 %v2797_v5  ;;  %v272_v12 = vperm.slane %v2878_v7, 1  ;;  %v2044_v13 = vsub.f32 0.0, %v2641_v9  ;;  %vm291_vm0 = vcmask 1043456   ;;  %v277_v18 = vld [vmem:[%s4730_s2] sm:$0xff]  ;;  %vm4734_vm1 = vcmask 64512   ;;  %v472_v62 = vld [vmem:[%s4731_s3 + $0x10] sm:$0xff] }
  0x20   : > { %v2888_v14 = vadd.f32 %v271_v10, %v2876_v6  ;;  %v2026_v15 = vmul.f32 1.442695, %v2025_v11  ;;  %v278_v23 = vpack.c.bf16 %v277_v18, %v277_v18  ;;  %v2958_v3 = vand.u32 127, %v328_v0  ;;  %v2964_v5 = vld [vmem:[%s4729_s1 + $0x80] sm:$0xff] }
  0x21   : > { %v2893_v16 = vadd.f32 %v272_v12, %v2880_v8  ;;  %v2045_v17 = vmul.f32 1.442695, %v2044_v13  ;;  %v2673_v7 = vld [vmem:[%s4729_s1 + $0x91] ss:$8 sm:$0x3] }
  0x22   : > { %v279_v19 = vpack.c.bf16 %v2888_v14, %v2888_v14  ;;  %2725 = vpow2.f32 %v2026_v15  ;;  %vm407_vm10 = vcmp.lt.s32.totalorder %v2958_v3, 111  ;;  %vm396_vm11 = vcmp.lt.s32.totalorder %v2958_v3, 112 }
  0x23   : > { %v280_v20 = vpack.c.bf16 %v2893_v16, %v2893_v16  ;;  %2727 = vpow2.f32 %v2045_v17  ;;  %vm385_vm12 = vcmp.lt.s32.totalorder %v2958_v3, 113  ;;  %vm374_vm13 = vcmp.lt.s32.totalorder %v2958_v3, 127 }
  0x24   : > { %v2903_v21 = vsel %vm291_vm0, %v279_v19, 0  ;;  %vm352_vm14 = vcmp.lt.s32.totalorder %v2958_v3, 15  ;;  %vm363_vm15 = vcmp.lt.s32.totalorder %v2958_v3, 1 }
  0x25   : > { %v2906_v22 = vsel %vm291_vm0, %v280_v20, 0  ;;  %305 = vmatpush.bf16.msra.mxu3 %v2903_v21 }
  0x26   : > { %318 = vmatpush.bf16.msra.mxu1 %v2906_v22 }
  0x28   : > { %v2726_v24 = vpop.eup %2725  ;;  %2642 = vmatmul.msk.bf16.vlgmr.msra.gmra.mxu3 %vm4734_vm1, %v278_v23 }
  0x29   : > { %2643 = vmatmul.msk.bf16.vlgmr.msra.gmra.mxu1 %vm4734_vm1, %v278_v23  ;;  %v2728_v25 = vpop.eup %2727  ;;  %v2028_v26 = vadd.f32 1.0, %v2726_v24 }
  0x2a   : > { %v2047_v27 = vadd.f32 1.0, %v2728_v25  ;;  %v2984_v25 = vld [vmem:[%s4729_s1 + $0x70] sm:$0xff] }
  0x2b   : > { %2729 = vrcp.f32 %v2028_v26  ;;  %vm2034_vm2 = vweird.f32 %v2028_v26  ;;  %v2040_v31 = vand.u32 2147483648, %v2028_v26  ;;  %v2038_v34 = vand.u32 2147483647, %v2028_v26 }
  0x2c   : > { %2731 = vrcp.f32 %v2047_v27  ;;  %v2059_v35 = vand.u32 2147483648, %v2047_v27  ;;  %vm2053_vm4 = vweird.f32 %v2047_v27  ;;  %v2057_v37 = vand.u32 2147483647, %v2047_v27 }
  0x2d   : > { %v2041_v39 = vor.u32 1.1754944e-38, %v2040_v31  ;;  %vm2039_vm7 = vcmp.eq.f32.partialorder %v2038_v34, 8.507059e+37  ;;  %v3003_v31 = vld [vmem:[%s4729_s1 + $0x78] sm:$0xff] }
  0x2e   : > { %v2060_v42 = vor.u32 1.1754944e-38, %v2059_v35  ;;  %vm2058_vm9 = vcmp.eq.f32.partialorder %v2057_v37, 8.507059e+37  ;;  %v426_v35 = vld [vmem:[%s4731_s3 + $0x8] sm:$0xff] }
  0x31   : > { %v2730_v28 = vpop.eup %2729 }
  0x32   : > { %v2732_v29 = vpop.eup %2731  ;;  %v2030_v30 = vmul.f32 %v2730_v28, %v2028_v26  ;;  %vm2035_vm3 = vweird.f32 %v2730_v28 }
  0x33   : > { %v2049_v32 = vmul.f32 %v2732_v29, %v2047_v27  ;;  %vm2054_vm5 = vweird.f32 %v2732_v29  ;;  %vm2036_vm6 = vmor %vm2034_vm2, %vm2035_vm3  ;;  %vm330_vm2 = vcmp.lt.s32.totalorder %v2958_v3, 17  ;;  %vm4736_vm3 = vcmp.lt.s32.totalorder %v2958_v3, 16 }
  0x34   : > { %v2031_v33 = vsub.f32 1.0, %v2030_v30  ;;  %vm2055_vm8 = vmor %vm2053_vm4, %vm2054_vm5  ;;  %v2998_v30 = vld [vmem:[%s4729_s1 + $0x68] sm:$0xff]  ;;  %vm4735_vm4 = vcmask 588800  }
  0x35   : > { %v2050_v36 = vsub.f32 1.0, %v2049_v32 }
  0x36   : > { %v2032_v38 = vmul.f32 %v2730_v28, %v2031_v33 }
  0x37   : > { %v2051_v40 = vmul.f32 %v2732_v29, %v2050_v36 }
  0x38   : > { %v2033_v41 = vadd.f32 %v2730_v28, %v2032_v38 }
  0x39   : > { %v2052_v43 = vadd.f32 %v2732_v29, %v2051_v40 }
  0x3a   : > { %v2037_v44 = vsel %vm2036_vm6, %v2730_v28, %v2033_v41 }
  0x3b   : > { %v2042_v45 = vsel %vm2039_vm7, %v2041_v39, %v2037_v44  ;;  %v2056_v46 = vsel %vm2055_vm8, %v2732_v29, %v2052_v43  ;;  %v2993_v29 = vld [vmem:[%s4729_s1 + $0x60] sm:$0xff]  ;;  %v3021_v43 = vld [vmem:[%s4729_s1 + $0x50] sm:$0xff]  ;;  %v3026_v44 = vld [vmem:[%s4729_s1 + $0x58] sm:$0xff] }
  0x3c   : > { %v2043_v47 = vsub.f32 1.0, %v2042_v45  ;;  %v2061_v48 = vsel %vm2058_vm9, %v2060_v42, %v2056_v46 }
  0x3d   : > { %v2062_v49 = vsub.f32 1.0, %v2061_v48 }
  0x3f   : > { %v2063_v50 = vadd.f32 %v2062_v49, %v2043_v47 }
  0x41   : > { %v2065_v51 = vperm.slane %v2063_v50, 0  ;;  %v2066_v52 = vperm.slane %v2063_v50, 1  ;;  %v3040_v50 = vld [vmem:[%s4729_s1 + $0x20] sm:$0xff] }
  0x43   : > { %v2913_v53 = vmul.f32 %v2065_v51, %v2876_v6  ;;  %v2916_v54 = vmul.f32 %v2066_v52, %v2880_v8  ;;  %v2969_v6 = vld [vmem:[%s4729_s1 + $0x88] sm:$0xff] }
  0x44   : > { %v3045_v51 = vld [vmem:[%s4729_s1 + $0x28] sm:$0xff] }
  0x91   : > { %v285_v55 = vpop.permute.xlu0 %284 }
  0xa6   : > { %v320_v56 = vpop.f32.mrf.mxu1 }
  0xa7   : > { %v2918_v57 = vadd.f32 %v320_v56, %v285_v55 }
  0xa9   : > { %394 = vrot.lane.b32.xlu0 %v2918_v57, %s2798_s15  ;;  %383 = vrot.lane.b32.xlu2 %v2918_v57, %s2799_s16 }
  0xaa   : > { %405 = vrot.lane.b32.xlu1 %v2918_v57, %s2800_s17 }
  0xab   : > { %v307_v58 = vpop.f32.mrf.mxu3 }
  0xac   : > { %v2926_v60 = vadd.f32 %v307_v58, %v285_v55 }
  0xae   : > { %v322_v59 = vpop.f32.mrf.mxu1 }
  0xb1   : > { %372 = vrot.lane.b32.xlu2 %v2918_v57, %s2801_s18  ;;  %403 = vrot.lane.b32.xlu0 %v2926_v60, %s2800_s17 }
  0xb2   : > { %350 = vrot.lane.b32.xlu1 %v2918_v57, %s2802_s23 }
  0xb3   : > { %v309_v61 = vpop.f32.mrf.mxu3 }
  0xb4   : > { %v3056_v61 = vld [vmem:[%s4729_s1 + $0x30] sm:$0xff] }
  0xb9   : > { %392 = vrot.lane.b32.xlu2 %v2926_v60, %s2798_s15  ;;  %361 = vrot.lane.b32.xlu0 %v2918_v57, %s2803_s24 }
  0xba   : > { %381 = vrot.lane.b32.xlu1 %v2926_v60, %s2799_s16 }
  0xc1   : > { %359 = vrot.lane.b32.xlu2 %v2926_v60, %s2803_s24  ;;  %348 = vrot.lane.b32.xlu0 %v2926_v60, %s2802_s23 }
  0xc2   : > { %370 = vrot.lane.b32.xlu1 %v2926_v60, %s2801_s18 }
  0xc9   : > { %326 = vrot.lane.b32.xlu2 %v2918_v57, %s2804_s26  ;;  %337 = vrot.lane.b32.xlu0 %v2926_v60, %s2805_s27 }
  0xca   : > { %324 = vrot.lane.b32.xlu1 %v2926_v60, %s2804_s26 }
  0xd1   : > { %475 = vperm.xlu0 %2722, %v472_v62   ;;  %429 = vperm.xlu2 %2723, %v426_v35   ;;  %v3061_v62 = vld [vmem:[%s4729_s1 + $0x38] sm:$0xff] }
  0xd2   : > { %339 = vrot.lane.b32.xlu1 %v2918_v57, %s2805_s27 }
 0x103   : > { %v384_v63 = vpop.permute.xlu2 %383 }
 0x10b   : > { %v373_v4 = vpop.permute.xlu2 %372 }
 0x113   : > { %v393_v24 = vpop.permute.xlu2 %392 }
 0x11b   : > { %v395_v1 = vpop.permute.xlu0 %394  ;;  %v360_v52 = vpop.permute.xlu2 %359 }
 0x11c   : > { %v406_v2 = vpop.permute.xlu1 %405  ;;  %v397_v26 = vsel %vm396_vm11, %v393_v24, %v395_v1  ;;  %v398_v27 = vsel %vm396_vm11, %v395_v1, %v393_v24 }
 0x11d   : > { %v401_v37 = vmul.f32 %v2984_v25, %v397_v26  ;;  %v402_v39 = vmul.f32 %v3003_v31, %v398_v27 }
 0x123   : > { %v404_v8 = vpop.permute.xlu0 %403 }
 0x124   : > { %v351_v9 = vpop.permute.xlu1 %350  ;;  %v409_v11 = vsel %vm407_vm10, %v406_v2, %v404_v8  ;;  %v408_v13 = vsel %vm407_vm10, %v404_v8, %v406_v2 }
 0x125   : > { %v412_v15 = vmul.f32 %v2964_v5, %v408_v13  ;;  %v413_v17 = vmul.f32 %v2969_v6, %v409_v11 }
 0x127   : > { %v424_v18 = vpack.c.bf16 %v412_v15, %v412_v15  ;;  %v425_v19 = vpack.c.bf16 %v413_v17, %v413_v17 }
 0x129   : > { %v437_v20 = vsel %vm291_vm0, %v424_v18, 0  ;;  %v440_v23 = vsel %vm291_vm0, %v425_v19, 0  ;;  %v3083_v19 = vld [vmem:[%s4729_s1 + $0x10] sm:$0xff] }
 0x12a   : > { %445 = vmatpush.bf16.msra.mxu2 %v437_v20  ;;  %458 = vmatpush.bf16.msrb.mxu3 %v440_v23  ;;  %v3088_v20 = vld [vmem:[%s4729_s1 + $0x8] sm:$0xff]  ;;  %v3093_v23 = vld [vmem:[%s4729_s1 + $0x18] sm:$0xff] }
 0x12b   : > { %v362_v28 = vpop.permute.xlu0 %361 }
 0x12c   : > { %v382_v32 = vpop.permute.xlu1 %381  ;;  %v364_v58 = vsel %vm363_vm15, %v360_v52, %v362_v28  ;;  %v365_v59 = vsel %vm363_vm15, %v362_v28, %v360_v52 }
 0x12d   : > { %v386_v33 = vsel %vm385_vm12, %v382_v32, %v384_v63  ;;  %v387_v34 = vsel %vm385_vm12, %v384_v63, %v382_v32  ;;  %v368_v8 = vmul.f32 %v3056_v61, %v365_v59 }
 0x12e   : > { %v390_v36 = vmul.f32 %v2993_v29, %v386_v33  ;;  %v391_v38 = vmul.f32 %v2998_v30, %v387_v34 }
 0x130   : > { %v422_v40 = vpack.c.bf16 %v401_v37, %v390_v36  ;;  %v423_v41 = vpack.c.bf16 %v402_v39, %v391_v38  ;;  %v414_v36 = vld [vmem:[%s4730_s2 + $0x10] sm:$0xff] }
 0x131   : > { %v415_v39 = vpack.c.bf16 %v414_v36, %v414_v36 }
 0x132   : > { %446 = vmatpush.bf16.msra.mxu2 %v422_v40  ;;  %459 = vmatpush.bf16.msrb.mxu3 %v423_v41 }
 0x133   : > { %v349_v42 = vpop.permute.xlu0 %348 }
 0x134   : > { %v371_v45 = vpop.permute.xlu1 %370  ;;  %v353_v48 = vsel %vm352_vm14, %v349_v42, %v351_v9  ;;  %v354_v49 = vsel %vm352_vm14, %v351_v9, %v349_v42  ;;  %v369_v9 = vmul.f32 %v3061_v62, %v364_v58 }
 0x135   : > { %v375_v46 = vsel %vm374_vm13, %v371_v45, %v373_v4  ;;  %v376_v47 = vsel %vm374_vm13, %v373_v4, %v371_v45  ;;  %v357_v2 = vmul.f32 %v3040_v50, %v354_v49  ;;  %v358_v4 = vmul.f32 %v3045_v51, %v353_v48 }
 0x136   : > { %v379_v55 = vmul.f32 %v3021_v43, %v375_v46  ;;  %v380_v56 = vmul.f32 %v3026_v44, %v376_v47  ;;  %v468_v47 = vld [vmem:[%s4730_s2 + $0x20] sm:$0xff] }
 0x137   : > { %v418_v13 = vpack.c.bf16 %v368_v8, %v357_v2  ;;  %v419_v15 = vpack.c.bf16 %v369_v9, %v358_v4 }
 0x138   : > { %v420_v63 = vpack.c.bf16 %v379_v55, %v2926_v60  ;;  %v421_v1 = vpack.c.bf16 %v380_v56, %v2918_v57  ;;  %v327_v60 = vpop.permute.xlu2 %326  ;;  %v3074_v57 = vld [vmem:[%s4729_s1] sm:$0xff]  ;;  %v469_v56 = vpack.c.bf16 %v468_v47, %v468_v47 }
 0x13a   : > { %447 = vmatpush.bf16.msra.mxu2 %v420_v63  ;;  %460 = vmatpush.bf16.msrb.mxu3 %v421_v1 }
 0x13b   : > { %v338_v24 = vpop.permute.xlu0 %337 }
 0x13c   : > { %v325_v11 = vpop.permute.xlu1 %324 }
 0x13d   : > { %v331_v17 = vsel %vm330_vm2, %v325_v11, %v327_v60  ;;  %v332_v18 = vsel %vm330_vm2, %v327_v60, %v325_v11  ;;  %v591_v60 = vld [vmem:[%s4731_s3 + $0x48] sm:$0xff] }
 0x13e   : > { %448 = vmatpush.bf16.msra.mxu2 %v418_v13  ;;  %461 = vmatpush.bf16.msrb.mxu3 %v419_v15  ;;  %v335_v32 = vmul.f32 %v3074_v57, %v332_v18  ;;  %v336_v34 = vmul.f32 %v3088_v20, %v331_v17  ;;  %v793_v17 = vld [vmem:[%s4731_s3 + $0x18] sm:$0xff] }
 0x140   : > { %v430_v40 = vpop.permute.xlu2 %429 }
 0x143   : > { %v476_v63 = vpop.permute.xlu0 %475 }
 0x144   : > { %v340_v26 = vpop.permute.xlu1 %339 }
 0x145   : > { %v342_v27 = vsel %vm4736_vm3, %v338_v24, %v340_v26  ;;  %v343_v28 = vsel %vm4736_vm3, %v340_v26, %v338_v24 }
 0x146   : > { %v346_v33 = vmul.f32 %v3083_v19, %v343_v28  ;;  %v347_v35 = vmul.f32 %v3093_v23, %v342_v27 }
 0x148   : > { %v416_v37 = vpack.c.bf16 %v346_v33, %v335_v32  ;;  %v417_v38 = vpack.c.bf16 %v347_v35, %v336_v34 }
 0x14a   : > { %449 = vmatpush.bf16.msra.mxu2 %v416_v37  ;;  %462 = vmatpush.bf16.msrb.mxu3 %v417_v38 }
 0x14d   : > { %2644 = vmatmul.msk.bf16.vlgmr.msra.gmra.mxu2 %vm4735_vm4, %v415_v39  ;;  %2645 = vmatmul.msk.bf16.vlgmr.msrb.gmra.mxu3 %vm4735_vm4, %v415_v39 }
 0x1d0   : > { %v451_v41 = vpop.f32.mrf.mxu2  ;;  %v464_v42 = vpop.f32.mrf.mxu3 }
 0x1d1   : > { %v452_v45 = vadd.f32 %v451_v41, %v430_v40  ;;  %v465_v46 = vadd.f32 %v464_v42, %v430_v40 }
 0x1d3   : > { %v470_v48 = vpack.c.bf16 %v452_v45, %v452_v45  ;;  %v471_v49 = vpack.c.bf16 %v465_v46, %v465_v46 }
 0x1d5   : > { %v482_v52 = vsel %vm291_vm0, %v470_v48, 0  ;;  %v485_v55 = vsel %vm291_vm0, %v471_v49, 0 }
 0x1d6   : > { %494 = vmatpush.bf16.msra.mxu0 %v482_v52  ;;  %507 = vmatpush.bf16.msrb.mxu1 %v485_v55 }
 0x1d8   : > { %v453_v58 = vpop.f32.mrf.mxu2  ;;  %v466_v59 = vpop.f32.mrf.mxu3 }
 0x1d9   : > { %2646 = vmatmul.msk.bf16.vlgmr.msra.gmra.mxu0 %vm4734_vm1, %v469_v56  ;;  %2647 = vmatmul.msk.bf16.vlgmr.msrb.gmra.mxu1 %vm4734_vm1, %v469_v56 }
 0x256   : > { %v496_v1 = vpop.f32.mrf.mxu0  ;;  %v509_v2 = vpop.f32.mrf.mxu1 }
 0x257   : > { %v497_v4 = vadd.f32 %v496_v1, %v476_v63  ;;  %v510_v8 = vadd.f32 %v509_v2, %v476_v63 }
 0x259   : > { %v3115_v9 = vmax.f32 %v497_v4, 0.0  ;;  %v3117_v11 = vmax.f32 %v510_v8, 0.0 }
 0x25b   : > { %573 = vrot.lane.b32.xlu2 %v3117_v11, %s2800_s17  ;;  %555 = vrot.lane.b32.xlu0 %v3115_v9, %s2799_s16 }
 0x25c   : > { %571 = vrot.lane.b32.xlu1 %v3115_v9, %s2800_s17 }
 0x25e   : > { %v498_v13 = vpop.f32.mrf.mxu0  ;;  %v511_v15 = vpop.f32.mrf.mxu1 }
 0x263   : > { %563 = vrot.lane.b32.xlu2 %v3115_v9, %s2798_s15  ;;  %565 = vrot.lane.b32.xlu0 %v3117_v11, %s2798_s15 }
 0x264   : > { %557 = vrot.lane.b32.xlu1 %v3117_v11, %s2799_s16 }
 0x26b   : > { %549 = vrot.lane.b32.xlu2 %v3117_v11, %s2801_s18  ;;  %531 = vrot.lane.b32.xlu0 %v3115_v9, %s2802_s23 }
 0x26c   : > { %547 = vrot.lane.b32.xlu1 %v3115_v9, %s2801_s18 }
 0x273   : > { %539 = vrot.lane.b32.xlu2 %v3115_v9, %s2803_s24  ;;  %541 = vrot.lane.b32.xlu0 %v3117_v11, %s2803_s24 }
 0x274   : > { %533 = vrot.lane.b32.xlu1 %v3117_v11, %s2802_s23 }
 0x27b   : > { %517 = vrot.lane.b32.xlu2 %v3117_v11, %s2804_s26  ;;  %523 = vrot.lane.b32.xlu0 %v3115_v9, %s2805_s27 }
 0x27c   : > { %515 = vrot.lane.b32.xlu1 %v3115_v9, %s2804_s26 }
 0x283   : > { %594 = vperm.xlu2 %2723, %v591_v60   ;;  %796 = vperm.xlu0 %2722, %v793_v17  }
 0x284   : > { %525 = vrot.lane.b32.xlu1 %v3117_v11, %s2805_s27 }
 0x2b5   : > { %v574_v18 = vpop.permute.xlu2 %573 }
 0x2bd   : > { %v564_v34 = vpop.permute.xlu2 %563 }
 0x2c5   : > { %v550_v58 = vpop.permute.xlu2 %549 }
 0x2cd   : > { %v556_v24 = vpop.permute.xlu0 %555  ;;  %v540_v60 = vpop.permute.xlu2 %539 }
 0x2ce   : > { %v572_v26 = vpop.permute.xlu1 %571 }
 0x2cf   : > { %v575_v27 = vsel %vm407_vm10, %v572_v26, %v574_v18  ;;  %v576_v28 = vsel %vm407_vm10, %v574_v18, %v572_v26 }
 0x2d0   : > { %v578_v32 = vmul.f32 %v576_v28, %v2969_v6  ;;  %v577_v33 = vmul.f32 %v575_v27, %v2964_v5 }
 0x2d2   : > { %v590_v35 = vpack.c.bf16 %v578_v32, %v578_v32  ;;  %v589_v36 = vpack.c.bf16 %v577_v33, %v577_v33 }
 0x2d4   : > { %v601_v37 = vsel %vm291_vm0, %v589_v36, 0  ;;  %v604_v38 = vsel %vm291_vm0, %v590_v35, 0 }
 0x2d5   : > { %609 = vmatpush.bf16.msrb.mxu0 %v601_v37  ;;  %622 = vmatpush.bf16.msra.mxu1 %v604_v38  ;;  %v566_v39 = vpop.permute.xlu0 %565 }
 0x2d6   : > { %v567_v40 = vsel %vm396_vm11, %v564_v34, %v566_v39  ;;  %v568_v41 = vsel %vm396_vm11, %v566_v39, %v564_v34  ;;  %v558_v42 = vpop.permute.xlu1 %557  ;;  %v518_v39 = vpop.permute.xlu2 %517 }
 0x2d7   : > { %v570_v45 = vmul.f32 %v568_v41, %v3003_v31  ;;  %v559_v46 = vsel %vm385_vm12, %v556_v24, %v558_v42  ;;  %v560_v47 = vsel %vm385_vm12, %v558_v42, %v556_v24  ;;  %v569_v48 = vmul.f32 %v567_v40, %v2984_v25 }
 0x2d8   : > { %v562_v49 = vmul.f32 %v560_v47, %v2998_v30  ;;  %v561_v52 = vmul.f32 %v559_v46, %v2993_v29 }
 0x2da   : > { %v587_v55 = vpack.c.bf16 %v569_v48, %v561_v52  ;;  %v588_v56 = vpack.c.bf16 %v570_v45, %v562_v49 }
 0x2dc   : > { %610 = vmatpush.bf16.msrb.mxu0 %v587_v55  ;;  %623 = vmatpush.bf16.msra.mxu1 %v588_v56  ;;  %v579_v56 = vld [vmem:[%s4730_s2 + $0x90] sm:$0xff] }
 0x2dd   : > { %v532_v59 = vpop.permute.xlu0 %531 }
 0x2de   : > { %v548_v63 = vpop.permute.xlu1 %547 }
 0x2df   : > { %v551_v1 = vsel %vm374_vm13, %v548_v63, %v550_v58  ;;  %v552_v2 = vsel %vm374_vm13, %v550_v58, %v548_v63  ;;  %v580_v63 = vpack.c.bf16 %v579_v56, %v579_v56 }
 0x2e0   : > { %v554_v4 = vmul.f32 %v552_v2, %v3026_v44  ;;  %v553_v8 = vmul.f32 %v551_v1, %v3021_v43  ;;  %v791_v1 = vld [vmem:[%s4730_s2 + $0x30] sm:$0xff] }
 0x2e1   : > { %v792_v2 = vpack.c.bf16 %v791_v1, %v791_v1 }
 0x2e2   : > { %v585_v13 = vpack.c.bf16 %v553_v8, %v3115_v9  ;;  %v586_v15 = vpack.c.bf16 %v554_v4, %v3117_v11  ;;  %v595_v4 = vpop.permute.xlu2 %594 }
 0x2e4   : > { %611 = vmatpush.bf16.msrb.mxu0 %v585_v13  ;;  %624 = vmatpush.bf16.msra.mxu1 %v586_v15 }
 0x2e5   : > { %v542_v17 = vpop.permute.xlu0 %541 }
 0x2e6   : > { %v543_v18 = vsel %vm363_vm15, %v540_v60, %v542_v17  ;;  %v544_v24 = vsel %vm363_vm15, %v542_v17, %v540_v60  ;;  %v534_v26 = vpop.permute.xlu1 %533 }
 0x2e7   : > { %v546_v27 = vmul.f32 %v543_v18, %v3061_v62  ;;  %v535_v28 = vsel %vm352_vm14, %v532_v59, %v534_v26  ;;  %v536_v32 = vsel %vm352_vm14, %v534_v26, %v532_v59  ;;  %v545_v33 = vmul.f32 %v544_v24, %v3056_v61 }
 0x2e8   : > { %v538_v34 = vmul.f32 %v535_v28, %v3045_v51  ;;  %v537_v35 = vmul.f32 %v536_v32, %v3040_v50 }
 0x2ea   : > { %v583_v36 = vpack.c.bf16 %v545_v33, %v537_v35  ;;  %v584_v37 = vpack.c.bf16 %v546_v27, %v538_v34 }
 0x2ec   : > { %612 = vmatpush.bf16.msrb.mxu0 %v583_v36  ;;  %625 = vmatpush.bf16.msra.mxu1 %v584_v37  ;;  %v904_v37 = vld [vmem:[%s4731_s3 + $0x20] sm:$0xff] }
 0x2ed   : > { %v524_v42 = vpop.permute.xlu0 %523 }
 0x2ee   : > { %v516_v38 = vpop.permute.xlu1 %515 }
 0x2ef   : > { %v519_v40 = vsel %vm330_vm2, %v516_v38, %v518_v39  ;;  %v520_v41 = vsel %vm330_vm2, %v518_v39, %v516_v38  ;;  %v996_v38 = vld [vmem:[%s4731_s3 + $0x30] sm:$0xff] }
 0x2f0   : > { %v522_v48 = vmul.f32 %v519_v40, %v3088_v20  ;;  %v521_v52 = vmul.f32 %v520_v41, %v3074_v57 }
 0x2f5   : > { %v797_v34 = vpop.permute.xlu0 %796 }
 0x2f6   : > { %v526_v45 = vpop.permute.xlu1 %525 }
 0x2f7   : > { %v527_v46 = vsel %vm4736_vm3, %v524_v42, %v526_v45  ;;  %v528_v47 = vsel %vm4736_vm3, %v526_v45, %v524_v42 }
 0x2f8   : > { %v530_v49 = vmul.f32 %v527_v46, %v3093_v23  ;;  %v529_v55 = vmul.f32 %v528_v47, %v3083_v19 }
 0x2fa   : > { %v581_v58 = vpack.c.bf16 %v529_v55, %v521_v52  ;;  %v582_v59 = vpack.c.bf16 %v530_v49, %v522_v48 }
 0x2fc   : > { %613 = vmatpush.bf16.msrb.mxu0 %v581_v58  ;;  %626 = vmatpush.bf16.msra.mxu1 %v582_v59 }
 0x2ff   : > { %2648 = vmatmul.msk.bf16.vlgmr.msrb.gmra.mxu0 %vm4735_vm4, %v580_v63  ;;  %2649 = vmatmul.msk.bf16.vlgmr.msra.gmra.mxu1 %vm4735_vm4, %v580_v63 }
 0x300   : > { %809 = vmatpush.bf16.msra.mxu0 %v2903_v21  ;;  %822 = vmatpush.bf16.msrb.mxu1 %v2906_v22 }
 0x30f   : > { %2652 = vmatmul.msk.bf16.vlgmr.msra.gmra.mxu0 %vm4734_vm1, %v792_v2  ;;  %2653 = vmatmul.msk.bf16.vlgmr.msrb.gmra.mxu1 %vm4734_vm1, %v792_v2 }
 0x37c   : > { %v615_v8 = vpop.f32.mrf.mxu0  ;;  %v628_v13 = vpop.f32.mrf.mxu1 }
 0x37d   : > { %v616_v15 = vadd.f32 %v615_v8, %v595_v4  ;;  %v629_v60 = vadd.f32 %v628_v13, %v595_v4 }
 0x37f   : > { %v3221_v17 = vmax.f32 %v616_v15, 0.0  ;;  %v3223_v18 = vmax.f32 %v629_v60, 0.0 }
 0x381   : > { %674 = vrot.lane.b32.xlu0 %v3221_v17, %s2799_s16  ;;  %690 = vrot.lane.b32.xlu1 %v3221_v17, %s2800_s17 }
 0x382   : > { %692 = vrot.lane.b32.xlu2 %v3223_v18, %s2800_s17 }
 0x384   : > { %v617_v24 = vpop.f32.mrf.mxu0  ;;  %v630_v26 = vpop.f32.mrf.mxu1 }
 0x389   : > { %684 = vrot.lane.b32.xlu0 %v3223_v18, %s2798_s15  ;;  %676 = vrot.lane.b32.xlu1 %v3223_v18, %s2799_s16 }
 0x38a   : > { %682 = vrot.lane.b32.xlu2 %v3221_v17, %s2798_s15 }
 0x38c   : > { %v811_v27 = vpop.f32.mrf.mxu0  ;;  %v824_v28 = vpop.f32.mrf.mxu1 }
 0x38d   : > { %v3255_v35 = vadd.f32 %v811_v27, %v797_v34  ;;  %v3257_v36 = vadd.f32 %v824_v28, %v797_v34 }
 0x391   : > { %650 = vrot.lane.b32.xlu0 %v3221_v17, %s2802_s23  ;;  %666 = vrot.lane.b32.xlu1 %v3221_v17, %s2801_s18 }
 0x392   : > { %668 = vrot.lane.b32.xlu2 %v3223_v18, %s2801_s18 }
 0x394   : > { %v813_v32 = vpop.f32.mrf.mxu0  ;;  %v826_v33 = vpop.f32.mrf.mxu1 }
 0x399   : > { %660 = vrot.lane.b32.xlu0 %v3223_v18, %s2803_s24  ;;  %652 = vrot.lane.b32.xlu1 %v3223_v18, %s2802_s23 }
 0x39a   : > { %658 = vrot.lane.b32.xlu2 %v3221_v17, %s2803_s24 }
 0x3a1   : > { %634 = vrot.lane.b32.xlu0 %v3221_v17, %s2804_s26  ;;  %636 = vrot.lane.b32.xlu1 %v3223_v18, %s2804_s26 }
 0x3a2   : > { %642 = vrot.lane.b32.xlu2 %v3221_v17, %s2805_s27 }
 0x3a9   : > { %644 = vrot.lane.b32.xlu0 %v3223_v18, %s2805_s27  ;;  %884 = vrot.lane.b32.xlu1 %v3255_v35, %s2800_s17 }
 0x3aa   : > { %886 = vrot.lane.b32.xlu2 %v3257_v36, %s2800_s17 }
 0x3b1   : > { %876 = vrot.lane.b32.xlu0 %v3255_v35, %s2798_s15  ;;  %868 = vrot.lane.b32.xlu1 %v3255_v35, %s2799_s16 }
 0x3b2   : > { %870 = vrot.lane.b32.xlu2 %v3257_v36, %s2799_s16 }
 0x3b9   : > { %862 = vrot.lane.b32.xlu0 %v3257_v36, %s2801_s18  ;;  %878 = vrot.lane.b32.xlu1 %v3257_v36, %s2798_s15 }
 0x3ba   : > { %860 = vrot.lane.b32.xlu2 %v3255_v35, %s2801_s18 }
 0x3c1   : > { %852 = vrot.lane.b32.xlu0 %v3255_v35, %s2803_s24  ;;  %844 = vrot.lane.b32.xlu1 %v3255_v35, %s2802_s23 }
 0x3c2   : > { %846 = vrot.lane.b32.xlu2 %v3257_v36, %s2802_s23 }
 0x3c9   : > { %830 = vrot.lane.b32.xlu0 %v3257_v36, %s2804_s26  ;;  %854 = vrot.lane.b32.xlu1 %v3257_v36, %s2803_s24 }
 0x3ca   : > { %828 = vrot.lane.b32.xlu2 %v3255_v35, %s2804_s26 }
 0x3d1   : > { %907 = vperm.xlu0 %2722, %v904_v37   ;;  %836 = vrot.lane.b32.xlu1 %v3255_v35, %s2805_s27 }
 0x3d2   : > { %838 = vrot.lane.b32.xlu2 %v3257_v36, %s2805_s27 }
 0x3da   : > { %999 = vperm.xlu2 %2723, %v996_v38  }
 0x3dc   : > { %v693_v39 = vpop.permute.xlu2 %692 }
 0x3e4   : > { %v683_v40 = vpop.permute.xlu2 %682 }
 0x3ec   : > { %v669_v41 = vpop.permute.xlu2 %668 }
 0x3f3   : > { %v675_v42 = vpop.permute.xlu0 %674  ;;  %v691_v45 = vpop.permute.xlu1 %690 }
 0x3f4   : > { %v694_v46 = vsel %vm407_vm10, %v691_v45, %v693_v39  ;;  %v695_v47 = vsel %vm407_vm10, %v693_v39, %v691_v45  ;;  %v659_v1 = vpop.permute.xlu2 %658 }
 0x3f5   : > { %v697_v48 = vmul.f32 %v695_v47, %v2969_v6  ;;  %v696_v49 = vmul.f32 %v694_v46, %v2964_v5 }
 0x3f7   : > { %v709_v52 = vpack.c.bf16 %v697_v48, %v697_v48  ;;  %v708_v55 = vpack.c.bf16 %v696_v49, %v696_v49 }
 0x3f9   : > { %v720_v56 = vsel %vm291_vm0, %v708_v55, 0  ;;  %v723_v58 = vsel %vm291_vm0, %v709_v52, 0 }
 0x3fa   : > { %728 = vmatpush.bf16.msrb.mxu2 %v720_v56  ;;  %741 = vmatpush.bf16.msra.mxu3 %v723_v58 }
 0x3fb   : > { %v685_v59 = vpop.permute.xlu0 %684  ;;  %v677_v63 = vpop.permute.xlu1 %676 }
 0x3fc   : > { %v686_v2 = vsel %vm396_vm11, %v683_v40, %v685_v59  ;;  %v687_v4 = vsel %vm396_vm11, %v685_v59, %v683_v40  ;;  %v678_v8 = vsel %vm385_vm12, %v675_v42, %v677_v63  ;;  %v679_v13 = vsel %vm385_vm12, %v677_v63, %v675_v42  ;;  %v643_v40 = vpop.permute.xlu2 %642 }
 0x3fd   : > { %v689_v15 = vmul.f32 %v687_v4, %v3003_v31  ;;  %v681_v60 = vmul.f32 %v679_v13, %v2998_v30  ;;  %v680_v24 = vmul.f32 %v678_v8, %v2993_v29  ;;  %v688_v26 = vmul.f32 %v686_v2, %v2984_v25 }
 0x3ff   : > { %v706_v27 = vpack.c.bf16 %v688_v26, %v680_v24  ;;  %v707_v28 = vpack.c.bf16 %v689_v15, %v681_v60 }
 0x401   : > { %729 = vmatpush.bf16.msrb.mxu2 %v706_v27  ;;  %742 = vmatpush.bf16.msra.mxu3 %v707_v28 }
 0x403   : > { %v651_v32 = vpop.permute.xlu0 %650  ;;  %v667_v33 = vpop.permute.xlu1 %666 }
 0x404   : > { %v670_v34 = vsel %vm374_vm13, %v667_v33, %v669_v41  ;;  %v671_v37 = vsel %vm374_vm13, %v669_v41, %v667_v33  ;;  %v887_v63 = vpop.permute.xlu2 %886 }
 0x405   : > { %v673_v38 = vmul.f32 %v671_v37, %v3026_v44  ;;  %v672_v39 = vmul.f32 %v670_v34, %v3021_v43 }
 0x407   : > { %v704_v42 = vpack.c.bf16 %v672_v39, %v3221_v17  ;;  %v705_v45 = vpack.c.bf16 %v673_v38, %v3223_v18 }
 0x409   : > { %730 = vmatpush.bf16.msrb.mxu2 %v704_v42  ;;  %743 = vmatpush.bf16.msra.mxu3 %v705_v45  ;;  %v698_v42 = vld [vmem:[%s4730_s2 + $0xa0] sm:$0xff] }
 0x40b   : > { %v661_v46 = vpop.permute.xlu0 %660  ;;  %v653_v47 = vpop.permute.xlu1 %652 }
 0x40c   : > { %v662_v48 = vsel %vm363_vm15, %v659_v1, %v661_v46  ;;  %v663_v49 = vsel %vm363_vm15, %v661_v46, %v659_v1  ;;  %v654_v41 = vsel %vm352_vm14, %v651_v32, %v653_v47  ;;  %v655_v52 = vsel %vm352_vm14, %v653_v47, %v651_v32  ;;  %v871_v13 = vpop.permute.xlu2 %870 }
 0x40d   : > { %v665_v17 = vmul.f32 %v662_v48, %v3061_v62  ;;  %v657_v18 = vmul.f32 %v654_v41, %v3045_v51  ;;  %v656_v55 = vmul.f32 %v655_v52, %v3040_v50  ;;  %v664_v56 = vmul.f32 %v663_v49, %v3056_v61 }
 0x40e   : > { %v699_v48 = vpack.c.bf16 %v698_v42, %v698_v42 }
 0x40f   : > { %v702_v58 = vpack.c.bf16 %v664_v56, %v656_v55  ;;  %v703_v59 = vpack.c.bf16 %v665_v17, %v657_v18 }
 0x411   : > { %731 = vmatpush.bf16.msrb.mxu2 %v702_v58  ;;  %744 = vmatpush.bf16.msra.mxu3 %v703_v59 }
 0x413   : > { %v635_v1 = vpop.permute.xlu0 %634  ;;  %v637_v2 = vpop.permute.xlu1 %636 }
 0x414   : > { %v638_v4 = vsel %vm330_vm2, %v635_v1, %v637_v2  ;;  %v639_v8 = vsel %vm330_vm2, %v637_v2, %v635_v1  ;;  %v861_v18 = vpop.permute.xlu2 %860 }
 0x415   : > { %v641_v15 = vmul.f32 %v638_v4, %v3088_v20  ;;  %v640_v26 = vmul.f32 %v639_v8, %v3074_v57 }
 0x41b   : > { %v645_v60 = vpop.permute.xlu0 %644  ;;  %v885_v24 = vpop.permute.xlu1 %884 }
 0x41c   : > { %v646_v27 = vsel %vm4736_vm3, %v643_v40, %v645_v60  ;;  %v647_v28 = vsel %vm4736_vm3, %v645_v60, %v643_v40  ;;  %v888_v32 = vsel %vm407_vm10, %v885_v24, %v887_v63  ;;  %v889_v33 = vsel %vm407_vm10, %v887_v63, %v885_v24  ;;  %v847_v24 = vpop.permute.xlu2 %846 }
 0x41d   : > { %v649_v34 = vmul.f32 %v646_v27, %v3093_v23  ;;  %v890_v37 = vmul.f32 %v888_v32, %v2964_v5  ;;  %v891_v38 = vmul.f32 %v889_v33, %v2969_v6  ;;  %v648_v39 = vmul.f32 %v647_v28, %v3083_v19 }
 0x41f   : > { %v902_v45 = vpack.c.bf16 %v890_v37, %v890_v37  ;;  %v903_v40 = vpack.c.bf16 %v891_v38, %v891_v38  ;;  %v700_v46 = vpack.c.bf16 %v648_v39, %v640_v26  ;;  %v701_v47 = vpack.c.bf16 %v649_v34, %v641_v15 }
 0x421   : > { %732 = vmatpush.bf16.msrb.mxu2 %v700_v46  ;;  %745 = vmatpush.bf16.msra.mxu3 %v701_v47  ;;  %v914_v49 = vsel %vm291_vm0, %v902_v45, 0  ;;  %v917_v41 = vsel %vm291_vm0, %v903_v40, 0 }
 0x423   : > { %v877_v52 = vpop.permute.xlu0 %876  ;;  %v869_v17 = vpop.permute.xlu1 %868 }
 0x424   : > { %2650 = vmatmul.msk.bf16.vlgmr.msrb.gmra.mxu2 %vm4735_vm4, %v699_v48  ;;  %2651 = vmatmul.msk.bf16.vlgmr.msra.gmra.mxu3 %vm4735_vm4, %v699_v48  ;;  %v872_v55 = vsel %vm385_vm12, %v869_v17, %v871_v13  ;;  %v873_v56 = vsel %vm385_vm12, %v871_v13, %v869_v17  ;;  %v829_v39 = vpop.permute.xlu2 %828 }
 0x425   : > { %922 = vmatpush.bf16.msra.mxu2 %v914_v49  ;;  %935 = vmatpush.bf16.msrb.mxu3 %v917_v41  ;;  %v874_v8 = vmul.f32 %v872_v55, %v2993_v29  ;;  %v875_v15 = vmul.f32 %v873_v56, %v2998_v30 }
 0x42b   : > { %v863_v58 = vpop.permute.xlu0 %862  ;;  %v879_v59 = vpop.permute.xlu1 %878 }
 0x42c   : > { %v864_v63 = vsel %vm374_vm13, %v861_v18, %v863_v58  ;;  %v865_v1 = vsel %vm374_vm13, %v863_v58, %v861_v18  ;;  %v880_v2 = vsel %vm396_vm11, %v877_v52, %v879_v59  ;;  %v881_v4 = vsel %vm396_vm11, %v879_v59, %v877_v52  ;;  %v839_v56 = vpop.permute.xlu2 %838 }
 0x42d   : > { %v882_v13 = vmul.f32 %v880_v2, %v2984_v25  ;;  %v883_v60 = vmul.f32 %v881_v4, %v3003_v31  ;;  %v866_v26 = vmul.f32 %v864_v63, %v3021_v43  ;;  %v867_v27 = vmul.f32 %v865_v1, %v3026_v44 }
 0x42f   : > { %v900_v28 = vpack.c.bf16 %v882_v13, %v874_v8  ;;  %v901_v32 = vpack.c.bf16 %v883_v60, %v875_v15  ;;  %v898_v34 = vpack.c.bf16 %v866_v26, %v3255_v35  ;;  %v899_v37 = vpack.c.bf16 %v867_v27, %v3257_v36  ;;  %v892_v15 = vld [vmem:[%s4730_s2 + $0x40] sm:$0xff] }
 0x431   : > { %923 = vmatpush.bf16.msra.mxu2 %v900_v28  ;;  %936 = vmatpush.bf16.msrb.mxu3 %v901_v32 }
 0x433   : > { %v845_v33 = vpop.permute.xlu1 %844  ;;  %v853_v38 = vpop.permute.xlu0 %852 }
 0x434   : > { %v848_v42 = vsel %vm352_vm14, %v845_v33, %v847_v24  ;;  %v849_v45 = vsel %vm352_vm14, %v847_v24, %v845_v33  ;;  %v893_v24 = vpack.c.bf16 %v892_v15, %v892_v15  ;;  %v949_v33 = vld [vmem:[%s4731_s3 + $0x28] sm:$0xff] }
 0x435   : > { %924 = vmatpush.bf16.msra.mxu2 %v898_v34  ;;  %937 = vmatpush.bf16.msrb.mxu3 %v899_v37  ;;  %v850_v35 = vmul.f32 %v849_v45, %v3040_v50  ;;  %v851_v36 = vmul.f32 %v848_v42, %v3045_v51  ;;  %v945_v45 = vld [vmem:[%s4730_s2 + $0x50] sm:$0xff] }
 0x436   : > { %952 = vperm.xlu1 %2724, %v949_v33  }
 0x43b   : > { %v855_v40 = vpop.permute.xlu1 %854  ;;  %v831_v41 = vpop.permute.xlu0 %830 }
 0x43c   : > { %v856_v46 = vsel %vm363_vm15, %v853_v38, %v855_v40  ;;  %v857_v47 = vsel %vm363_vm15, %v855_v40, %v853_v38  ;;  %v832_v18 = vsel %vm330_vm2, %v829_v39, %v831_v41  ;;  %v833_v55 = vsel %vm330_vm2, %v831_v41, %v829_v39 }
 0x43d   : > { %v858_v48 = vmul.f32 %v857_v47, %v3056_v61  ;;  %v859_v49 = vmul.f32 %v856_v46, %v3061_v62  ;;  %v834_v1 = vmul.f32 %v833_v55, %v3074_v57  ;;  %v835_v2 = vmul.f32 %v832_v18, %v3088_v20 }
 0x43f   : > { %v896_v52 = vpack.c.bf16 %v858_v48, %v850_v35  ;;  %v897_v17 = vpack.c.bf16 %v859_v49, %v851_v36  ;;  %v946_v36 = vpack.c.bf16 %v945_v45, %v945_v45 }
 0x441   : > { %925 = vmatpush.bf16.msra.mxu2 %v896_v52  ;;  %938 = vmatpush.bf16.msrb.mxu3 %v897_v17 }
 0x443   : > { %v837_v58 = vpop.permute.xlu1 %836  ;;  %v908_v34 = vpop.permute.xlu0 %907 }
 0x444   : > { %v840_v59 = vsel %vm4736_vm3, %v837_v58, %v839_v56  ;;  %v841_v63 = vsel %vm4736_vm3, %v839_v56, %v837_v58 }
 0x445   : > { %v842_v4 = vmul.f32 %v841_v63, %v3083_v19  ;;  %v843_v8 = vmul.f32 %v840_v59, %v3093_v23  ;;  %v992_v59 = vld [vmem:[%s4730_s2 + $0x60] sm:$0xff] }
 0x447   : > { %v894_v13 = vpack.c.bf16 %v842_v4, %v834_v1  ;;  %v895_v60 = vpack.c.bf16 %v843_v8, %v835_v2  ;;  %v993_v8 = vpack.c.bf16 %v992_v59, %v992_v59 }
 0x449   : > { %926 = vmatpush.bf16.msra.mxu2 %v894_v13  ;;  %939 = vmatpush.bf16.msrb.mxu3 %v895_v60  ;;  %v1000_v60 = vpop.permute.xlu2 %999 }
 0x44c   : > { %2654 = vmatmul.msk.bf16.vlgmr.msra.gmra.mxu2 %vm4735_vm4, %v893_v24  ;;  %2655 = vmatmul.msk.bf16.vlgmr.msrb.gmra.mxu3 %vm4735_vm4, %v893_v24 }
 0x4a7   : > { %v3413_v26 = vpop.f32.mrf.mxu2  ;;  %v3415_v27 = vpop.f32.mrf.mxu3 }
 0x4a8   : > { %v953_v41 = vpop.permute.xlu1 %952 }
 0x4af   : > { %v736_v28 = vpop.f32.mrf.mxu2  ;;  %v749_v32 = vpop.f32.mrf.mxu3 }
 0x4cf   : > { %v928_v37 = vpop.f32.mrf.mxu2  ;;  %v941_v38 = vpop.f32.mrf.mxu3 }
 0x4d0   : > { %v929_v39 = vadd.f32 %v928_v37, %v908_v34  ;;  %v942_v42 = vadd.f32 %v941_v38, %v908_v34  ;;  %v1113_v38 = vld [vmem:[%s4731_s3 + $0x38] sm:$0xff] }
 0x4d2   : > { %v947_v40 = vpack.c.bf16 %v929_v39, %v929_v39  ;;  %v948_v46 = vpack.c.bf16 %v942_v42, %v942_v42 }
 0x4d4   : > { %v959_v47 = vsel %vm291_vm0, %v947_v40, 0  ;;  %v962_v35 = vsel %vm291_vm0, %v948_v46, 0 }
 0x4d5   : > { %971 = vmatpush.bf16.msrb.mxu0 %v959_v47  ;;  %984 = vmatpush.bf16.msra.mxu1 %v962_v35 }
 0x4d7   : > { %v930_v48 = vpop.f32.mrf.mxu2  ;;  %v943_v49 = vpop.f32.mrf.mxu3 }
 0x4d8   : > { %2656 = vmatmul.msk.bf16.vlgmr.msrb.gmra.mxu0 %vm4734_vm1, %v946_v36  ;;  %2657 = vmatmul.msk.bf16.vlgmr.msra.gmra.mxu1 %vm4734_vm1, %v946_v36 }
 0x555   : > { %v973_v52 = vpop.f32.mrf.mxu0  ;;  %v986_v17 = vpop.f32.mrf.mxu1 }
 0x556   : > { %v974_v18 = vadd.f32 %v973_v52, %v953_v41  ;;  %v987_v55 = vadd.f32 %v986_v17, %v953_v41 }
 0x558   : > { %v990_v56 = vmax.f32 %v974_v18, 0.0  ;;  %v991_v58 = vmax.f32 %v987_v55, 0.0 }
 0x55a   : > { %v994_v63 = vpack.c.bf16 %v990_v56, %v990_v56  ;;  %v995_v1 = vpack.c.bf16 %v991_v58, %v991_v58 }
 0x55c   : > { %v1006_v2 = vsel %vm291_vm0, %v994_v63, 0  ;;  %v1009_v4 = vsel %vm291_vm0, %v995_v1, 0 }
 0x55d   : > { %v975_v15 = vpop.f32.mrf.mxu0  ;;  %v988_v13 = vpop.f32.mrf.mxu1  ;;  %1018 = vmatpush.bf16.msrb.mxu2 %v1006_v2  ;;  %1031 = vmatpush.bf16.msra.mxu3 %v1009_v4 }
 0x560   : > { %2658 = vmatmul.msk.bf16.vlgmr.msrb.gmra.mxu2 %vm4734_vm1, %v993_v8  ;;  %2659 = vmatmul.msk.bf16.vlgmr.msra.gmra.mxu3 %vm4734_vm1, %v993_v8 }
 0x5e3   : > { %v1020_v24 = vpop.f32.mrf.mxu2  ;;  %v1033_v28 = vpop.f32.mrf.mxu3 }
 0x5e4   : > { %v1021_v32 = vadd.f32 %v1020_v24, %v1000_v60  ;;  %v1034_v33 = vadd.f32 %v1033_v28, %v1000_v60 }
 0x5e6   : > { %1095 = vrot.lane.b32.xlu1 %v1034_v33, %s2800_s17  ;;  %1077 = vrot.lane.b32.xlu2 %v1021_v32, %s2799_s16 }
 0x5e7   : > { %1093 = vrot.lane.b32.xlu0 %v1021_v32, %s2800_s17 }
 0x5eb   : > { %v1022_v34 = vpop.f32.mrf.mxu2  ;;  %v1035_v37 = vpop.f32.mrf.mxu3 }
 0x5ee   : > { %1085 = vrot.lane.b32.xlu1 %v1021_v32, %s2798_s15  ;;  %1087 = vrot.lane.b32.xlu2 %v1034_v33, %s2798_s15 }
 0x5ef   : > { %1079 = vrot.lane.b32.xlu0 %v1034_v33, %s2799_s16 }
 0x5f6   : > { %1071 = vrot.lane.b32.xlu1 %v1034_v33, %s2801_s18  ;;  %1053 = vrot.lane.b32.xlu2 %v1021_v32, %s2802_s23 }
 0x5f7   : > { %1069 = vrot.lane.b32.xlu0 %v1021_v32, %s2801_s18 }
 0x5fe   : > { %1061 = vrot.lane.b32.xlu1 %v1021_v32, %s2803_s24  ;;  %1063 = vrot.lane.b32.xlu2 %v1034_v33, %s2803_s24 }
 0x5ff   : > { %1055 = vrot.lane.b32.xlu0 %v1034_v33, %s2802_s23 }
 0x606   : > { %1039 = vrot.lane.b32.xlu1 %v1034_v33, %s2804_s26  ;;  %1045 = vrot.lane.b32.xlu2 %v1021_v32, %s2805_s27 }
 0x607   : > { %1037 = vrot.lane.b32.xlu0 %v1021_v32, %s2804_s26 }
 0x60e   : > { %1116 = vperm.xlu1 %2724, %v1113_v38  }
 0x60f   : > { %1047 = vrot.lane.b32.xlu0 %v1034_v33, %s2805_s27 }
 0x640   : > { %v1078_v39 = vpop.permute.xlu2 %1077 }
 0x648   : > { %v1088_v36 = vpop.permute.xlu2 %1087 }
 0x650   : > { %v1054_v8 = vpop.permute.xlu2 %1053 }
 0x658   : > { %v1096_v42 = vpop.permute.xlu1 %1095 }
 0x659   : > { %v1094_v45 = vpop.permute.xlu0 %1093 }
 0x65a   : > { %v1097_v40 = vsel %vm407_vm10, %v1094_v45, %v1096_v42  ;;  %v1098_v46 = vsel %vm407_vm10, %v1096_v42, %v1094_v45 }
 0x65b   : > { %v1099_v47 = vmul.f32 %v1097_v40, %v2964_v5  ;;  %v1100_v35 = vmul.f32 %v1098_v46, %v2969_v6 }
 0x65d   : > { %v1111_v48 = vpack.c.bf16 %v1099_v47, %v1099_v47  ;;  %v1112_v49 = vpack.c.bf16 %v1100_v35, %v1100_v35 }
 0x65f   : > { %v1123_v41 = vsel %vm291_vm0, %v1111_v48, 0  ;;  %v1126_v52 = vsel %vm291_vm0, %v1112_v49, 0 }
 0x660   : > { %1131 = vmatpush.bf16.msra.mxu0 %v1123_v41  ;;  %1144 = vmatpush.bf16.msrb.mxu1 %v1126_v52  ;;  %v1086_v17 = vpop.permute.xlu1 %1085 }
 0x661   : > { %v1089_v18 = vsel %vm396_vm11, %v1086_v17, %v1088_v36  ;;  %v1090_v55 = vsel %vm396_vm11, %v1088_v36, %v1086_v17  ;;  %v1080_v56 = vpop.permute.xlu0 %1079 }
 0x662   : > { %v1091_v5 = vmul.f32 %v1089_v18, %v2984_v25  ;;  %v1092_v6 = vmul.f32 %v1090_v55, %v3003_v31  ;;  %v1081_v58 = vsel %vm385_vm12, %v1078_v39, %v1080_v56  ;;  %v1082_v59 = vsel %vm385_vm12, %v1080_v56, %v1078_v39  ;;  %v1101_v18 = vld [vmem:[%s4730_s2 + $0x70] sm:$0xff] }
 0x663   : > { %v1083_v63 = vmul.f32 %v1081_v58, %v2993_v29  ;;  %v1084_v1 = vmul.f32 %v1082_v59, %v2998_v30  ;;  %v1064_v30 = vpop.permute.xlu2 %1063 }
 0x665   : > { %v1109_v2 = vpack.c.bf16 %v1091_v5, %v1083_v63  ;;  %v1110_v4 = vpack.c.bf16 %v1092_v6, %v1084_v1  ;;  %v1102_v5 = vpack.c.bf16 %v1101_v18, %v1101_v18  ;;  %v1230_v63 = vld [vmem:[%s4731_s3 + $0x40] sm:$0xff]  ;;  %v710_v1 = vld [vmem:[%s4731_s3 + $0x50] sm:$0xff] }
 0x667   : > { %1132 = vmatpush.bf16.msra.mxu0 %v1109_v2  ;;  %1145 = vmatpush.bf16.msrb.mxu1 %v1110_v4  ;;  %v1277_v2 = vld [vmem:[%s4731_s3 + $0x58] sm:$0xff] }
 0x668   : > { %v1072_v15 = vpop.permute.xlu1 %1071 }
 0x669   : > { %v1070_v13 = vpop.permute.xlu0 %1069 }
 0x66a   : > { %v1073_v25 = vsel %vm374_vm13, %v1070_v13, %v1072_v15  ;;  %v1074_v31 = vsel %vm374_vm13, %v1072_v15, %v1070_v13 }
 0x66b   : > { %v1075_v60 = vmul.f32 %v1073_v25, %v3021_v43  ;;  %v1076_v24 = vmul.f32 %v1074_v31, %v3026_v44  ;;  %v1046_v36 = vpop.permute.xlu2 %1045 }
 0x66d   : > { %v1107_v29 = vpack.c.bf16 %v1075_v60, %v1021_v32  ;;  %v1108_v28 = vpack.c.bf16 %v1076_v24, %v1034_v33  ;;  %v3560_v24 = vld [vmem:[%s4729_s1 + $0x80] sm:$0xff] }
 0x66f   : > { %1133 = vmatpush.bf16.msra.mxu0 %v1107_v29  ;;  %1146 = vmatpush.bf16.msrb.mxu1 %v1108_v28  ;;  %v3566_v28 = vld [vmem:[%s4729_s1 + $0x88] sm:$0xff] }
 0x670   : > { %v1062_v34 = vpop.permute.xlu1 %1061 }
 0x671   : > { %v1065_v37 = vsel %vm363_vm15, %v1062_v34, %v1064_v30  ;;  %v1066_v38 = vsel %vm363_vm15, %v1064_v30, %v1062_v34  ;;  %v1056_v39 = vpop.permute.xlu0 %1055 }
 0x672   : > { %v1067_v42 = vmul.f32 %v1066_v38, %v3056_v61  ;;  %v1068_v45 = vmul.f32 %v1065_v37, %v3061_v62  ;;  %v1057_v43 = vsel %vm352_vm14, %v1054_v8, %v1056_v39  ;;  %v1058_v44 = vsel %vm352_vm14, %v1056_v39, %v1054_v8 }
 0x673   : > { %v1059_v32 = vmul.f32 %v1058_v44, %v3040_v50  ;;  %v1060_v33 = vmul.f32 %v1057_v43, %v3045_v51 }
 0x675   : > { %v1105_v40 = vpack.c.bf16 %v1067_v42, %v1059_v32  ;;  %v1106_v46 = vpack.c.bf16 %v1068_v45, %v1060_v33 }
 0x677   : > { %1134 = vmatpush.bf16.msra.mxu0 %v1105_v40  ;;  %1147 = vmatpush.bf16.msrb.mxu1 %v1106_v46  ;;  %v3582_v40 = vld [vmem:[%s4729_s1 + $0x60] sm:$0xff] }
 0x678   : > { %v1040_v35 = vpop.permute.xlu1 %1039 }
 0x679   : > { %v1038_v47 = vpop.permute.xlu0 %1037 }
 0x67a   : > { %v1041_v61 = vsel %vm330_vm2, %v1038_v47, %v1040_v35  ;;  %v1042_v62 = vsel %vm330_vm2, %v1040_v35, %v1038_v47  ;;  %v3588_v47 = vld [vmem:[%s4729_s1 + $0x68] sm:$0xff] }
 0x67b   : > { %v1043_v51 = vmul.f32 %v1042_v62, %v3074_v57  ;;  %v1044_v41 = vmul.f32 %v1041_v61, %v3088_v20  ;;  %v3594_v61 = vld [vmem:[%s4729_s1 + $0x70] sm:$0xff] }
 0x680   : > { %v1117_v57 = vpop.permute.xlu1 %1116 }
 0x681   : > { %v1048_v48 = vpop.permute.xlu0 %1047 }
 0x682   : > { %v1049_v49 = vsel %vm4736_vm3, %v1046_v36, %v1048_v48  ;;  %v1050_v50 = vsel %vm4736_vm3, %v1048_v48, %v1046_v36  ;;  %v3600_v36 = vld [vmem:[%s4729_s1 + $0x78] sm:$0xff] }
 0x683   : > { %v1051_v52 = vmul.f32 %v1050_v50, %v3083_v19  ;;  %v1052_v17 = vmul.f32 %v1049_v49, %v3093_v23 }
 0x685   : > { %v1103_v55 = vpack.c.bf16 %v1051_v52, %v1043_v51  ;;  %v1104_v56 = vpack.c.bf16 %v1052_v17, %v1044_v41 }
 0x687   : > { %1135 = vmatpush.bf16.msra.mxu0 %v1103_v55  ;;  %1148 = vmatpush.bf16.msrb.mxu1 %v1104_v56  ;;  %v3610_v55 = vld [vmem:[%s4729_s1 + $0x50] sm:$0xff] }
 0x68a   : > { %2660 = vmatmul.msk.bf16.vlgmr.msra.gmra.mxu0 %vm4735_vm4, %v1102_v5  ;;  %2661 = vmatmul.msk.bf16.vlgmr.msrb.gmra.mxu1 %vm4735_vm4, %v1102_v5  ;;  %v3616_v5 = vld [vmem:[%s4729_s1 + $0x58] sm:$0xff] }
 0x707   : > { %v1137_v6 = vpop.f32.mrf.mxu0  ;;  %v1150_v20 = vpop.f32.mrf.mxu1 }
 0x708   : > { %v3508_v58 = vadd.f32 %v1137_v6, %v1117_v57  ;;  %v3510_v19 = vadd.f32 %v1150_v20, %v1117_v57 }
 0x70a   : > { %1194 = vrot.lane.b32.xlu1 %v3508_v58, %s2799_s16  ;;  %1210 = vrot.lane.b32.xlu2 %v3508_v58, %s2800_s17 }
 0x70b   : > { %1212 = vrot.lane.b32.xlu0 %v3510_v19, %s2800_s17 }
 0x70f   : > { %v1139_v23 = vpop.f32.mrf.mxu0  ;;  %v1152_v59 = vpop.f32.mrf.mxu1 }
 0x712   : > { %1204 = vrot.lane.b32.xlu1 %v3510_v19, %s2798_s15  ;;  %1196 = vrot.lane.b32.xlu2 %v3510_v19, %s2799_s16 }
 0x713   : > { %1202 = vrot.lane.b32.xlu0 %v3508_v58, %s2798_s15 }
 0x71a   : > { %1170 = vrot.lane.b32.xlu1 %v3508_v58, %s2802_s23  ;;  %1186 = vrot.lane.b32.xlu2 %v3508_v58, %s2801_s18 }
 0x71b   : > { %1188 = vrot.lane.b32.xlu0 %v3510_v19, %s2801_s18 }
 0x722   : > { %1180 = vrot.lane.b32.xlu1 %v3510_v19, %s2803_s24  ;;  %1172 = vrot.lane.b32.xlu2 %v3510_v19, %s2802_s23 }
 0x723   : > { %1178 = vrot.lane.b32.xlu0 %v3508_v58, %s2803_s24 }
 0x72a   : > { %1162 = vrot.lane.b32.xlu1 %v3508_v58, %s2805_s27  ;;  %1154 = vrot.lane.b32.xlu2 %v3508_v58, %s2804_s26 }
 0x72b   : > { %1156 = vrot.lane.b32.xlu0 %v3510_v19, %s2804_s26 }
 0x732   : > { %1233 = vperm.xlu1 %2724, %v1230_v63   ;;  %1164 = vrot.lane.b32.xlu2 %v3510_v19, %s2805_s27 }
 0x733   : > { %713 = vperm.xlu0 %2722, %v710_v1  }
 0x73a   : > { %1280 = vperm.xlu2 %2723, %v1277_v2  }
 0x764   : > { %v1211_v4 = vpop.permute.xlu2 %1210 }
 0x76c   : > { %v1197_v8 = vpop.permute.xlu2 %1196 }
 0x774   : > { %v1187_v25 = vpop.permute.xlu2 %1186 }
 0x77c   : > { %v1195_v15 = vpop.permute.xlu1 %1194  ;;  %v1173_v49 = vpop.permute.xlu2 %1172 }
 0x77d   : > { %v1213_v13 = vpop.permute.xlu0 %1212  ;;  %v1198_v42 = vsel %vm385_vm12, %v1195_v15, %v1197_v8  ;;  %v1199_v45 = vsel %vm385_vm12, %v1197_v8, %v1195_v15  ;;  %v3638_v15 = vld [vmem:[%s4729_s1 + $0x28] sm:$0xff] }
 0x77e   : > { %v1214_v31 = vsel %vm407_vm10, %v1211_v4, %v1213_v13  ;;  %v1215_v60 = vsel %vm407_vm10, %v1213_v13, %v1211_v4  ;;  %v1200_v46 = vmul.f32 %v3582_v40, %v1198_v42  ;;  %v1201_v35 = vmul.f32 %v3588_v47, %v1199_v45 }
 0x77f   : > { %v1216_v29 = vmul.f32 %v3560_v24, %v1214_v31  ;;  %v1217_v30 = vmul.f32 %v3566_v28, %v1215_v60  ;;  %v3650_v60 = vld [vmem:[%s4729_s1 + $0x38] sm:$0xff] }
 0x781   : > { %v1228_v34 = vpack.c.bf16 %v1216_v29, %v1216_v29  ;;  %v1229_v37 = vpack.c.bf16 %v1217_v30, %v1217_v30 }
 0x783   : > { %v1240_v38 = vsel %vm291_vm0, %v1228_v34, 0  ;;  %v1243_v39 = vsel %vm291_vm0, %v1229_v37, 0 }
 0x784   : > { %1248 = vmatpush.bf16.msra.mxu2 %v1240_v38  ;;  %1261 = vmatpush.bf16.msrb.mxu3 %v1243_v39  ;;  %v1205_v43 = vpop.permute.xlu1 %1204  ;;  %v1155_v23 = vpop.permute.xlu2 %1154 }
 0x785   : > { %v1203_v44 = vpop.permute.xlu0 %1202 }
 0x786   : > { %v1206_v32 = vsel %vm396_vm11, %v1203_v44, %v1205_v43  ;;  %v1207_v33 = vsel %vm396_vm11, %v1205_v43, %v1203_v44  ;;  %v3660_v43 = vld [vmem:[%s4729_s1 + $0x10] sm:$0xff] }
 0x787   : > { %v1208_v62 = vmul.f32 %v3594_v61, %v1206_v32  ;;  %v1209_v48 = vmul.f32 %v3600_v36, %v1207_v33  ;;  %v3666_v32 = vld [vmem:[%s4729_s1 + $0x18] sm:$0xff] }
 0x789   : > { %v1226_v50 = vpack.c.bf16 %v1208_v62, %v1200_v46  ;;  %v1227_v51 = vpack.c.bf16 %v1209_v48, %v1201_v35  ;;  %v3676_v62 = vld [vmem:[%s4729_s1] sm:$0xff] }
 0x78b   : > { %1249 = vmatpush.bf16.msra.mxu2 %v1226_v50  ;;  %1262 = vmatpush.bf16.msrb.mxu3 %v1227_v51  ;;  %v1218_v51 = vld [vmem:[%s4730_s2 + $0x80] sm:$0xff] }
 0x78c   : > { %v1171_v41 = vpop.permute.xlu1 %1170  ;;  %v1165_v37 = vpop.permute.xlu2 %1164 }
 0x78d   : > { %v1189_v52 = vpop.permute.xlu0 %1188  ;;  %v1174_v59 = vsel %vm352_vm14, %v1171_v41, %v1173_v49  ;;  %v1175_v63 = vsel %vm352_vm14, %v1173_v49, %v1171_v41  ;;  %v3682_v49 = vld [vmem:[%s4729_s1 + $0x8] sm:$0xff] }
 0x78e   : > { %v1190_v17 = vsel %vm374_vm13, %v1187_v25, %v1189_v52  ;;  %v1191_v18 = vsel %vm374_vm13, %v1189_v52, %v1187_v25  ;;  %v1177_v13 = vmul.f32 %v3638_v15, %v1174_v59  ;;  %v3644_v25 = vld [vmem:[%s4729_s1 + $0x30] sm:$0xff] }
 0x78f   : > { %v1192_v56 = vmul.f32 %v3610_v55, %v1190_v17  ;;  %v1193_v57 = vmul.f32 %v3616_v5, %v1191_v18  ;;  %v1219_v17 = vpack.c.bf16 %v1218_v51, %v1218_v51 }
 0x791   : > { %v1224_v6 = vpack.c.bf16 %v1192_v56, %v3508_v58  ;;  %v1225_v20 = vpack.c.bf16 %v1193_v57, %v3510_v19  ;;  %v3632_v58 = vld [vmem:[%s4729_s1 + $0x20] sm:$0xff] }
 0x792   : > { %v1176_v19 = vmul.f32 %v3632_v58, %v1175_v63 }
 0x793   : > { %1250 = vmatpush.bf16.msra.mxu2 %v1224_v6  ;;  %1263 = vmatpush.bf16.msrb.mxu3 %v1225_v20 }
 0x794   : > { %v1181_v1 = vpop.permute.xlu1 %1180 }
 0x795   : > { %v1179_v2 = vpop.permute.xlu0 %1178 }
 0x796   : > { %v1182_v4 = vsel %vm363_vm15, %v1179_v2, %v1181_v1  ;;  %v1183_v8 = vsel %vm363_vm15, %v1181_v1, %v1179_v2 }
 0x797   : > { %v1184_v31 = vmul.f32 %v3644_v25, %v1183_v8  ;;  %v1185_v29 = vmul.f32 %v3650_v60, %v1182_v4 }
 0x799   : > { %v1222_v30 = vpack.c.bf16 %v1184_v31, %v1176_v19  ;;  %v1223_v34 = vpack.c.bf16 %v1185_v29, %v1177_v13 }
 0x79b   : > { %1251 = vmatpush.bf16.msra.mxu2 %v1222_v30  ;;  %1264 = vmatpush.bf16.msrb.mxu3 %v1223_v34 }
 0x79c   : > { %v1163_v38 = vpop.permute.xlu1 %1162 }
 0x79d   : > { %v1166_v39 = vsel %vm4736_vm3, %v1163_v38, %v1165_v37  ;;  %v1167_v42 = vsel %vm4736_vm3, %v1165_v37, %v1163_v38  ;;  %v1157_v45 = vpop.permute.xlu0 %1156 }
 0x79e   : > { %v1168_v44 = vmul.f32 %v3660_v43, %v1167_v42  ;;  %v1169_v33 = vmul.f32 %v3666_v32, %v1166_v39  ;;  %v1158_v46 = vsel %vm330_vm2, %v1155_v23, %v1157_v45  ;;  %v1159_v35 = vsel %vm330_vm2, %v1157_v45, %v1155_v23 }
 0x79f   : > { %v1160_v48 = vmul.f32 %v3676_v62, %v1159_v35  ;;  %v1161_v50 = vmul.f32 %v3682_v49, %v1158_v46 }
 0x7a1   : > { %v1220_v41 = vpack.c.bf16 %v1168_v44, %v1160_v48  ;;  %v1221_v52 = vpack.c.bf16 %v1169_v33, %v1161_v50 }
 0x7a3   : > { %1252 = vmatpush.bf16.msra.mxu2 %v1220_v41  ;;  %1265 = vmatpush.bf16.msrb.mxu3 %v1221_v52 }
 0x7a4   : > { %v1234_v51 = vpop.permute.xlu1 %1233 }
 0x7a5   : > { %v714_v18 = vpop.permute.xlu0 %713 }
 0x7a6   : > { %2662 = vmatmul.msk.bf16.vlgmr.msra.gmra.mxu2 %vm4735_vm4, %v1219_v17  ;;  %2663 = vmatmul.msk.bf16.vlgmr.msrb.gmra.mxu3 %vm4735_vm4, %v1219_v17  ;;  %v735_v56 = vadd.f32 %v3413_v26, %v714_v18  ;;  %v748_v57 = vadd.f32 %v3415_v27, %v714_v18 }
 0x7a8   : > { %v751_v6 = vsub.f32 0.0, %v735_v56  ;;  %v752_v20 = vsub.f32 0.0, %v748_v57 }
 0x7aa   : > { %v753_v23 = vmul.f32 1.442695, %v751_v6  ;;  %v755_v59 = vmul.f32 1.442695, %v752_v20 }
 0x7ac   : > { %2733 = vpow2.f32 %v753_v23 }
 0x7ad   : > { %2735 = vpow2.f32 %v755_v59 }
 0x7b2   : > { %v2734_v63 = vpop.eup %2733 }
 0x7b3   : > { %v2736_v1 = vpop.eup %2735  ;;  %v757_v2 = vadd.f32 1.0, %v2734_v63  ;;  %v1273_v63 = vld [vmem:[%s4730_s2 + $0xb0] sm:$0xff] }
 0x7b4   : > { %v758_v4 = vadd.f32 1.0, %v2736_v1 }
 0x7b5   : > { %2737 = vrcp.f32 %v757_v2  ;;  %vm764_vm7 = vweird.f32 %v757_v2  ;;  %v770_v38 = vand.u32 2147483648, %v757_v2  ;;  %v768_v42 = vand.u32 2147483647, %v757_v2 }
 0x7b6   : > { %2739 = vrcp.f32 %v758_v4  ;;  %v784_v39 = vand.u32 2147483648, %v758_v4  ;;  %vm778_vm9 = vweird.f32 %v758_v4  ;;  %v782_v45 = vand.u32 2147483647, %v758_v4 }
 0x7b7   : > { %v771_v46 = vor.u32 1.1754944e-38, %v770_v38  ;;  %vm769_vm4 = vcmp.eq.f32.partialorder %v768_v42, 8.507059e+37 }
 0x7b8   : > { %v785_v35 = vor.u32 1.1754944e-38, %v784_v39  ;;  %vm783_vm3 = vcmp.eq.f32.partialorder %v782_v45, 8.507059e+37 }
 0x7bb   : > { %v2738_v8 = vpop.eup %2737 }
 0x7bc   : > { %v2740_v19 = vpop.eup %2739  ;;  %v760_v13 = vmul.f32 %v2738_v8, %v757_v2  ;;  %vm765_vm5 = vweird.f32 %v2738_v8 }
 0x7bd   : > { %v774_v31 = vmul.f32 %v2740_v19, %v758_v4  ;;  %vm779_vm6 = vweird.f32 %v2740_v19  ;;  %vm766_vm8 = vmor %vm764_vm7, %vm765_vm5  ;;  %v1274_v4 = vpack.c.bf16 %v1273_v63, %v1273_v63  ;;  %vm4739_vm5 = vcmask 588800  }
 0x7be   : > { %v761_v29 = vsub.f32 1.0, %v760_v13  ;;  %vm780_vm1 = vmor %vm778_vm9, %vm779_vm6  ;;  %v1281_v13 = vpop.permute.xlu2 %1280 }
 0x7bf   : > { %v775_v26 = vsub.f32 1.0, %v774_v31  ;;  %vm4740_vm6 = vmmov %vm4739_vm5 }
 0x7c0   : > { %v762_v30 = vmul.f32 %v2738_v8, %v761_v29  ;;  %vm4743_vm9 = vmmov %vm4739_vm5 }
 0x7c1   : > { %v776_v27 = vmul.f32 %v2740_v19, %v775_v26 }
 0x7c2   : > { %v763_v34 = vadd.f32 %v2738_v8, %v762_v30 }
 0x7c3   : > { %v777_v37 = vadd.f32 %v2740_v19, %v776_v27 }
 0x7c4   : > { %v767_v44 = vsel %vm766_vm8, %v2738_v8, %v763_v34 }
 0x7c5   : > { %v781_v33 = vsel %vm780_vm1, %v2740_v19, %v777_v37  ;;  %v772_v48 = vsel %vm769_vm4, %v771_v46, %v767_v44  ;;  %vm1283_vm1 = vcmask 130048   ;;  %v1391_v37 = vld [vmem:[%s4731_s3 + $0x60] sm:$0xff] }
 0x7c6   : > { %v786_v50 = vsel %vm783_vm3, %v785_v35, %v781_v33  ;;  %v787_v41 = vperm.slane %v772_v48, 0  ;;  %vm4737_vm3 = vcmp.lt.s32.totalorder %v2958_v3, 16 }
 0x7c7   : > { %v788_v52 = vperm.slane %v786_v50, 0  ;;  %vm4738_vm4 = vmmov %vm4737_vm3 }
 0x7c8   : > { %v789_v6 = vmul.f32 %v787_v41, %v3115_v9  ;;  %vm4741_vm7 = vmmov %vm4737_vm3 }
 0x7c9   : > { %v790_v23 = vmul.f32 %v788_v52, %v3117_v11  ;;  %vm4742_vm8 = vmmov %vm4737_vm3 }
 0x829   : > { %v1254_v17 = vpop.f32.mrf.mxu2  ;;  %v1267_v18 = vpop.f32.mrf.mxu3 }
 0x82a   : > { %v1255_v56 = vadd.f32 %v1254_v17, %v1234_v51  ;;  %v1268_v57 = vadd.f32 %v1267_v18, %v1234_v51 }
 0x82c   : > { %v1271_v20 = vmax.f32 %v1255_v56, 0.0  ;;  %v1272_v59 = vmax.f32 %v1268_v57, 0.0 }
 0x82e   : > { %v1275_v1 = vpack.c.bf16 %v1271_v20, %v789_v6  ;;  %v1276_v2 = vpack.c.bf16 %v1272_v59, %v790_v23 }
 0x830   : > { %1294 = vmatpush.bf16.msrb.mxu0 %v1275_v1  ;;  %1307 = vmatpush.bf16.msra.mxu1 %v1276_v2 }
 0x831   : > { %v1256_v8 = vpop.f32.mrf.mxu2  ;;  %v1269_v19 = vpop.f32.mrf.mxu3 }
 0x833   : > { %2664 = vmatmul.msk.bf16.vlgmr.msrb.gmra.mxu0 %vm1283_vm1, %v1274_v4  ;;  %2665 = vmatmul.msk.bf16.vlgmr.msra.gmra.mxu1 %vm1283_vm1, %v1274_v4  ;;  %vm4744_vm1 = vmmov %vm4739_vm5 }
 0x8b0   : > { %v1296_v9 = vpop.f32.mrf.mxu0  ;;  %v1309_v31 = vpop.f32.mrf.mxu1 }
 0x8b1   : > { %v1297_v29 = vadd.f32 %v1296_v9, %v1281_v13  ;;  %v1310_v11 = vadd.f32 %v1309_v31, %v1281_v13 }
 0x8b3   : > { %v1313_v26 = vmax.f32 %v1297_v29, 0.0  ;;  %v1314_v30 = vmax.f32 %v1310_v11, 0.0 }
 0x8b5   : > { %1373 = vrot.lane.b32.xlu1 %v1314_v30, %s2800_s17  ;;  %1355 = vrot.lane.b32.xlu2 %v1313_v26, %s2799_s16 }
 0x8b6   : > { %1371 = vrot.lane.b32.xlu0 %v1313_v26, %s2800_s17 }
 0x8b8   : > { %v1298_v27 = vpop.f32.mrf.mxu0  ;;  %v1311_v34 = vpop.f32.mrf.mxu1 }
 0x8bd   : > { %1363 = vrot.lane.b32.xlu1 %v1313_v26, %s2798_s15  ;;  %1365 = vrot.lane.b32.xlu2 %v1314_v30, %s2798_s15 }
 0x8be   : > { %1357 = vrot.lane.b32.xlu0 %v1314_v30, %s2799_s16 }
 0x8c5   : > { %1349 = vrot.lane.b32.xlu1 %v1314_v30, %s2801_s18  ;;  %1331 = vrot.lane.b32.xlu2 %v1313_v26, %s2802_s23 }
 0x8c6   : > { %1347 = vrot.lane.b32.xlu0 %v1313_v26, %s2801_s18 }
 0x8cd   : > { %1339 = vrot.lane.b32.xlu1 %v1313_v26, %s2803_s24  ;;  %1341 = vrot.lane.b32.xlu2 %v1314_v30, %s2803_s24 }
 0x8ce   : > { %1333 = vrot.lane.b32.xlu0 %v1314_v30, %s2802_s23 }
 0x8d5   : > { %1317 = vrot.lane.b32.xlu1 %v1314_v30, %s2804_s26  ;;  %1323 = vrot.lane.b32.xlu2 %v1313_v26, %s2805_s27 }
 0x8d6   : > { %1315 = vrot.lane.b32.xlu0 %v1313_v26, %s2804_s26 }
 0x8dd   : > { %1394 = vperm.xlu1 %2724, %v1391_v37  }
 0x8de   : > { %1325 = vrot.lane.b32.xlu0 %v1314_v30, %s2805_s27 }
 0x90f   : > { %v1356_v38 = vpop.permute.xlu2 %1355 }
 0x917   : > { %v1366_v35 = vpop.permute.xlu2 %1365 }
 0x91f   : > { %v1332_v4 = vpop.permute.xlu2 %1331 }
 0x927   : > { %v1374_v39 = vpop.permute.xlu1 %1373  ;;  %v1342_v34 = vpop.permute.xlu2 %1341 }
 0x928   : > { %v1372_v42 = vpop.permute.xlu0 %1371 }
 0x929   : > { %v1375_v45 = vsel %vm407_vm10, %v1372_v42, %v1374_v39  ;;  %v1376_v44 = vsel %vm407_vm10, %v1374_v39, %v1372_v42 }
 0x92a   : > { %v3721_v33 = vmul.f32 %v3560_v24, %v1375_v45  ;;  %v3724_v46 = vmul.f32 %v3566_v28, %v1376_v44 }
 0x92c   : > { %v1389_v48 = vpack.c.bf16 %v3721_v33, %v3721_v33  ;;  %v1390_v50 = vpack.c.bf16 %v3724_v46, %v3724_v46 }
 0x92e   : > { %v1401_v51 = vsel %vm291_vm0, %v1389_v48, 0  ;;  %v1404_v41 = vsel %vm291_vm0, %v1390_v50, 0 }
 0x92f   : > { %1409 = vmatpush.bf16.msrb.mxu2 %v1401_v51  ;;  %1422 = vmatpush.bf16.msra.mxu3 %v1404_v41  ;;  %v1364_v52 = vpop.permute.xlu1 %1363 }
 0x930   : > { %v1367_v17 = vsel %vm396_vm11, %v1364_v52, %v1366_v35  ;;  %v1368_v18 = vsel %vm396_vm11, %v1366_v35, %v1364_v52  ;;  %v1358_v56 = vpop.permute.xlu0 %1357 }
 0x931   : > { %v1369_v57 = vmul.f32 %v3594_v61, %v1367_v17  ;;  %v1370_v6 = vmul.f32 %v3600_v36, %v1368_v18  ;;  %v1359_v20 = vsel %vm385_vm12, %v1356_v38, %v1358_v56  ;;  %v1360_v23 = vsel %vm385_vm12, %v1358_v56, %v1356_v38  ;;  %v1324_v56 = vpop.permute.xlu2 %1323 }
 0x932   : > { %v1361_v59 = vmul.f32 %v3582_v40, %v1359_v20  ;;  %v1362_v63 = vmul.f32 %v3588_v47, %v1360_v23 }
 0x934   : > { %v3744_v1 = vpack.c.bf16 %v1369_v57, %v1361_v59  ;;  %v3746_v2 = vpack.c.bf16 %v1370_v6, %v1362_v63 }
 0x936   : > { %1410 = vmatpush.bf16.msrb.mxu2 %v3744_v1  ;;  %1423 = vmatpush.bf16.msra.mxu3 %v3746_v2 }
 0x937   : > { %v1350_v8 = vpop.permute.xlu1 %1349 }
 0x938   : > { %v1348_v19 = vpop.permute.xlu0 %1347 }
 0x939   : > { %v1351_v13 = vsel %vm374_vm13, %v1348_v19, %v1350_v8  ;;  %v1352_v9 = vsel %vm374_vm13, %v1350_v8, %v1348_v19  ;;  %v1379_v8 = vld [vmem:[%s4730_s2 + $0xc0] sm:$0xff] }
 0x93a   : > { %v1353_v31 = vmul.f32 %v3610_v55, %v1351_v13  ;;  %v1354_v29 = vmul.f32 %v3616_v5, %v1352_v9  ;;  %v1380_v9 = vpack.c.bf16 %v1379_v8, %v1379_v8 }
 0x93c   : > { %v3756_v11 = vpack.c.bf16 %v1353_v31, %v1313_v26  ;;  %v3758_v27 = vpack.c.bf16 %v1354_v29, %v1314_v30 }
 0x93e   : > { %1411 = vmatpush.bf16.msrb.mxu2 %v3756_v11  ;;  %1424 = vmatpush.bf16.msra.mxu3 %v3758_v27 }
 0x93f   : > { %v1340_v37 = vpop.permute.xlu1 %1339 }
 0x940   : > { %v1343_v38 = vsel %vm363_vm15, %v1340_v37, %v1342_v34  ;;  %v1344_v39 = vsel %vm363_vm15, %v1342_v34, %v1340_v37  ;;  %v1334_v42 = vpop.permute.xlu0 %1333 }
 0x941   : > { %v1345_v45 = vmul.f32 %v3644_v25, %v1344_v39  ;;  %v1346_v26 = vmul.f32 %v3650_v60, %v1343_v38  ;;  %v1335_v30 = vsel %vm352_vm14, %v1332_v4, %v1334_v42  ;;  %v1336_v44 = vsel %vm352_vm14, %v1334_v42, %v1332_v4 }
 0x942   : > { %v1337_v35 = vmul.f32 %v3632_v58, %v1336_v44  ;;  %v1338_v48 = vmul.f32 %v3638_v15, %v1335_v30 }
 0x944   : > { %v3774_v50 = vpack.c.bf16 %v1345_v45, %v1337_v35  ;;  %v3776_v51 = vpack.c.bf16 %v1346_v26, %v1338_v48  ;;  %v1732_v45 = vld [vmem:[%s4731_s3 + $0x78] sm:$0xff]  ;;  %v1508_v26 = vld [vmem:[%s4731_s3 + $0x68] sm:$0xff] }
 0x946   : > { %1412 = vmatpush.bf16.msrb.mxu2 %v3774_v50  ;;  %1425 = vmatpush.bf16.msra.mxu3 %v3776_v51 }
 0x947   : > { %v1318_v52 = vpop.permute.xlu1 %1317 }
 0x948   : > { %v1316_v41 = vpop.permute.xlu0 %1315 }
 0x949   : > { %v1319_v17 = vsel %vm330_vm2, %v1316_v41, %v1318_v52  ;;  %v1320_v18 = vsel %vm330_vm2, %v1318_v52, %v1316_v41 }
 0x94a   : > { %v1321_v23 = vmul.f32 %v3676_v62, %v1320_v18  ;;  %v1322_v59 = vmul.f32 %v3682_v49, %v1319_v17 }
 0x94f   : > { %v1395_v31 = vpop.permute.xlu1 %1394 }
 0x950   : > { %v1326_v57 = vpop.permute.xlu0 %1325 }
 0x951   : > { %v1327_v6 = vsel %vm4737_vm3, %v1324_v56, %v1326_v57  ;;  %v1328_v20 = vsel %vm4738_vm4, %v1326_v57, %v1324_v56  ;;  %vm4745_vm3 = vcmask 64512  }
 0x952   : > { %v1329_v63 = vmul.f32 %v3660_v43, %v1328_v20  ;;  %v1330_v4 = vmul.f32 %v3666_v32, %v1327_v6  ;;  %vm4746_vm4 = vmmov %vm4745_vm3 }
 0x954   : > { %v3795_v19 = vpack.c.bf16 %v1329_v63, %v1321_v23  ;;  %v3797_v13 = vpack.c.bf16 %v1330_v4, %v1322_v59 }
 0x956   : > { %1413 = vmatpush.bf16.msrb.mxu2 %v3795_v19  ;;  %1426 = vmatpush.bf16.msra.mxu3 %v3797_v13 }
 0x959   : > { %2666 = vmatmul.msk.bf16.vlgmr.msrb.gmra.mxu2 %vm4739_vm5, %v1380_v9  ;;  %2667 = vmatmul.msk.bf16.vlgmr.msra.gmra.mxu3 %vm4740_vm6, %v1380_v9  ;;  %vm4747_vm5 = vmmov %vm4741_vm7 }
 0x95a   : > { %vm4748_vm6 = vmmov %vm4747_vm5 }
 0x9dc   : > { %v1415_v29 = vpop.f32.mrf.mxu2  ;;  %v1428_v34 = vpop.f32.mrf.mxu3 }
 0x9dd   : > { %v3803_v37 = vadd.f32 %v1415_v29, %v1395_v31  ;;  %v3805_v38 = vadd.f32 %v1428_v34, %v1395_v31 }
 0x9df   : > { %1472 = vrot.lane.b32.xlu1 %v3803_v37, %s2799_s16  ;;  %1488 = vrot.lane.b32.xlu2 %v3803_v37, %s2800_s17 }
 0x9e0   : > { %1490 = vrot.lane.b32.xlu0 %v3805_v38, %s2800_s17 }
 0x9e4   : > { %v1417_v39 = vpop.f32.mrf.mxu2  ;;  %v1430_v42 = vpop.f32.mrf.mxu3 }
 0x9e7   : > { %1482 = vrot.lane.b32.xlu1 %v3805_v38, %s2798_s15  ;;  %1474 = vrot.lane.b32.xlu2 %v3805_v38, %s2799_s16 }
 0x9e8   : > { %1480 = vrot.lane.b32.xlu0 %v3803_v37, %s2798_s15 }
 0x9ef   : > { %1448 = vrot.lane.b32.xlu1 %v3803_v37, %s2802_s23  ;;  %1464 = vrot.lane.b32.xlu2 %v3803_v37, %s2801_s18 }
 0x9f0   : > { %1466 = vrot.lane.b32.xlu0 %v3805_v38, %s2801_s18 }
 0x9f7   : > { %1458 = vrot.lane.b32.xlu1 %v3805_v38, %s2803_s24  ;;  %1450 = vrot.lane.b32.xlu2 %v3805_v38, %s2802_s23 }
 0x9f8   : > { %1456 = vrot.lane.b32.xlu0 %v3803_v37, %s2803_s24 }
 0x9ff   : > { %1440 = vrot.lane.b32.xlu1 %v3803_v37, %s2805_s27  ;;  %1432 = vrot.lane.b32.xlu2 %v3803_v37, %s2804_s26 }
 0xa00   : > { %1434 = vrot.lane.b32.xlu0 %v3805_v38, %s2804_s26 }
 0xa07   : > { %1735 = vperm.xlu1 %2724, %v1732_v45   ;;  %1442 = vrot.lane.b32.xlu2 %v3805_v38, %s2805_s27 }
 0xa08   : > { %1511 = vperm.xlu0 %2722, %v1508_v26  }
 0xa39   : > { %v1489_v30 = vpop.permute.xlu2 %1488 }
 0xa41   : > { %v1475_v44 = vpop.permute.xlu2 %1474 }
 0xa49   : > { %v1465_v41 = vpop.permute.xlu2 %1464 }
 0xa51   : > { %v1473_v35 = vpop.permute.xlu1 %1472  ;;  %v1451_v45 = vpop.permute.xlu2 %1450 }
 0xa52   : > { %v1491_v48 = vpop.permute.xlu0 %1490  ;;  %v1476_v59 = vsel %vm385_vm12, %v1473_v35, %v1475_v44  ;;  %v1477_v63 = vsel %vm385_vm12, %v1475_v44, %v1473_v35 }
 0xa53   : > { %v1492_v52 = vsel %vm407_vm10, %v1489_v30, %v1491_v48  ;;  %v1493_v17 = vsel %vm407_vm10, %v1491_v48, %v1489_v30  ;;  %v1478_v29 = vmul.f32 %v3582_v40, %v1476_v59  ;;  %v1479_v34 = vmul.f32 %v3588_v47, %v1477_v63 }
 0xa54   : > { %v1494_v18 = vmul.f32 %v3560_v24, %v1492_v52  ;;  %v1495_v56 = vmul.f32 %v3566_v28, %v1493_v17 }
 0xa56   : > { %v1506_v57 = vpack.c.bf16 %v1494_v18, %v1494_v18  ;;  %v1507_v6 = vpack.c.bf16 %v1495_v56, %v1495_v56 }
 0xa58   : > { %v1518_v20 = vsel %vm291_vm0, %v1506_v57, 0  ;;  %v1521_v23 = vsel %vm291_vm0, %v1507_v6, 0 }
 0xa59   : > { %1526 = vmatpush.bf16.msra.mxu0 %v1518_v20  ;;  %1539 = vmatpush.bf16.msrb.mxu1 %v1521_v23  ;;  %v1483_v4 = vpop.permute.xlu1 %1482  ;;  %v1433_v6 = vpop.permute.xlu2 %1432 }
 0xa5a   : > { %v1481_v8 = vpop.permute.xlu0 %1480 }
 0xa5b   : > { %v1484_v9 = vsel %vm396_vm11, %v1481_v8, %v1483_v4  ;;  %v1485_v31 = vsel %vm396_vm11, %v1483_v4, %v1481_v8 }
 0xa5c   : > { %v1486_v39 = vmul.f32 %v3594_v61, %v1484_v9  ;;  %v1487_v42 = vmul.f32 %v3600_v36, %v1485_v31 }
 0xa5e   : > { %v1504_v26 = vpack.c.bf16 %v1486_v39, %v1478_v29  ;;  %v1505_v30 = vpack.c.bf16 %v1487_v42, %v1479_v34 }
 0xa60   : > { %1527 = vmatpush.bf16.msra.mxu0 %v1504_v26  ;;  %1540 = vmatpush.bf16.msrb.mxu1 %v1505_v30 }
 0xa61   : > { %v1449_v44 = vpop.permute.xlu1 %1448  ;;  %v1443_v34 = vpop.permute.xlu2 %1442 }
 0xa62   : > { %v1467_v35 = vpop.permute.xlu0 %1466  ;;  %v1452_v20 = vsel %vm352_vm14, %v1449_v44, %v1451_v45  ;;  %v1453_v23 = vsel %vm352_vm14, %v1451_v45, %v1449_v44 }
 0xa63   : > { %v1468_v48 = vsel %vm374_vm13, %v1465_v41, %v1467_v35  ;;  %v1469_v52 = vsel %vm374_vm13, %v1467_v35, %v1465_v41 }
 0xa64   : > { %v1470_v17 = vmul.f32 %v3610_v55, %v1468_v48  ;;  %v1471_v18 = vmul.f32 %v3616_v5, %v1469_v52 }
 0xa66   : > { %v1502_v56 = vpack.c.bf16 %v1470_v17, %v3803_v37  ;;  %v1503_v57 = vpack.c.bf16 %v1471_v18, %v3805_v38  ;;  %v1454_v37 = vmul.f32 %v3632_v58, %v1453_v23  ;;  %v1455_v38 = vmul.f32 %v3638_v15, %v1452_v20  ;;  %v1496_v18 = vld [vmem:[%s4730_s2 + $0xd0] sm:$0xff] }
 0xa67   : > { %v1497_v20 = vpack.c.bf16 %v1496_v18, %v1496_v18 }
 0xa68   : > { %1528 = vmatpush.bf16.msra.mxu0 %v1502_v56  ;;  %1541 = vmatpush.bf16.msrb.mxu1 %v1503_v57 }
 0xa69   : > { %v1459_v59 = vpop.permute.xlu1 %1458 }
 0xa6a   : > { %v1457_v63 = vpop.permute.xlu0 %1456 }
 0xa6b   : > { %v1460_v41 = vsel %vm363_vm15, %v1457_v63, %v1459_v59  ;;  %v1461_v4 = vsel %vm363_vm15, %v1459_v59, %v1457_v63 }
 0xa6c   : > { %v1462_v8 = vmul.f32 %v3644_v25, %v1461_v4  ;;  %v1463_v9 = vmul.f32 %v3650_v60, %v1460_v41 }
 0xa6e   : > { %v1500_v31 = vpack.c.bf16 %v1462_v8, %v1454_v37  ;;  %v1501_v29 = vpack.c.bf16 %v1463_v9, %v1455_v38 }
 0xa70   : > { %1529 = vmatpush.bf16.msra.mxu0 %v1500_v31  ;;  %1542 = vmatpush.bf16.msrb.mxu1 %v1501_v29 }
 0xa71   : > { %v1441_v39 = vpop.permute.xlu1 %1440 }
 0xa72   : > { %v1444_v42 = vsel %vm4741_vm7, %v1441_v39, %v1443_v34  ;;  %v1445_v45 = vsel %vm4742_vm8, %v1443_v34, %v1441_v39  ;;  %v1435_v26 = vpop.permute.xlu0 %1434  ;;  %vm4749_vm7 = vmmov %vm4744_vm1 }
 0xa73   : > { %v1446_v30 = vmul.f32 %v3660_v43, %v1445_v45  ;;  %v1447_v44 = vmul.f32 %v3666_v32, %v1444_v42  ;;  %v1436_v35 = vsel %vm330_vm2, %v1433_v6, %v1435_v26  ;;  %v1437_v48 = vsel %vm330_vm2, %v1435_v26, %v1433_v6  ;;  %v1730_v6 = vld [vmem:[%s4730_s2 + $0xf0] sm:$0xff]  ;;  %v1843_v26 = vld [vmem:[%s4731_s3 + $0x80] sm:$0xff]  ;;  %vm4750_vm8 = vmmov %vm4744_vm1 }
 0xa74   : > { %v1438_v52 = vmul.f32 %v3676_v62, %v1437_v48  ;;  %v1439_v17 = vmul.f32 %v3682_v49, %v1436_v35  ;;  %v1731_v23 = vpack.c.bf16 %v1730_v6, %v1730_v6 }
 0xa76   : > { %v1498_v56 = vpack.c.bf16 %v1446_v30, %v1438_v52  ;;  %v1499_v57 = vpack.c.bf16 %v1447_v44, %v1439_v17 }
 0xa78   : > { %1530 = vmatpush.bf16.msra.mxu0 %v1498_v56  ;;  %1543 = vmatpush.bf16.msrb.mxu1 %v1499_v57 }
 0xa79   : > { %v1736_v39 = vpop.permute.xlu1 %1735 }
 0xa7a   : > { %v1512_v59 = vpop.permute.xlu0 %1511 }
 0xa7b   : > { %2668 = vmatmul.msk.bf16.vlgmr.msra.gmra.mxu0 %vm4743_vm9, %v1497_v20  ;;  %2669 = vmatmul.msk.bf16.vlgmr.msrb.gmra.mxu1 %vm4744_vm1, %v1497_v20  ;;  %vm4751_vm9 = vmmov %vm4747_vm5 }
 0xa7c   : > { %1748 = vmatpush.bf16.msrb.mxu0 %v2903_v21  ;;  %1761 = vmatpush.bf16.msra.mxu1 %v2906_v22  ;;  %vm4752_vm1 = vmmov %vm4747_vm5 }
 0xa8b   : > { %2674 = vmatmul.msk.bf16.vlgmr.msrb.gmra.mxu0 %vm4745_vm3, %v1731_v23  ;;  %2675 = vmatmul.msk.bf16.vlgmr.msra.gmra.mxu1 %vm4746_vm4, %v1731_v23  ;;  %vm4753_vm3 = vmmov %vm4749_vm7 }
 0xa8c   : > { %vm4754_vm4 = vmmov %vm4753_vm3 }
 0xaf8   : > { %v1532_v63 = vpop.f32.mrf.mxu0  ;;  %v1545_v41 = vpop.f32.mrf.mxu1 }
 0xaf9   : > { %v1533_v4 = vadd.f32 %v1532_v63, %v1512_v59  ;;  %v1546_v21 = vadd.f32 %v1545_v41, %v1512_v59 }
 0xafb   : > { %v3909_v37 = vmax.f32 %v1533_v4, 0.0  ;;  %v3911_v22 = vmax.f32 %v1546_v21, 0.0 }
 0xafd   : > { %1609 = vrot.lane.b32.xlu0 %v3911_v22, %s2800_s17  ;;  %1591 = vrot.lane.b32.xlu1 %v3909_v37, %s2799_s16 }
 0xafe   : > { %1607 = vrot.lane.b32.xlu2 %v3909_v37, %s2800_s17 }
 0xb00   : > { %v1534_v38 = vpop.f32.mrf.mxu0  ;;  %v1547_v8 = vpop.f32.mrf.mxu1 }
 0xb05   : > { %1599 = vrot.lane.b32.xlu0 %v3909_v37, %s2798_s15  ;;  %1601 = vrot.lane.b32.xlu1 %v3911_v22, %s2798_s15 }
 0xb06   : > { %1593 = vrot.lane.b32.xlu2 %v3911_v22, %s2799_s16 }
 0xb08   : > { %v1750_v9 = vpop.f32.mrf.mxu0  ;;  %v1763_v31 = vpop.f32.mrf.mxu1 }
 0xb09   : > { %v3943_v42 = vadd.f32 %v1763_v31, %v1736_v39  ;;  %v3945_v45 = vadd.f32 %v1750_v9, %v1736_v39 }
 0xb0d   : > { %1585 = vrot.lane.b32.xlu0 %v3911_v22, %s2801_s18  ;;  %1567 = vrot.lane.b32.xlu1 %v3909_v37, %s2802_s23 }
 0xb0e   : > { %1583 = vrot.lane.b32.xlu2 %v3909_v37, %s2801_s18 }
 0xb10   : > { %v1765_v29 = vpop.f32.mrf.mxu1  ;;  %v1752_v34 = vpop.f32.mrf.mxu0 }
 0xb15   : > { %1575 = vrot.lane.b32.xlu0 %v3909_v37, %s2803_s24  ;;  %1577 = vrot.lane.b32.xlu1 %v3911_v22, %s2803_s24 }
 0xb16   : > { %1569 = vrot.lane.b32.xlu2 %v3911_v22, %s2802_s23 }
 0xb1d   : > { %1559 = vrot.lane.b32.xlu0 %v3909_v37, %s2805_s27  ;;  %1551 = vrot.lane.b32.xlu1 %v3909_v37, %s2804_s26 }
 0xb1e   : > { %1553 = vrot.lane.b32.xlu2 %v3911_v22, %s2804_s26 }
 0xb25   : > { %1825 = vrot.lane.b32.xlu0 %v3943_v42, %s2800_s17  ;;  %1561 = vrot.lane.b32.xlu1 %v3911_v22, %s2805_s27 }
 0xb26   : > { %1823 = vrot.lane.b32.xlu2 %v3945_v45, %s2800_s17 }
 0xb2d   : > { %1809 = vrot.lane.b32.xlu0 %v3943_v42, %s2799_s16  ;;  %1815 = vrot.lane.b32.xlu1 %v3945_v45, %s2798_s15 }
 0xb2e   : > { %1807 = vrot.lane.b32.xlu2 %v3945_v45, %s2799_s16 }
 0xb35   : > { %1799 = vrot.lane.b32.xlu0 %v3945_v45, %s2801_s18  ;;  %1801 = vrot.lane.b32.xlu1 %v3943_v42, %s2801_s18 }
 0xb36   : > { %1817 = vrot.lane.b32.xlu2 %v3943_v42, %s2798_s15 }
 0xb3d   : > { %1785 = vrot.lane.b32.xlu0 %v3943_v42, %s2802_s23  ;;  %1791 = vrot.lane.b32.xlu1 %v3945_v45, %s2803_s24 }
 0xb3e   : > { %1783 = vrot.lane.b32.xlu2 %v3945_v45, %s2802_s23 }
 0xb45   : > { %1767 = vrot.lane.b32.xlu0 %v3945_v45, %s2804_s26  ;;  %1769 = vrot.lane.b32.xlu1 %v3943_v42, %s2804_s26 }
 0xb46   : > { %1793 = vrot.lane.b32.xlu2 %v3943_v42, %s2803_s24 }
 0xb4d   : > { %1777 = vrot.lane.b32.xlu0 %v3943_v42, %s2805_s27  ;;  %1846 = vperm.xlu1 %2724, %v1843_v26  }
 0xb4e   : > { %1775 = vrot.lane.b32.xlu2 %v3945_v45, %s2805_s27 }
 0xb58   : > { %v1608_v30 = vpop.permute.xlu2 %1607 }
 0xb60   : > { %v1594_v44 = vpop.permute.xlu2 %1593 }
 0xb68   : > { %v1584_v35 = vpop.permute.xlu2 %1583 }
 0xb6f   : > { %v1610_v48 = vpop.permute.xlu0 %1609  ;;  %v1592_v52 = vpop.permute.xlu1 %1591 }
 0xb70   : > { %v1611_v17 = vsel %vm407_vm10, %v1608_v30, %v1610_v48  ;;  %v1612_v18 = vsel %vm407_vm10, %v1610_v48, %v1608_v30  ;;  %v1570_v20 = vpop.permute.xlu2 %1569  ;;  %v1595_v41 = vsel %vm385_vm12, %v1592_v52, %v1594_v44  ;;  %v1596_v4 = vsel %vm385_vm12, %v1594_v44, %v1592_v52 }
 0xb71   : > { %v1613_v56 = vmul.f32 %v3560_v24, %v1611_v17  ;;  %v1614_v57 = vmul.f32 %v3566_v28, %v1612_v18  ;;  %v1597_v31 = vmul.f32 %v3582_v40, %v1595_v41  ;;  %v1598_v29 = vmul.f32 %v3588_v47, %v1596_v4 }
 0xb73   : > { %v1625_v6 = vpack.c.bf16 %v1613_v56, %v1613_v56  ;;  %v1626_v23 = vpack.c.bf16 %v1614_v57, %v1614_v57 }
 0xb75   : > { %v1637_v59 = vsel %vm291_vm0, %v1625_v6, 0  ;;  %v1640_v63 = vsel %vm291_vm0, %v1626_v23, 0 }
 0xb76   : > { %1645 = vmatpush.bf16.msra.mxu2 %v1637_v59  ;;  %1658 = vmatpush.bf16.msrb.mxu3 %v1640_v63 }
 0xb77   : > { %v1600_v21 = vpop.permute.xlu0 %1599  ;;  %v1602_v38 = vpop.permute.xlu1 %1601 }
 0xb78   : > { %v1603_v8 = vsel %vm396_vm11, %v1600_v21, %v1602_v38  ;;  %v1604_v9 = vsel %vm396_vm11, %v1602_v38, %v1600_v21  ;;  %v1554_v44 = vpop.permute.xlu2 %1553 }
 0xb79   : > { %v1605_v34 = vmul.f32 %v3594_v61, %v1603_v8  ;;  %v1606_v39 = vmul.f32 %v3600_v36, %v1604_v9 }
 0xb7b   : > { %v1623_v26 = vpack.c.bf16 %v1605_v34, %v1597_v31  ;;  %v1624_v30 = vpack.c.bf16 %v1606_v39, %v1598_v29 }
 0xb7d   : > { %1646 = vmatpush.bf16.msra.mxu2 %v1623_v26  ;;  %1659 = vmatpush.bf16.msrb.mxu3 %v1624_v30 }
 0xb7f   : > { %v1586_v48 = vpop.permute.xlu0 %1585  ;;  %v1568_v52 = vpop.permute.xlu1 %1567 }
 0xb80   : > { %v1587_v17 = vsel %vm374_vm13, %v1584_v35, %v1586_v48  ;;  %v1588_v18 = vsel %vm374_vm13, %v1586_v48, %v1584_v35  ;;  %v1571_v59 = vsel %vm352_vm14, %v1568_v52, %v1570_v20  ;;  %v1572_v63 = vsel %vm352_vm14, %v1570_v20, %v1568_v52  ;;  %v1824_v41 = vpop.permute.xlu2 %1823 }
 0xb81   : > { %v1589_v56 = vmul.f32 %v3610_v55, %v1587_v17  ;;  %v1590_v57 = vmul.f32 %v3616_v5, %v1588_v18 }
 0xb83   : > { %v1621_v6 = vpack.c.bf16 %v1589_v56, %v3909_v37  ;;  %v1622_v23 = vpack.c.bf16 %v1590_v57, %v3911_v22  ;;  %v1573_v37 = vmul.f32 %v3632_v58, %v1572_v63  ;;  %v1574_v22 = vmul.f32 %v3638_v15, %v1571_v59 }
 0xb85   : > { %1647 = vmatpush.bf16.msra.mxu2 %v1621_v6  ;;  %1660 = vmatpush.bf16.msrb.mxu3 %v1622_v23 }
 0xb87   : > { %v1576_v4 = vpop.permute.xlu0 %1575  ;;  %v1578_v21 = vpop.permute.xlu1 %1577 }
 0xb88   : > { %v1579_v35 = vsel %vm363_vm15, %v1576_v4, %v1578_v21  ;;  %v1580_v38 = vsel %vm363_vm15, %v1578_v21, %v1576_v4  ;;  %v1808_v39 = vpop.permute.xlu2 %1807  ;;  %v1615_v21 = vld [vmem:[%s4730_s2 + $0xe0] sm:$0xff] }
 0xb89   : > { %v1581_v8 = vmul.f32 %v3644_v25, %v1580_v38  ;;  %v1582_v9 = vmul.f32 %v3650_v60, %v1579_v35 }
 0xb8b   : > { %v1619_v31 = vpack.c.bf16 %v1581_v8, %v1573_v37  ;;  %v1620_v29 = vpack.c.bf16 %v1582_v9, %v1574_v22  ;;  %v1616_v8 = vpack.c.bf16 %v1615_v21, %v1615_v21 }
 0xb8d   : > { %1648 = vmatpush.bf16.msra.mxu2 %v1619_v31  ;;  %1661 = vmatpush.bf16.msrb.mxu3 %v1620_v29 }
 0xb8f   : > { %v1560_v20 = vpop.permute.xlu0 %1559  ;;  %v1552_v34 = vpop.permute.xlu1 %1551 }
 0xb90   : > { %v1555_v26 = vsel %vm330_vm2, %v1552_v34, %v1554_v44  ;;  %v1556_v30 = vsel %vm330_vm2, %v1554_v44, %v1552_v34  ;;  %v1818_v35 = vpop.permute.xlu2 %1817 }
 0xb91   : > { %v1557_v48 = vmul.f32 %v3676_v62, %v1556_v30  ;;  %v1558_v52 = vmul.f32 %v3682_v49, %v1555_v26 }
 0xb97   : > { %v1826_v17 = vpop.permute.xlu0 %1825  ;;  %v1562_v18 = vpop.permute.xlu1 %1561 }
 0xb98   : > { %v1827_v56 = vsel %vm407_vm10, %v1824_v41, %v1826_v17  ;;  %v1828_v57 = vsel %vm407_vm10, %v1826_v17, %v1824_v41  ;;  %v1563_v6 = vsel %vm4747_vm5, %v1560_v20, %v1562_v18  ;;  %v1564_v23 = vsel %vm4748_vm6, %v1562_v18, %v1560_v20  ;;  %vm4755_vm5 = vmmov %vm4752_vm1 }
 0xb99   : > { %v1829_v44 = vmul.f32 %v3560_v24, %v1827_v56  ;;  %v1830_v59 = vmul.f32 %v3566_v28, %v1828_v57  ;;  %v1565_v63 = vmul.f32 %v3660_v43, %v1564_v23  ;;  %v1566_v4 = vmul.f32 %v3666_v32, %v1563_v6  ;;  %v1784_v56 = vpop.permute.xlu2 %1783  ;;  %vm4756_vm6 = vmmov %vm4752_vm1 }
 0xb9b   : > { %v1841_v41 = vpack.c.bf16 %v1829_v44, %v1829_v44  ;;  %v1842_v38 = vpack.c.bf16 %v1830_v59, %v1830_v59  ;;  %v1617_v37 = vpack.c.bf16 %v1565_v63, %v1557_v48  ;;  %v1618_v22 = vpack.c.bf16 %v1566_v4, %v1558_v52 }
 0xb9d   : > { %1649 = vmatpush.bf16.msra.mxu2 %v1617_v37  ;;  %1662 = vmatpush.bf16.msrb.mxu3 %v1618_v22  ;;  %v1853_v24 = vsel %vm291_vm0, %v1841_v41, 0  ;;  %v1856_v28 = vsel %vm291_vm0, %v1842_v38, 0 }
 0xb9f   : > { %v1810_v9 = vpop.permute.xlu0 %1809  ;;  %v1816_v31 = vpop.permute.xlu1 %1815 }
 0xba0   : > { %v1811_v29 = vsel %vm385_vm12, %v1808_v39, %v1810_v9  ;;  %v1812_v20 = vsel %vm385_vm12, %v1810_v9, %v1808_v39  ;;  %v1819_v34 = vsel %vm396_vm11, %v1816_v31, %v1818_v35  ;;  %v1820_v26 = vsel %vm396_vm11, %v1818_v35, %v1816_v31  ;;  %2670 = vmatmul.msk.bf16.vlgmr.msra.gmra.mxu2 %vm4749_vm7, %v1616_v8  ;;  %vm4757_vm7 = vmmov %vm4753_vm3 }
 0xba1   : > { %1861 = vmatpush.bf16.msrb.mxu2 %v1853_v24  ;;  %1874 = vmatpush.bf16.msra.mxu3 %v1856_v28  ;;  %v1813_v30 = vmul.f32 %v3582_v40, %v1811_v29  ;;  %v1814_v48 = vmul.f32 %v3588_v47, %v1812_v20  ;;  %v1821_v52 = vmul.f32 %v3594_v61, %v1819_v34  ;;  %v1794_v59 = vpop.permute.xlu2 %1793 }
 0xba2   : > { %v1822_v17 = vmul.f32 %v3600_v36, %v1820_v26  ;;  %2671 = vmatmul.msk.bf16.vlgmr.msrb.gmra.mxu3 %vm4750_vm8, %v1616_v8  ;;  %v1831_v26 = vld [vmem:[%s4730_s2 + $0x100] sm:$0xff]  ;;  %vm4758_vm8 = vmmov %vm4753_vm3 }
 0xba3   : > { %v1839_v18 = vpack.c.bf16 %v1821_v52, %v1813_v30  ;;  %v1832_v52 = vpack.c.bf16 %v1831_v26, %v1831_v26 }
 0xba4   : > { %v1840_v39 = vpack.c.bf16 %v1822_v17, %v1814_v48 }
 0xba5   : > { %1862 = vmatpush.bf16.msrb.mxu2 %v1839_v18 }
 0xba6   : > { %1875 = vmatpush.bf16.msra.mxu3 %v1840_v39 }
 0xba7   : > { %v1800_v57 = vpop.permute.xlu0 %1799  ;;  %v1802_v6 = vpop.permute.xlu1 %1801 }
 0xba8   : > { %v1803_v23 = vsel %vm374_vm13, %v1800_v57, %v1802_v6  ;;  %v1804_v40 = vsel %vm374_vm13, %v1802_v6, %v1800_v57 }
 0xba9   : > { %v1805_v47 = vmul.f32 %v3610_v55, %v1803_v23  ;;  %v1806_v61 = vmul.f32 %v3616_v5, %v1804_v40  ;;  %v1776_v31 = vpop.permute.xlu2 %1775  ;;  %v1960_v40 = vld [vmem:[%s4731_s3 + $0x88] sm:$0xff] }
 0xbab   : > { %v1837_v36 = vpack.c.bf16 %v1805_v47, %v3945_v45  ;;  %v1838_v44 = vpack.c.bf16 %v1806_v61, %v3943_v42  ;;  %v2005_v47 = vld [vmem:[%s4731_s3 + $0xa8] sm:$0xff]  ;;  %v2013_v61 = vld [vmem:[%s4731_s3 + $0xb0] sm:$0xff] }
 0xbad   : > { %1863 = vmatpush.bf16.msrb.mxu2 %v1837_v36  ;;  %1876 = vmatpush.bf16.msra.mxu3 %v1838_v44 }
 0xbaf   : > { %v1786_v63 = vpop.permute.xlu0 %1785  ;;  %v1792_v4 = vpop.permute.xlu1 %1791 }
 0xbb0   : > { %v1787_v21 = vsel %vm352_vm14, %v1784_v56, %v1786_v63  ;;  %v1788_v35 = vsel %vm352_vm14, %v1786_v63, %v1784_v56  ;;  %v1795_v55 = vsel %vm363_vm15, %v1792_v4, %v1794_v59  ;;  %v1796_v5 = vsel %vm363_vm15, %v1794_v59, %v1792_v4 }
 0xbb1   : > { %v1789_v45 = vmul.f32 %v3632_v58, %v1788_v35  ;;  %v1790_v42 = vmul.f32 %v3638_v15, %v1787_v21  ;;  %v1797_v41 = vmul.f32 %v3644_v25, %v1796_v5  ;;  %v1798_v38 = vmul.f32 %v3650_v60, %v1795_v55  ;;  %v4180_v55 = vld [vmem:[%s4729_s1 + $0x80] sm:$0xff] }
 0xbb3   : > { %v1835_v37 = vpack.c.bf16 %v1797_v41, %v1789_v45  ;;  %v1836_v22 = vpack.c.bf16 %v1798_v38, %v1790_v42  ;;  %v4186_v45 = vld [vmem:[%s4729_s1 + $0x88] sm:$0xff] }
 0xbb5   : > { %1864 = vmatpush.bf16.msrb.mxu2 %v1835_v37  ;;  %1877 = vmatpush.bf16.msra.mxu3 %v1836_v22 }
 0xbb7   : > { %v1768_v8 = vpop.permute.xlu0 %1767  ;;  %v1770_v24 = vpop.permute.xlu1 %1769 }
 0xbb8   : > { %v1771_v28 = vsel %vm330_vm2, %v1768_v8, %v1770_v24  ;;  %v1772_v9 = vsel %vm330_vm2, %v1770_v24, %v1768_v8 }
 0xbb9   : > { %v1773_v60 = vmul.f32 %v3676_v62, %v1772_v9  ;;  %v1774_v29 = vmul.f32 %v3682_v49, %v1771_v28 }
 0xbbf   : > { %v1778_v58 = vpop.permute.xlu0 %1777 }
 0xbc0   : > { %v1779_v15 = vsel %vm4751_vm9, %v1776_v31, %v1778_v58  ;;  %v1780_v25 = vsel %vm4752_vm1, %v1778_v58, %v1776_v31  ;;  %vm4759_vm9 = vmmov %vm4752_vm1 }
 0xbc1   : > { %v1781_v20 = vmul.f32 %v3660_v43, %v1780_v25  ;;  %v1782_v34 = vmul.f32 %v3666_v32, %v1779_v15  ;;  %v1847_v32 = vpop.permute.xlu1 %1846  ;;  %v4202_v25 = vld [vmem:[%s4729_s1 + $0x60] sm:$0xff] }
 0xbc3   : > { %v1833_v30 = vpack.c.bf16 %v1781_v20, %v1773_v60  ;;  %v1834_v48 = vpack.c.bf16 %v1782_v34, %v1774_v29  ;;  %v4208_v29 = vld [vmem:[%s4729_s1 + $0x68] sm:$0xff]  ;;  %v4214_v34 = vld [vmem:[%s4729_s1 + $0x70] sm:$0xff] }
 0xbc5   : > { %1865 = vmatpush.bf16.msrb.mxu2 %v1833_v30  ;;  %1878 = vmatpush.bf16.msra.mxu3 %v1834_v48  ;;  %v4220_v30 = vld [vmem:[%s4729_s1 + $0x78] sm:$0xff] }
 0xbc8   : > { %2676 = vmatmul.msk.bf16.vlgmr.msrb.gmra.mxu2 %vm4753_vm3, %v1832_v52  ;;  %2677 = vmatmul.msk.bf16.vlgmr.msra.gmra.mxu3 %vm4754_vm4, %v1832_v52  ;;  %vm4760_vm3 = vmmov %vm4752_vm1 }
 0xbc9   : > { %vm4761_vm4 = vmmov %vm4752_vm1 }
 0xc23   : > { %v4098_v62 = vpop.f32.mrf.mxu2 }
 0xc25   : > { %v4100_v49 = vpop.f32.mrf.mxu3 }
 0xc2b   : > { %v1653_v43 = vpop.f32.mrf.mxu2 }
 0xc2d   : > { %v1666_v17 = vpop.f32.mrf.mxu3 }
 0xc4b   : > { %v1867_v18 = vpop.f32.mrf.mxu2  ;;  %v1880_v39 = vpop.f32.mrf.mxu3 }
 0xc4c   : > { %v4102_v56 = vadd.f32 %v1867_v18, %v1847_v32  ;;  %v4104_v57 = vadd.f32 %v1880_v39, %v1847_v32 }
 0xc4e   : > { %1924 = vrot.lane.b32.xlu1 %v4102_v56, %s2799_s16  ;;  %1940 = vrot.lane.b32.xlu2 %v4102_v56, %s2800_s17 }
 0xc4f   : > { %1942 = vrot.lane.b32.xlu0 %v4104_v57, %s2800_s17 }
 0xc53   : > { %v1869_v6 = vpop.f32.mrf.mxu2  ;;  %v1882_v23 = vpop.f32.mrf.mxu3 }
 0xc54   : > { %v4230_v23 = vld [vmem:[%s4729_s1 + $0x50] sm:$0xff] }
 0xc56   : > { %1934 = vrot.lane.b32.xlu1 %v4104_v57, %s2798_s15  ;;  %1926 = vrot.lane.b32.xlu2 %v4104_v57, %s2799_s16 }
 0xc57   : > { %1932 = vrot.lane.b32.xlu0 %v4102_v56, %s2798_s15 }
 0xc5e   : > { %1900 = vrot.lane.b32.xlu1 %v4102_v56, %s2802_s23  ;;  %1916 = vrot.lane.b32.xlu2 %v4102_v56, %s2801_s18 }
 0xc5f   : > { %1918 = vrot.lane.b32.xlu0 %v4104_v57, %s2801_s18 }
 0xc66   : > { %1910 = vrot.lane.b32.xlu1 %v4104_v57, %s2803_s24  ;;  %1902 = vrot.lane.b32.xlu2 %v4104_v57, %s2802_s23 }
 0xc67   : > { %1908 = vrot.lane.b32.xlu0 %v4102_v56, %s2803_s24 }
 0xc6e   : > { %1892 = vrot.lane.b32.xlu1 %v4102_v56, %s2805_s27  ;;  %1884 = vrot.lane.b32.xlu2 %v4102_v56, %s2804_s26 }
 0xc6f   : > { %1886 = vrot.lane.b32.xlu0 %v4104_v57, %s2804_s26 }
 0xc76   : > { %1963 = vperm.xlu1 %2724, %v1960_v40   ;;  %1894 = vrot.lane.b32.xlu2 %v4104_v57, %s2805_s27 }
 0xc77   : > { %2008 = vperm.xlu0 %2722, %v2005_v47   ;;  %v4236_v47 = vld [vmem:[%s4729_s1 + $0x58] sm:$0xff] }
 0xc7e   : > { %2016 = vperm.xlu2 %2723, %v2013_v61   ;;  %2105 = vrot.lane.b32.xlu1 %v2916_v54, %s2801_s18 }
 0xc7f   : > { %2103 = vrot.lane.b32.xlu0 %v2913_v53, %s2801_s18 }
 0xc86   : > { %2095 = vrot.lane.b32.xlu1 %v2913_v53, %s2803_s24  ;;  %2111 = vrot.lane.b32.xlu2 %v2913_v53, %s2799_s16 }
 0xc87   : > { %2113 = vrot.lane.b32.xlu0 %v2916_v54, %s2799_s16 }
 0xc8e   : > { %2081 = vrot.lane.b32.xlu1 %v2916_v54, %s2805_s27  ;;  %2097 = vrot.lane.b32.xlu2 %v2916_v54, %s2803_s24 }
 0xc8f   : > { %2079 = vrot.lane.b32.xlu0 %v2913_v53, %s2805_s27 }
 0xc96   : > { %2073 = vrot.lane.b32.xlu1 %v2916_v54, %s2804_s26  ;;  %2087 = vrot.lane.b32.xlu2 %v2913_v53, %s2802_s23 }
 0xc97   : > { %2089 = vrot.lane.b32.xlu0 %v2916_v54, %s2802_s23 }
 0xc9e   : > { %2119 = vrot.lane.b32.xlu1 %v2913_v53, %s2798_s15 }
 0xc9f   : > { %2071 = vrot.lane.b32.xlu0 %v2913_v53, %s2804_s26 }
 0xca8   : > { %v1941_v36 = vpop.permute.xlu2 %1940 }
 0xcb0   : > { %v1927_v44 = vpop.permute.xlu2 %1926 }
 0xcb8   : > { %v1917_v59 = vpop.permute.xlu2 %1916 }
 0xcc0   : > { %v1925_v63 = vpop.permute.xlu1 %1924  ;;  %v1903_v28 = vpop.permute.xlu2 %1902 }
 0xcc1   : > { %v1943_v4 = vpop.permute.xlu0 %1942  ;;  %v1928_v8 = vsel %vm385_vm12, %v1925_v63, %v1927_v44  ;;  %v1929_v24 = vsel %vm385_vm12, %v1927_v44, %v1925_v63 }
 0xcc2   : > { %v1944_v21 = vsel %vm407_vm10, %v1941_v36, %v1943_v4  ;;  %v1945_v35 = vsel %vm407_vm10, %v1943_v4, %v1941_v36  ;;  %v1930_v60 = vmul.f32 %v4202_v25, %v1928_v8  ;;  %v1931_v20 = vmul.f32 %v4208_v29, %v1929_v24 }
 0xcc3   : > { %v1946_v5 = vmul.f32 %v4180_v55, %v1944_v21  ;;  %v1947_v42 = vmul.f32 %v4186_v45, %v1945_v35 }
 0xcc5   : > { %v1958_v41 = vpack.c.bf16 %v1946_v5, %v1946_v5  ;;  %v1959_v38 = vpack.c.bf16 %v1947_v42, %v1947_v42  ;;  %v4258_v42 = vld [vmem:[%s4729_s1 + $0x28] sm:$0xff] }
 0xcc7   : > { %v1970_v37 = vsel %vm291_vm0, %v1958_v41, 0  ;;  %v1973_v22 = vsel %vm291_vm0, %v1959_v38, 0  ;;  %v4264_v38 = vld [vmem:[%s4729_s1 + $0x30] sm:$0xff] }
 0xcc8   : > { %1978 = vmatpush.bf16.msra.mxu0 %v1970_v37  ;;  %1991 = vmatpush.bf16.msrb.mxu1 %v1973_v22  ;;  %v1935_v9 = vpop.permute.xlu1 %1934  ;;  %v1885_v18 = vpop.permute.xlu2 %1884  ;;  %v4270_v22 = vld [vmem:[%s4729_s1 + $0x38] sm:$0xff] }
 0xcc9   : > { %v1933_v31 = vpop.permute.xlu0 %1932 }
 0xcca   : > { %v1936_v58 = vsel %vm396_vm11, %v1933_v31, %v1935_v9  ;;  %v1937_v15 = vsel %vm396_vm11, %v1935_v9, %v1933_v31 }
 0xccb   : > { %v1938_v26 = vmul.f32 %v4214_v34, %v1936_v58  ;;  %v1939_v48 = vmul.f32 %v4220_v30, %v1937_v15 }
 0xccd   : > { %v1956_v52 = vpack.c.bf16 %v1938_v26, %v1930_v60  ;;  %v1957_v43 = vpack.c.bf16 %v1939_v48, %v1931_v20  ;;  %v4280_v20 = vld [vmem:[%s4729_s1 + $0x10] sm:$0xff]  ;;  %v4286_v48 = vld [vmem:[%s4729_s1 + $0x18] sm:$0xff] }
 0xccf   : > { %1979 = vmatpush.bf16.msra.mxu0 %v1956_v52  ;;  %1992 = vmatpush.bf16.msrb.mxu1 %v1957_v43 }
 0xcd0   : > { %v1901_v17 = vpop.permute.xlu1 %1900  ;;  %v1895_v24 = vpop.permute.xlu2 %1894 }
 0xcd1   : > { %v1919_v32 = vpop.permute.xlu0 %1918  ;;  %v1905_v63 = vsel %vm352_vm14, %v1903_v28, %v1901_v17 }
 0xcd2   : > { %v1920_v39 = vsel %vm374_vm13, %v1917_v59, %v1919_v32  ;;  %v1921_v6 = vsel %vm374_vm13, %v1919_v32, %v1917_v59  ;;  %v1904_v59 = vsel %vm352_vm14, %v1901_v17, %v1903_v28  ;;  %v4296_v32 = vld [vmem:[%s4729_s1] sm:$0xff] }
 0xcd3   : > { %v1922_v40 = vmul.f32 %v4230_v23, %v1920_v39  ;;  %v1923_v61 = vmul.f32 %v4236_v47, %v1921_v6  ;;  %v1907_v41 = vmul.f32 %v4258_v42, %v1904_v59  ;;  %v4302_v6 = vld [vmem:[%s4729_s1 + $0x8] sm:$0xff]  ;;  %v2003_v59 = vand.u32 2147483647, %v2888_v14 }
 0xcd5   : > { %v1954_v36 = vpack.c.bf16 %v1922_v40, %v4102_v56  ;;  %v1955_v44 = vpack.c.bf16 %v1923_v61, %v4104_v57  ;;  %v4252_v56 = vld [vmem:[%s4729_s1 + $0x20] sm:$0xff]  ;;  %v1948_v61 = vld [vmem:[%s4730_s2 + $0x110] sm:$0xff] }
 0xcd6   : > { %v1906_v57 = vmul.f32 %v4252_v56, %v1905_v63  ;;  %v2004_v63 = vand.u32 2147483647, %v2893_v16 }
 0xcd7   : > { %1980 = vmatpush.bf16.msra.mxu0 %v1954_v36  ;;  %1993 = vmatpush.bf16.msrb.mxu1 %v1955_v44 }
 0xcd8   : > { %v1911_v4 = vpop.permute.xlu1 %1910  ;;  %v2017_v44 = vpop.permute.xlu2 %2016 }
 0xcd9   : > { %v1909_v21 = vpop.permute.xlu0 %1908 }
 0xcda   : > { %v1912_v35 = vsel %vm363_vm15, %v1909_v21, %v1911_v4  ;;  %v1913_v5 = vsel %vm363_vm15, %v1911_v4, %v1909_v21  ;;  %v1949_v4 = vpack.c.bf16 %v1948_v61, %v1948_v61 }
 0xcdb   : > { %v1914_v37 = vmul.f32 %v4264_v38, %v1913_v5  ;;  %v1915_v8 = vmul.f32 %v4270_v22, %v1912_v35 }
 0xcdd   : > { %v1952_v28 = vpack.c.bf16 %v1914_v37, %v1906_v57  ;;  %v1953_v9 = vpack.c.bf16 %v1915_v8, %v1907_v41 }
 0xcdf   : > { %1981 = vmatpush.bf16.msra.mxu0 %v1952_v28  ;;  %1994 = vmatpush.bf16.msrb.mxu1 %v1953_v9 }
 0xce0   : > { %v1893_v31 = vpop.permute.xlu1 %1892  ;;  %v2112_v8 = vpop.permute.xlu2 %2111 }
 0xce1   : > { %v1896_v58 = vsel %vm4755_vm5, %v1893_v31, %v1895_v24  ;;  %v1897_v15 = vsel %vm4756_vm6, %v1895_v24, %v1893_v31  ;;  %v1887_v60 = vpop.permute.xlu0 %1886  ;;  %vm2229_vm5 = vcmask 719872   ;;  %vm4762_vm6 = vmmov %vm4752_vm1 }
 0xce2   : > { %v1898_v26 = vmul.f32 %v4280_v20, %v1897_v15  ;;  %v1899_v52 = vmul.f32 %v4286_v48, %v1896_v58  ;;  %v1888_v43 = vsel %vm330_vm2, %v1885_v18, %v1887_v60  ;;  %v1889_v17 = vsel %vm330_vm2, %v1887_v60, %v1885_v18 }
 0xce3   : > { %v1890_v39 = vmul.f32 %v4296_v32, %v1889_v17  ;;  %v1891_v40 = vmul.f32 %v4302_v6, %v1888_v43 }
 0xce5   : > { %v1950_v36 = vpack.c.bf16 %v1898_v26, %v1890_v39  ;;  %v1951_v18 = vpack.c.bf16 %v1899_v52, %v1891_v40 }
 0xce7   : > { %1982 = vmatpush.bf16.msra.mxu0 %v1950_v36  ;;  %1995 = vmatpush.bf16.msrb.mxu1 %v1951_v18 }
 0xce8   : > { %v4310_v21 = vpop.permute.xlu1 %1963  ;;  %v2098_v31 = vpop.permute.xlu2 %2097 }
 0xce9   : > { %v2009_v35 = vpop.permute.xlu0 %2008 }
 0xcea   : > { %v2011_v5 = vmul.f32 %v2009_v35, %v2003_v59  ;;  %v2012_v57 = vmul.f32 %v2009_v35, %v2004_v63  ;;  %2678 = vmatmul.msk.bf16.vlgmr.msra.gmra.mxu0 %vm4757_vm7, %v1949_v4  ;;  %2679 = vmatmul.msk.bf16.vlgmr.msrb.gmra.mxu1 %vm4758_vm8, %v1949_v4  ;;  %vm4763_vm7 = vmmov %vm4752_vm1 }
 0xcec   : > { %v4314_v41 = vadd.f32 %v2017_v44, %v2011_v5  ;;  %v4316_v37 = vadd.f32 %v2017_v44, %v2012_v57 }
 0xcf0   : > { %v2106_v14 = vpop.permute.xlu1 %2105 }
 0xcf1   : > { %v2104_v24 = vpop.permute.xlu0 %2103 }
 0xcf2   : > { %v2107_v16 = vsel %vm374_vm13, %v2104_v24, %v2106_v14  ;;  %v2108_v28 = vsel %vm374_vm13, %v2106_v14, %v2104_v24 }
 0xcf3   : > { %v2109_v58 = vmul.f32 %v4230_v23, %v2107_v16  ;;  %v2110_v15 = vmul.f32 %v4236_v47, %v2108_v28 }
 0xcf8   : > { %v2096_v9 = vpop.permute.xlu1 %2095 }
 0xcf9   : > { %v2114_v60 = vpop.permute.xlu0 %2113  ;;  %v2099_v26 = vsel %vm363_vm15, %v2096_v9, %v2098_v31  ;;  %v2100_v52 = vsel %vm363_vm15, %v2098_v31, %v2096_v9 }
 0xcfa   : > { %v2115_v43 = vsel %vm385_vm12, %v2112_v8, %v2114_v60  ;;  %v2116_v17 = vsel %vm385_vm12, %v2114_v60, %v2112_v8  ;;  %v2101_v61 = vmul.f32 %v4264_v38, %v2100_v52  ;;  %v2102_v36 = vmul.f32 %v4270_v22, %v2099_v26  ;;  %v2088_v8 = vpop.permute.xlu2 %2087 }
 0xcfb   : > { %v2117_v39 = vmul.f32 %v4202_v25, %v2115_v43  ;;  %v2118_v40 = vmul.f32 %v4208_v29, %v2116_v17 }
 0xcfc   : > { %v2207_v59 = vpack.c.bf16 %v2913_v53, %v2101_v61  ;;  %v2208_v63 = vpack.c.bf16 %v2916_v54, %v2102_v36 }
 0xcfd   : > { %v2209_v18 = vpack.c.bf16 %v2117_v39, %v2109_v58  ;;  %v2210_v44 = vpack.c.bf16 %v2118_v40, %v2110_v15 }
 0xcff   : > { %2239 = vmatpush.bf16.msra.mxu2 %v2209_v18  ;;  %2265 = vmatpush.bf16.msrb.mxu0 %v2210_v44 }
 0xd00   : > { %v2082_v35 = vpop.permute.xlu1 %2081 }
 0xd01   : > { %v2080_v4 = vpop.permute.xlu0 %2079 }
 0xd02   : > { %v2083_v5 = vsel %vm4759_vm9, %v2080_v4, %v2082_v35  ;;  %v2084_v57 = vsel %vm4752_vm1, %v2082_v35, %v2080_v4  ;;  %vm4764_vm9 = vmmov %vm4758_vm8 }
 0xd03   : > { %2240 = vmatpush.bf16.msra.mxu2 %v2207_v59  ;;  %2266 = vmatpush.bf16.msrb.mxu0 %v2208_v63  ;;  %v2085_v14 = vmul.f32 %v4280_v20, %v2084_v57  ;;  %v2086_v24 = vmul.f32 %v4286_v48, %v2083_v5 }
 0xd08   : > { %v2074_v26 = vpop.permute.xlu1 %2073 }
 0xd09   : > { %v2090_v16 = vpop.permute.xlu0 %2089 }
 0xd0a   : > { %v2091_v28 = vsel %vm352_vm14, %v2088_v8, %v2090_v16  ;;  %v2092_v9 = vsel %vm352_vm14, %v2090_v16, %v2088_v8 }
 0xd0b   : > { %v2093_v31 = vmul.f32 %v4252_v56, %v2092_v9  ;;  %v2094_v58 = vmul.f32 %v4258_v42, %v2091_v28 }
 0xd0d   : > { %v2205_v15 = vpack.c.bf16 %v2093_v31, %v2085_v14  ;;  %v2206_v60 = vpack.c.bf16 %v2094_v58, %v2086_v24 }
 0xd0f   : > { %2241 = vmatpush.bf16.msra.mxu2 %v2205_v15  ;;  %2267 = vmatpush.bf16.msrb.mxu0 %v2206_v60 }
 0xd10   : > { %v4418_v4 = vpop.permute.xlu1 %2119 }
 0xd11   : > { %v2072_v52 = vpop.permute.xlu0 %2071 }
 0xd12   : > { %v2075_v43 = vsel %vm330_vm2, %v2072_v52, %v2074_v26  ;;  %v2076_v17 = vsel %vm330_vm2, %v2074_v26, %v2072_v52 }
 0xd13   : > { %v2077_v39 = vmul.f32 %v4296_v32, %v2076_v17  ;;  %v2078_v40 = vmul.f32 %v4302_v6, %v2075_v43 }
 0xd15   : > { %v2203_v61 = vpack.c.bf16 %v2077_v39, %v3721_v33  ;;  %v2204_v36 = vpack.c.bf16 %v2078_v40, %v3724_v46  ;;  %v2199_v33 = vld [vmem:[%s4730_s2 + $0x120] sm:$0xff] }
 0xd16   : > { %v2201_v46 = vpack.c.bf16 %v2199_v33, %v2199_v33 }
 0xd17   : > { %2242 = vmatpush.bf16.msra.mxu2 %v2203_v61  ;;  %2268 = vmatpush.bf16.msrb.mxu0 %v2204_v36 }
 0xd1b   : > { %2243 = vmatpush.bf16.msra.mxu2 %v3744_v1  ;;  %2269 = vmatpush.bf16.msrb.mxu0 %v3746_v2 }
 0xd1f   : > { %2244 = vmatpush.bf16.msra.mxu2 %v3756_v11  ;;  %2270 = vmatpush.bf16.msrb.mxu0 %v3758_v27 }
 0xd23   : > { %2245 = vmatpush.bf16.msra.mxu2 %v3774_v50  ;;  %2271 = vmatpush.bf16.msrb.mxu0 %v3776_v51  ;;  %v2021_v50 = vmax.f32 %v4314_v41, 0.0  ;;  %v2022_v51 = vmax.f32 %v4316_v37, 0.0  ;;  %v2223_v41 = vld [vmem:[%s4731_s3 + $0x90] sm:$0xff] }
 0xd27   : > { %2246 = vmatpush.bf16.msra.mxu2 %v3795_v19  ;;  %2272 = vmatpush.bf16.msrb.mxu0 %v3797_v13 }
 0xd2a   : > { %2247 = vmatmul.bf16.vlgmr.msra.gmra.mxu2 %v2201_v46  ;;  %2273 = vmatmul.bf16.vlgmr.msrb.gmra.mxu0 %v2201_v46 }
 0xd67   : > { %v1984_v1 = vpop.f32.mrf.mxu0  ;;  %v1997_v2 = vpop.f32.mrf.mxu1 }
 0xd68   : > { %v1985_v11 = vadd.f32 %v1984_v1, %v4310_v21  ;;  %v1998_v27 = vadd.f32 %v1997_v2, %v4310_v21 }
 0xd6a   : > { %v2001_v19 = vmax.f32 %v1985_v11, 0.0  ;;  %v2002_v18 = vmax.f32 %v1998_v27, 0.0 }
 0xd6c   : > { %v4373_v13 = vadd.f32 %v2021_v50, %v2001_v19  ;;  %v4375_v44 = vadd.f32 %v2022_v51, %v2002_v18 }
 0xd6e   : > { %2177 = vrot.lane.b32.xlu0 %v4375_v44, %s2799_s16  ;;  %2193 = vrot.lane.b32.xlu2 %v4375_v44, %s2800_s17 }
 0xd6f   : > { %2191 = vrot.lane.b32.xlu1 %v4373_v13, %s2800_s17  ;;  %v1986_v21 = vpop.f32.mrf.mxu0  ;;  %v1999_v59 = vpop.f32.mrf.mxu1 }
 0xd76   : > { %2167 = vrot.lane.b32.xlu0 %v4373_v13, %s2801_s18  ;;  %2175 = vrot.lane.b32.xlu2 %v4373_v13, %s2799_s16 }
 0xd77   : > { %2183 = vrot.lane.b32.xlu1 %v4373_v13, %s2798_s15 }
 0xd7e   : > { %2153 = vrot.lane.b32.xlu0 %v4375_v44, %s2802_s23  ;;  %2185 = vrot.lane.b32.xlu2 %v4375_v44, %s2798_s15 }
 0xd7f   : > { %2169 = vrot.lane.b32.xlu1 %v4375_v44, %s2801_s18 }
 0xd86   : > { %2135 = vrot.lane.b32.xlu0 %v4373_v13, %s2804_s26  ;;  %2151 = vrot.lane.b32.xlu2 %v4373_v13, %s2802_s23 }
 0xd87   : > { %2159 = vrot.lane.b32.xlu1 %v4373_v13, %s2803_s24 }
 0xd8e   : > { %2145 = vrot.lane.b32.xlu0 %v4375_v44, %s2805_s27  ;;  %2161 = vrot.lane.b32.xlu2 %v4375_v44, %s2803_s24 }
 0xd8f   : > { %2137 = vrot.lane.b32.xlu1 %v4375_v44, %s2804_s26 }
 0xd96   : > { %2127 = vrot.lane.b32.xlu0 %v2913_v53, %s2800_s17  ;;  %2143 = vrot.lane.b32.xlu2 %v4373_v13, %s2805_s27 }
 0xd97   : > { %2129 = vrot.lane.b32.xlu1 %v2916_v54, %s2800_s17 }
 0xd9e   : > { %2121 = vrot.lane.b32.xlu2 %v2916_v54, %s2798_s15 }
 0xda6   : > { %2226 = vperm.xlu2 %2723, %v2223_v41  }
 0xda7   : > { %v4426_v14 = vpop.f32.mrf.mxu0 }
 0xdad   : > { %v4420_v57 = vpop.f32.mrf.mxu2 }
 0xdaf   : > { %v2276_v61 = vpop.f32.mrf.mxu0 }
 0xdb5   : > { %v2250_v17 = vpop.f32.mrf.mxu2 }
 0xdc8   : > { %v2194_v37 = vpop.permute.xlu2 %2193 }
 0xdd0   : > { %v2176_v63 = vpop.permute.xlu2 %2175 }
 0xdd8   : > { %v2186_v35 = vpop.permute.xlu2 %2185 }
 0xde0   : > { %v2178_v53 = vpop.permute.xlu0 %2177  ;;  %v2152_v31 = vpop.permute.xlu2 %2151 }
 0xde1   : > { %v2192_v5 = vpop.permute.xlu1 %2191  ;;  %v2179_v60 = vsel %vm385_vm12, %v2176_v63, %v2178_v53  ;;  %v2180_v26 = vsel %vm385_vm12, %v2178_v53, %v2176_v63 }
 0xde2   : > { %v2195_v8 = vsel %vm407_vm10, %v2192_v5, %v2194_v37  ;;  %v2196_v54 = vsel %vm407_vm10, %v2194_v37, %v2192_v5  ;;  %v2181_v36 = vmul.f32 %v4202_v25, %v2179_v60  ;;  %v2182_v33 = vmul.f32 %v4208_v29, %v2180_v26 }
 0xde3   : > { %v2197_v24 = vmul.f32 %v4180_v55, %v2195_v8  ;;  %v2198_v16 = vmul.f32 %v4186_v45, %v2196_v54 }
 0xde5   : > { %v2221_v28 = vpack.c.bf16 %v2197_v24, %v2197_v24  ;;  %v2222_v9 = vpack.c.bf16 %v2198_v16, %v2198_v16 }
 0xde7   : > { %v2234_v58 = vsel %vm291_vm0, %v2221_v28, 0  ;;  %v2237_v15 = vsel %vm291_vm0, %v2222_v9, 0 }
 0xde8   : > { %2254 = vmatpush.bf16.msrb.mxu3 %v2234_v58  ;;  %2280 = vmatpush.bf16.msra.mxu1 %v2237_v15  ;;  %v2168_v52 = vpop.permute.xlu0 %2167  ;;  %v2162_v50 = vpop.permute.xlu2 %2161 }
 0xde9   : > { %v2184_v43 = vpop.permute.xlu1 %2183 }
 0xdea   : > { %v2187_v39 = vsel %vm396_vm11, %v2184_v43, %v2186_v35  ;;  %v2188_v40 = vsel %vm396_vm11, %v2186_v35, %v2184_v43 }
 0xdeb   : > { %v2189_v46 = vmul.f32 %v4214_v34, %v2187_v39  ;;  %v2190_v1 = vmul.f32 %v4220_v30, %v2188_v40 }
 0xded   : > { %v2219_v2 = vpack.c.bf16 %v2189_v46, %v2181_v36  ;;  %v2220_v11 = vpack.c.bf16 %v2190_v1, %v2182_v33 }
 0xdef   : > { %2255 = vmatpush.bf16.msrb.mxu3 %v2219_v2  ;;  %2281 = vmatpush.bf16.msra.mxu1 %v2220_v11 }
 0xdf0   : > { %v2154_v27 = vpop.permute.xlu0 %2153  ;;  %v2144_v24 = vpop.permute.xlu2 %2143 }
 0xdf1   : > { %v2170_v51 = vpop.permute.xlu1 %2169  ;;  %v2155_v63 = vsel %vm352_vm14, %v2152_v31, %v2154_v27  ;;  %v2156_v35 = vsel %vm352_vm14, %v2154_v27, %v2152_v31 }
 0xdf2   : > { %v2171_v19 = vsel %vm374_vm13, %v2168_v52, %v2170_v51  ;;  %v2172_v18 = vsel %vm374_vm13, %v2170_v51, %v2168_v52 }
 0xdf3   : > { %v2173_v21 = vmul.f32 %v4230_v23, %v2171_v19  ;;  %v2174_v59 = vmul.f32 %v4236_v47, %v2172_v18 }
 0xdf5   : > { %v2217_v41 = vpack.c.bf16 %v2173_v21, %v4373_v13  ;;  %v2218_v37 = vpack.c.bf16 %v2174_v59, %v4375_v44  ;;  %v2157_v13 = vmul.f32 %v4252_v56, %v2156_v35  ;;  %v2158_v44 = vmul.f32 %v4258_v42, %v2155_v63 }
 0xdf7   : > { %2256 = vmatpush.bf16.msrb.mxu3 %v2217_v41  ;;  %2282 = vmatpush.bf16.msra.mxu1 %v2218_v37 }
 0xdf8   : > { %v2136_v53 = vpop.permute.xlu0 %2135  ;;  %v2122_v36 = vpop.permute.xlu2 %2121 }
 0xdf9   : > { %v2160_v5 = vpop.permute.xlu1 %2159  ;;  %v2123_v1 = vsel %vm396_vm11, %v4418_v4, %v2122_v36  ;;  %v2124_v2 = vsel %vm396_vm11, %v2122_v36, %v4418_v4  ;;  %v2200_v4 = vld [vmem:[%s4730_s2 + $0x128] sm:$0xff] }
 0xdfa   : > { %v2163_v8 = vsel %vm363_vm15, %v2160_v5, %v2162_v50  ;;  %v2164_v54 = vsel %vm363_vm15, %v2162_v50, %v2160_v5  ;;  %v2125_v19 = vmul.f32 %v4214_v34, %v2123_v1  ;;  %v2126_v18 = vmul.f32 %v4220_v30, %v2124_v2 }
 0xdfb   : > { %v2165_v16 = vmul.f32 %v4264_v38, %v2164_v54  ;;  %v2166_v28 = vmul.f32 %v4270_v22, %v2163_v8  ;;  %v2202_v63 = vpack.c.bf16 %v2200_v4, %v2200_v4 }
 0xdfd   : > { %v2215_v9 = vpack.c.bf16 %v2165_v16, %v2157_v13  ;;  %v2216_v58 = vpack.c.bf16 %v2166_v28, %v2158_v44 }
 0xdff   : > { %2257 = vmatpush.bf16.msrb.mxu3 %v2215_v9  ;;  %2283 = vmatpush.bf16.msra.mxu1 %v2216_v58 }
 0xe00   : > { %v2146_v31 = vpop.permute.xlu0 %2145  ;;  %v2227_v35 = vpop.permute.xlu2 %2226 }
 0xe01   : > { %v2138_v15 = vpop.permute.xlu1 %2137  ;;  %v2147_v60 = vsel %vm4760_vm3, %v2144_v24, %v2146_v31  ;;  %v2148_v26 = vsel %vm4761_vm4, %v2146_v31, %v2144_v24  ;;  %v2249_v13 = vadd.f32 %v4420_v57, %v2227_v35  ;;  %v2367_v57 = vld [vmem:[%s4731_s3 + $0x98] sm:$0xff] }
 0xe02   : > { %v2139_v52 = vsel %vm330_vm2, %v2136_v53, %v2138_v15  ;;  %v2140_v43 = vsel %vm330_vm2, %v2138_v15, %v2136_v53  ;;  %v2149_v17 = vmul.f32 %v4280_v20, %v2148_v26  ;;  %v2150_v39 = vmul.f32 %v4286_v48, %v2147_v60 }
 0xe03   : > { %v2141_v40 = vmul.f32 %v4296_v32, %v2140_v43  ;;  %v2142_v61 = vmul.f32 %v4302_v6, %v2139_v52  ;;  %v2275_v53 = vadd.f32 %v4426_v14, %v2227_v35 }
 0xe05   : > { %v2213_v33 = vpack.c.bf16 %v2149_v17, %v2141_v40  ;;  %v2214_v46 = vpack.c.bf16 %v2150_v39, %v2142_v61 }
 0xe07   : > { %2258 = vmatpush.bf16.msrb.mxu3 %v2213_v33  ;;  %2284 = vmatpush.bf16.msra.mxu1 %v2214_v46 }
 0xe08   : > { %v2128_v11 = vpop.permute.xlu0 %2127 }
 0xe09   : > { %v2130_v27 = vpop.permute.xlu1 %2129 }
 0xe0a   : > { %v2131_v50 = vsel %vm407_vm10, %v2128_v11, %v2130_v27  ;;  %v2132_v51 = vsel %vm407_vm10, %v2130_v27, %v2128_v11 }
 0xe0b   : > { %v2133_v21 = vmul.f32 %v4180_v55, %v2131_v50  ;;  %v2134_v59 = vmul.f32 %v4186_v45, %v2132_v51 }
 0xe0d   : > { %v2211_v41 = vpack.c.bf16 %v2133_v21, %v2125_v19  ;;  %v2212_v37 = vpack.c.bf16 %v2134_v59, %v2126_v18 }
 0xe0f   : > { %2259 = vmatpush.bf16.msrb.mxu3 %v2211_v41  ;;  %2285 = vmatpush.bf16.msra.mxu1 %v2212_v37 }
 0xe12   : > { %2680 = vmatmul.msk.bf16.vlgmr.msrb.gmra.mxu3 %vm2229_vm5, %v2202_v63  ;;  %2681 = vmatmul.msk.bf16.vlgmr.msra.gmra.mxu1 %vm2229_vm5, %v2202_v63 }
 0xe8f   : > { %v2287_v5 = vpop.f32.mrf.mxu1 }
 0xe90   : > { %v4494_v8 = vadd.f32 %v2287_v5, %v2275_v53 }
 0xe92   : > { %2341 = vrot.lane.b32.xlu2 %v4494_v8, %s2798_s15  ;;  %2333 = vrot.lane.b32.xlu0 %v4494_v8, %s2799_s16 }
 0xe93   : > { %2349 = vrot.lane.b32.xlu1 %v4494_v8, %s2800_s17 }
 0xe95   : > { %v2261_v54 = vpop.f32.mrf.mxu3 }
 0xe96   : > { %v2262_v44 = vadd.f32 %v2261_v54, %v2249_v13 }
 0xe97   : > { %v2289_v24 = vpop.f32.mrf.mxu1 }
 0xe9a   : > { %2317 = vrot.lane.b32.xlu2 %v4494_v8, %s2803_s24  ;;  %2309 = vrot.lane.b32.xlu0 %v4494_v8, %s2802_s23 }
 0xe9b   : > { %2325 = vrot.lane.b32.xlu1 %v4494_v8, %s2801_s18 }
 0xe9d   : > { %v2263_v14 = vpop.f32.mrf.mxu3 }
 0xea2   : > { %2331 = vrot.lane.b32.xlu2 %v2262_v44, %s2799_s16  ;;  %2347 = vrot.lane.b32.xlu0 %v2262_v44, %s2800_s17 }
 0xea3   : > { %2339 = vrot.lane.b32.xlu1 %v2262_v44, %s2798_s15 }
 0xeaa   : > { %2307 = vrot.lane.b32.xlu2 %v2262_v44, %s2802_s23  ;;  %2323 = vrot.lane.b32.xlu0 %v2262_v44, %s2801_s18 }
 0xeab   : > { %2315 = vrot.lane.b32.xlu1 %v2262_v44, %s2803_s24 }
 0xeb2   : > { %2299 = vrot.lane.b32.xlu2 %v2262_v44, %s2805_s27  ;;  %2291 = vrot.lane.b32.xlu0 %v2262_v44, %s2804_s26 }
 0xeb3   : > { %2293 = vrot.lane.b32.xlu1 %v4494_v8, %s2804_s26 }
 0xeba   : > { %2301 = vrot.lane.b32.xlu0 %v4494_v8, %s2805_s27 }
 0xebb   : > { %2370 = vperm.xlu1 %2724, %v2367_v57  }
 0xeec   : > { %v2342_v16 = vpop.permute.xlu2 %2341 }
 0xef4   : > { %v2318_v58 = vpop.permute.xlu2 %2317 }
 0xefc   : > { %v2332_v26 = vpop.permute.xlu2 %2331 }
 0xf04   : > { %v2334_v28 = vpop.permute.xlu0 %2333  ;;  %v2308_v24 = vpop.permute.xlu2 %2307 }
 0xf05   : > { %v2350_v9 = vpop.permute.xlu1 %2349  ;;  %v2335_v33 = vsel %vm385_vm12, %v2332_v26, %v2334_v28  ;;  %v2336_v46 = vsel %vm385_vm12, %v2334_v28, %v2332_v26 }
 0xf06   : > { %v2337_v19 = vmul.f32 %v4202_v25, %v2335_v33  ;;  %v2338_v18 = vmul.f32 %v4208_v29, %v2336_v46 }
 0xf0c   : > { %v2310_v31 = vpop.permute.xlu0 %2309 }
 0xf0d   : > { %v2326_v15 = vpop.permute.xlu1 %2325  ;;  %v2311_v14 = vsel %vm352_vm14, %v2308_v24, %v2310_v31  ;;  %v2312_v13 = vsel %vm352_vm14, %v2310_v31, %v2308_v24  ;;  %v2300_v31 = vpop.permute.xlu2 %2299 }
 0xf14   : > { %v2348_v60 = vpop.permute.xlu0 %2347 }
 0xf15   : > { %v2340_v52 = vpop.permute.xlu1 %2339  ;;  %v2351_v43 = vsel %vm407_vm10, %v2348_v60, %v2350_v9  ;;  %v2352_v17 = vsel %vm407_vm10, %v2350_v9, %v2348_v60 }
 0xf16   : > { %v2343_v39 = vsel %vm396_vm11, %v2340_v52, %v2342_v16  ;;  %v2344_v40 = vsel %vm396_vm11, %v2342_v16, %v2340_v52  ;;  %v2353_v61 = vmul.f32 %v4180_v55, %v2351_v43  ;;  %v2354_v36 = vmul.f32 %v4186_v45, %v2352_v17 }
 0xf17   : > { %v2345_v11 = vmul.f32 %v4214_v34, %v2343_v39  ;;  %v2346_v27 = vmul.f32 %v4220_v30, %v2344_v40 }
 0xf18   : > { %v2365_v1 = vpack.c.bf16 %v2353_v61, %v2353_v61  ;;  %v2366_v2 = vpack.c.bf16 %v2354_v36, %v2354_v36 }
 0xf19   : > { %v2363_v37 = vpack.c.bf16 %v2345_v11, %v2337_v19  ;;  %v2364_v63 = vpack.c.bf16 %v2346_v27, %v2338_v18 }
 0xf1a   : > { %v2377_v50 = vsel %vm291_vm0, %v2365_v1, 0  ;;  %v2380_v51 = vsel %vm291_vm0, %v2366_v2, 0  ;;  %v2355_v1 = vld [vmem:[%s4730_s2 + $0x130] sm:$0xff] }
 0xf1b   : > { %2385 = vmatpush.bf16.msra.mxu3 %v2377_v50  ;;  %2398 = vmatpush.bf16.msrb.mxu1 %v2380_v51  ;;  %v2356_v27 = vpack.c.bf16 %v2355_v1, %v2355_v1 }
 0xf1c   : > { %v2324_v21 = vpop.permute.xlu0 %2323 }
 0xf1d   : > { %v2316_v59 = vpop.permute.xlu1 %2315  ;;  %v2327_v4 = vsel %vm374_vm13, %v2324_v21, %v2326_v15  ;;  %v2328_v41 = vsel %vm374_vm13, %v2326_v15, %v2324_v21  ;;  %v2314_v15 = vmul.f32 %v4258_v42, %v2311_v14 }
 0xf1e   : > { %v2319_v35 = vsel %vm363_vm15, %v2316_v59, %v2318_v58  ;;  %v2320_v53 = vsel %vm363_vm15, %v2318_v58, %v2316_v59  ;;  %v2329_v5 = vmul.f32 %v4230_v23, %v2327_v4  ;;  %v2330_v54 = vmul.f32 %v4236_v47, %v2328_v41 }
 0xf1f   : > { %2386 = vmatpush.bf16.msra.mxu3 %v2363_v37  ;;  %2399 = vmatpush.bf16.msrb.mxu1 %v2364_v63  ;;  %v2321_v28 = vmul.f32 %v4264_v38, %v2320_v53  ;;  %v2322_v9 = vmul.f32 %v4270_v22, %v2319_v35  ;;  %v2313_v58 = vmul.f32 %v4252_v56, %v2312_v13  ;;  %v1627_v63 = vld [vmem:[%s4731_s3 + $0x70] sm:$0xff] }
 0xf20   : > { %v2361_v57 = vpack.c.bf16 %v2329_v5, %v2262_v44  ;;  %v2362_v16 = vpack.c.bf16 %v2330_v54, %v4494_v8 }
 0xf21   : > { %v2359_v26 = vpack.c.bf16 %v2321_v28, %v2313_v58  ;;  %v2360_v52 = vpack.c.bf16 %v2322_v9, %v2314_v15 }
 0xf23   : > { %2387 = vmatpush.bf16.msra.mxu3 %v2361_v57  ;;  %2400 = vmatpush.bf16.msrb.mxu1 %v2362_v16 }
 0xf24   : > { %v2292_v60 = vpop.permute.xlu0 %2291 }
 0xf25   : > { %v2294_v43 = vpop.permute.xlu1 %2293 }
 0xf26   : > { %v2295_v44 = vsel %vm330_vm2, %v2292_v60, %v2294_v43  ;;  %v2296_v8 = vsel %vm330_vm2, %v2294_v43, %v2292_v60 }
 0xf27   : > { %2388 = vmatpush.bf16.msra.mxu3 %v2359_v26  ;;  %2401 = vmatpush.bf16.msrb.mxu1 %v2360_v52  ;;  %v2297_v61 = vmul.f32 %v4296_v32, %v2296_v8  ;;  %v2298_v36 = vmul.f32 %v4302_v6, %v2295_v44 }
 0xf2c   : > { %v2302_v17 = vpop.permute.xlu0 %2301 }
 0xf2d   : > { %v2303_v39 = vsel %vm4762_vm6, %v2300_v31, %v2302_v17  ;;  %v2304_v40 = vsel %vm4763_vm7, %v2302_v17, %v2300_v31  ;;  %v2371_v50 = vpop.permute.xlu1 %2370 }
 0xf2e   : > { %v2305_v33 = vmul.f32 %v4280_v20, %v2304_v40  ;;  %v2306_v46 = vmul.f32 %v4286_v48, %v2303_v39 }
 0xf30   : > { %v2357_v2 = vpack.c.bf16 %v2305_v33, %v2297_v61  ;;  %v2358_v11 = vpack.c.bf16 %v2306_v46, %v2298_v36 }
 0xf32   : > { %2389 = vmatpush.bf16.msra.mxu3 %v2357_v2  ;;  %2402 = vmatpush.bf16.msrb.mxu1 %v2358_v11 }
 0xf35   : > { %2682 = vmatmul.msk.bf16.vlgmr.msra.gmra.mxu3 %vm4758_vm8, %v2356_v27  ;;  %2683 = vmatmul.msk.bf16.vlgmr.msrb.gmra.mxu1 %vm4764_vm9, %v2356_v27 }
 0xfb2   : > { %v2404_v51 = vpop.f32.mrf.mxu1 }
 0xfb3   : > { %v2405_v19 = vadd.f32 %v2404_v51, %v2371_v50 }
 0xfb5   : > { %v4580_v18 = vmax.f32 %v2405_v19, 0.0 }
 0xfb7   : > { %2460 = vrot.lane.b32.xlu1 %v4580_v18, %s2798_s15  ;;  %2452 = vrot.lane.b32.xlu2 %v4580_v18, %s2799_s16 }
 0xfb8   : > { %2468 = vrot.lane.b32.xlu0 %v4580_v18, %s2800_s17  ;;  %v2391_v21 = vpop.f32.mrf.mxu3 }
 0xfb9   : > { %v2392_v41 = vadd.f32 %v2391_v21, %v2371_v50 }
 0xfba   : > { %v2406_v59 = vpop.f32.mrf.mxu1 }
 0xfbb   : > { %v2408_v37 = vmax.f32 %v2392_v41, 0.0 }
 0xfbf   : > { %2436 = vrot.lane.b32.xlu1 %v4580_v18, %s2803_s24  ;;  %2428 = vrot.lane.b32.xlu2 %v4580_v18, %s2802_s23 }
 0xfc0   : > { %2444 = vrot.lane.b32.xlu0 %v4580_v18, %s2801_s18  ;;  %v2393_v4 = vpop.f32.mrf.mxu3 }
 0xfc7   : > { %2450 = vrot.lane.b32.xlu1 %v2408_v37, %s2799_s16  ;;  %2466 = vrot.lane.b32.xlu2 %v2408_v37, %s2800_s17 }
 0xfc8   : > { %2458 = vrot.lane.b32.xlu0 %v2408_v37, %s2798_s15 }
 0xfcf   : > { %2426 = vrot.lane.b32.xlu1 %v2408_v37, %s2802_s23  ;;  %2442 = vrot.lane.b32.xlu2 %v2408_v37, %s2801_s18 }
 0xfd0   : > { %2434 = vrot.lane.b32.xlu0 %v2408_v37, %s2803_s24 }
 0xfd7   : > { %2418 = vrot.lane.b32.xlu1 %v2408_v37, %s2805_s27  ;;  %2410 = vrot.lane.b32.xlu2 %v2408_v37, %s2804_s26 }
 0xfd8   : > { %2412 = vrot.lane.b32.xlu0 %v4580_v18, %s2804_s26 }
 0xfdf   : > { %2420 = vrot.lane.b32.xlu2 %v4580_v18, %s2805_s27 }
 0xfe0   : > { %1630 = vperm.xlu0 %2722, %v1627_v63  }
0x1011   : > { %v2453_v35 = vpop.permute.xlu2 %2452 }
0x1019   : > { %v2429_v53 = vpop.permute.xlu2 %2428 }
0x1021   : > { %v2467_v54 = vpop.permute.xlu2 %2466 }
0x1029   : > { %v2461_v5 = vpop.permute.xlu1 %2460  ;;  %v2443_v52 = vpop.permute.xlu2 %2442 }
0x102a   : > { %v2469_v24 = vpop.permute.xlu0 %2468 }
0x102b   : > { %v2470_v14 = vsel %vm407_vm10, %v2467_v54, %v2469_v24  ;;  %v2471_v13 = vsel %vm407_vm10, %v2469_v24, %v2467_v54 }
0x102c   : > { %v2472_v57 = vmul.f32 %v4180_v55, %v2470_v14  ;;  %v2473_v16 = vmul.f32 %v4186_v45, %v2471_v13  ;;  %v2474_v14 = vld [vmem:[%s4730_s2 + $0x140] sm:$0xff] }
0x102e   : > { %v2484_v28 = vpack.c.bf16 %v2472_v57, %v2472_v57  ;;  %v2485_v9 = vpack.c.bf16 %v2473_v16, %v2473_v16  ;;  %v2475_v16 = vpack.c.bf16 %v2474_v14, %v2474_v14 }
0x1030   : > { %v2496_v58 = vsel %vm291_vm0, %v2484_v28, 0  ;;  %v2499_v15 = vsel %vm291_vm0, %v2485_v9, 0  ;;  %vm4765_vm0 = vmmov %vm4752_vm1 }
0x1031   : > { %2504 = vmatpush.bf16.msrb.mxu2 %v2496_v58  ;;  %2517 = vmatpush.bf16.msra.mxu0 %v2499_v15  ;;  %v2437_v60 = vpop.permute.xlu1 %2436  ;;  %v2411_v27 = vpop.permute.xlu2 %2410  ;;  %vm4766_vm10 = vmmov %vm4765_vm0  ;;  %v2672_v15 = vld [vmem:[%s4729_s1 + $0x90] ss:$8 sm:$0x3] }
0x1032   : > { %v2445_v26 = vpop.permute.xlu0 %2444 }
0x1033   : > { %v2446_v44 = vsel %vm374_vm13, %v2443_v52, %v2445_v26  ;;  %v2447_v55 = vsel %vm374_vm13, %v2445_v26, %v2443_v52 }
0x1034   : > { %v2448_v46 = vmul.f32 %v4230_v23, %v2446_v44  ;;  %v2449_v1 = vmul.f32 %v4236_v47, %v2447_v55 }
0x1039   : > { %v2451_v43 = vpop.permute.xlu1 %2450 }
0x103a   : > { %v2454_v45 = vsel %vm385_vm12, %v2451_v43, %v2453_v35  ;;  %v2455_v8 = vsel %vm385_vm12, %v2453_v35, %v2451_v43  ;;  %v2459_v31 = vpop.permute.xlu0 %2458  ;;  %vm4767_vm12 = vmmov %vm4758_vm8  ;;  %v1689_v43 = vsub.f32 1.0, %v2672_v15 }
0x103b   : > { %v2456_v17 = vmul.f32 %v4202_v25, %v2454_v45  ;;  %v2457_v39 = vmul.f32 %v4208_v29, %v2455_v8  ;;  %v2462_v40 = vsel %vm396_vm11, %v2459_v31, %v2461_v5  ;;  %v2463_v61 = vsel %vm396_vm11, %v2461_v5, %v2459_v31 }
0x103c   : > { %v2464_v36 = vmul.f32 %v4214_v34, %v2462_v40  ;;  %v2465_v33 = vmul.f32 %v4220_v30, %v2463_v61  ;;  %v2480_v34 = vpack.c.bf16 %v2448_v46, %v2408_v37  ;;  %v2481_v30 = vpack.c.bf16 %v2449_v1, %v4580_v18  ;;  %v2421_v18 = vpop.permute.xlu2 %2420 }
0x103e   : > { %v2482_v2 = vpack.c.bf16 %v2464_v36, %v2456_v17  ;;  %v2483_v11 = vpack.c.bf16 %v2465_v33, %v2457_v39 }
0x1040   : > { %2505 = vmatpush.bf16.msrb.mxu2 %v2482_v2  ;;  %2518 = vmatpush.bf16.msra.mxu0 %v2483_v11 }
0x1041   : > { %v2427_v25 = vpop.permute.xlu1 %2426 }
0x1042   : > { %v2430_v29 = vsel %vm352_vm14, %v2427_v25, %v2429_v53  ;;  %v2431_v50 = vsel %vm352_vm14, %v2429_v53, %v2427_v25  ;;  %v2435_v51 = vpop.permute.xlu0 %2434  ;;  %vm4768_vm14 = vmmov %vm4758_vm8 }
0x1043   : > { %v2432_v23 = vmul.f32 %v4252_v56, %v2431_v50  ;;  %v2433_v47 = vmul.f32 %v4258_v42, %v2430_v29  ;;  %v2438_v19 = vsel %vm363_vm15, %v2435_v51, %v2437_v60  ;;  %v2439_v21 = vsel %vm363_vm15, %v2437_v60, %v2435_v51 }
0x1044   : > { %v2440_v59 = vmul.f32 %v4264_v38, %v2439_v21  ;;  %v2441_v4 = vmul.f32 %v4270_v22, %v2438_v19  ;;  %2506 = vmatpush.bf16.msrb.mxu2 %v2480_v34  ;;  %2519 = vmatpush.bf16.msra.mxu0 %v2481_v30  ;;  %vm1685_vm15 = vcmask 1040384   ;;  %v1716_v19 = vsub.f32 1.0, %v2673_v7 }
0x1046   : > { %v2478_v41 = vpack.c.bf16 %v2440_v59, %v2432_v23  ;;  %v2479_v37 = vpack.c.bf16 %v2441_v4, %v2433_v47 }
0x1048   : > { %2507 = vmatpush.bf16.msrb.mxu2 %v2478_v41  ;;  %2520 = vmatpush.bf16.msra.mxu0 %v2479_v37 }
0x1049   : > { %v2419_v56 = vpop.permute.xlu1 %2418 }
0x104a   : > { %v2422_v42 = vsel %vm4765_vm0, %v2419_v56, %v2421_v18  ;;  %v2423_v63 = vsel %vm4766_vm10, %v2421_v18, %v2419_v56  ;;  %v2413_v35 = vpop.permute.xlu0 %2412 }
0x104b   : > { %v2424_v53 = vmul.f32 %v4280_v20, %v2423_v63  ;;  %v2425_v38 = vmul.f32 %v4286_v48, %v2422_v42  ;;  %v2414_v22 = vsel %vm330_vm2, %v2411_v27, %v2413_v35  ;;  %v2415_v5 = vsel %vm330_vm2, %v2413_v35, %v2411_v27 }
0x104c   : > { %v2416_v54 = vmul.f32 %v4296_v32, %v2415_v5  ;;  %v2417_v24 = vmul.f32 %v4302_v6, %v2414_v22  ;;  %v2486_v32 = vld [vmem:[%s4731_s3 + $0xa0] sm:$0xff] }
0x104e   : > { %v2476_v13 = vpack.c.bf16 %v2424_v53, %v2416_v54  ;;  %v2477_v57 = vpack.c.bf16 %v2425_v38, %v2417_v24 }
0x1050   : > { %2508 = vmatpush.bf16.msrb.mxu2 %v2476_v13  ;;  %2521 = vmatpush.bf16.msra.mxu0 %v2477_v57 }
0x1052   : > { %v1631_v20 = vpop.permute.xlu0 %1630 }
0x1053   : > { %v1652_v48 = vadd.f32 %v4098_v62, %v1631_v20  ;;  %v1665_v28 = vadd.f32 %v4100_v49, %v1631_v20  ;;  %2684 = vmatmul.msk.bf16.vlgmr.msrb.gmra.mxu2 %vm4767_vm12, %v2475_v16  ;;  %2685 = vmatmul.msk.bf16.vlgmr.msra.gmra.mxu0 %vm4768_vm14, %v2475_v16 }
0x1055   : > { %1674 = vrot.lane.b32.xlu2 %v1665_v28, %s2798_s15  ;;  %1672 = vrot.lane.b32.xlu1 %v1652_v48, %s2798_s15  ;;  %v1692_v58 = vrot.slane %v1665_v28, 7  ;;  %s2638_s15 = sshll.u32 %s2629_s21, 1 }
0x1056   : > { %p254_p8 = scmp.lt.s32.totalorder %s2638_s15, 3 }
0x1057   : > { %v1693_v44 = vsel %vm1685_vm15, %v1652_v48, %v1692_v58 }
0x1058   : > { %v1695_v39 = vmul.f32 %v1693_v44, %v1689_v43  ;;  %s4775_s15 = smov (!%p254_p8, %s2638_s15), 3 }
0x1059   : > { %s256_s13 = scalar_lea.vmem %s4732_s4, %s4775_s15  ;;  %s261_s30 = scalar_lea.vmem %s4733_s5, %s4775_s15 }
0x105d   : > { %2489 = vperm.xlu2 %2723, %v2486_v32  }
0x10af   : > { %v1675_v6 = vpop.permute.xlu2 %1674 }
0x10b7   : > { %v2490_v31 = vpop.permute.xlu2 %2489 }
0x10c7   : > { %v1673_v9 = vpop.permute.xlu1 %1672 }
0x10c8   : > { %v1676_v62 = vsel %vm396_vm11, %v1673_v9, %v1675_v6  ;;  %v1677_v49 = vsel %vm396_vm11, %v1675_v6, %v1673_v9  ;;  %vm4696_vm11 = vcmp.lt.s32.totalorder %v328_v0, 256 }
0x10c9   : > { %v1678_v60 = vsub.f32 %v1652_v48, %v1676_v62  ;;  %v1679_v26 = vsub.f32 %v1665_v28, %v1677_v49 }
0x10cb   : > { %v1681_v52 = vand.u32 2147483647, %v1679_v26  ;;  %v1680_v55 = vand.u32 2147483647, %v1678_v60 }
0x10cd   : > { %v1684_v45 = vrot.slane %v1681_v52, 7 }
0x10cf   : > { %v1686_v8 = vsel %vm1685_vm15, %v1680_v55, %v1684_v45 }
0x10d0   : > { %v1688_v17 = vmul.f32 %v2672_v15, %v1686_v8  ;;  %v2523_v40 = vpop.f32.mrf.mxu0 }
0x10d1   : > { %v2524_v61 = vadd.f32 %v2523_v40, %v2490_v31 }
0x10d2   : > { %v1696_v36 = vadd.f32 %v1695_v39, %v1688_v17 }
0x10d3   : > { %v2528_v1 = vadd.f32 %v2524_v61, %v272_v12 }
0x10d4   : > { %v1699_v33 = vperm.slane %v1696_v36, 1  ;;  %v1698_v46 = vperm.slane %v1696_v36, 0  ;;  %v1717_v4 = vmul.f32 %v1716_v19, %v1696_v36 }
0x10d5   : > { %v2531_v25 = vrot.slane %v2528_v1, 7 }
0x10d6   : > { %v2510_v2 = vpop.f32.mrf.mxu2  ;;  %1704 = vrot.lane.b32.xlu1 %v1699_v33, %s2801_s18  ;;  %1702 = vrot.lane.b32.xlu0 %v1698_v46, %s2801_s18 }
0x10d7   : > { %v2511_v11 = vadd.f32 %v2510_v2, %v2490_v31 }
0x10d8   : > { %v2525_v27 = vpop.f32.mrf.mxu0 }
0x10d9   : > { %v2527_v29 = vadd.f32 %v2511_v11, %v271_v10 }
0x10db   : > { %v2532_v50 = vsel %vm1685_vm15, %v2527_v29, %v2531_v25 }
0x10dc   : > { %2538 = vst.msk [vmem:[%s256_s13] sm:$0x3] %vm4696_vm11, %v2532_v50 }
0x10de   : > { %v2512_v51 = vpop.f32.mrf.mxu2 }
0x1148   : > { %v1705_v34 = vpop.permute.xlu1 %1704  ;;  %v1703_v30 = vpop.permute.xlu0 %1702 }
0x1149   : > { %v1707_v23 = vsel %vm374_vm13, %v1705_v34, %v1703_v30  ;;  %v1706_v0 = vsel %vm374_vm13, %v1703_v30, %v1705_v34 }
0x114a   : > { %v1710_v10 = vrot.slane %v1707_v23, 7 }
0x114c   : > { %v1711_v47 = vsel %vm1685_vm15, %v1706_v0, %v1710_v10 }
0x114d   : > { %v1713_v21 = vsub.f32 %v1696_v36, %v1711_v47 }
0x114f   : > { %v1714_v59 = vand.u32 2147483647, %v1713_v21 }
0x1151   : > { %v1715_v41 = vmul.f32 %v2673_v7, %v1714_v59 }
0x1153   : > { %v1718_v37 = vadd.f32 %v1717_v4, %v1715_v41 }
0x1155   : > { %v1720_v18 = vperm.slane %v1718_v37, 0  ;;  %v1721_v56 = vperm.slane %v1718_v37, 1 }
0x1157   : > { %v1724_v42 = vsub.f32 %v1652_v48, %v1720_v18  ;;  %v1725_v63 = vsub.f32 %v1665_v28, %v1721_v56 }
0x1159   : > { %v1726_v35 = vmax.f32 %v1724_v42, 0.0  ;;  %v1727_v53 = vmax.f32 %v1725_v63, 0.0 }
0x115b   : > { %v1729_v38 = vmin.f32 %v1727_v53, 1.0  ;;  %v1728_v3 = vmin.f32 %v1726_v35, 1.0 }
0x115d   : > { %v2541_v22 = vrot.slane %v1729_v38, 7 }
0x115f   : > { %v2542_v5 = vsel %vm1685_vm15, %v1728_v3, %v2541_v22 }
0x1160   : > { %2544 = vst.msk [vmem:[%s261_s30] sm:$0x3] %vm4696_vm11, %v2542_v5 }
0x1161 PF: > { %p13_p9 = scmp.ge.s32.totalorder %s2853_s22, 4   ;;  %s4771_s18 = smov %s2791_s19 }
0x1162   : > { %s4772_s19 = smov %s2862_s25  ;;  %s4773_s20 = smov %s2853_s22 }
0x1163   :  { %15 = sbr.rel (!%p13_p9) target bundleno = 2 (0x2), region = 110 }

</bundles_post_ra>
